<compile_context>
chip_gen: v5e
topology: v5e:2x2
jax: 0.10.0
libtpu: 0.0.40
codegen_flags: <defaults>
</compile_context>

<pallas_src>
import functools

import jax
import jax.numpy as jnp
from jax.experimental import pallas as pl
from jax.experimental.pallas import tpu as pltpu

EPS = 1e-5                    # PyTorch BatchNorm2d default eps
EXPANSION = 4
LANE = 128                    # lane width: channel pad target (lane-dense IO)
MATMUL_DTYPE = jnp.float32    # jnp.bfloat16 -> ~2x MXU rate (loosens 1e-3 chk)
WPAD = 8                      # left/right W padding in the 3x3 VMEM scratch
                              # (8 keeps the interior store sublane-aligned)


def _tpu_vmem_bytes():
    try:
        return int(getattr(pltpu.get_tpu_info(), "vmem_capacity_bytes"))
    except Exception:
        return 64 << 20       # conservative (v7x-sized) fallback

_VMEM_BYTES = _tpu_vmem_bytes()
# ~96 MiB scoped limit on 128 MiB parts (v5e/v6e), ~48 MiB on 64 MiB v7x.
VMEM_LIMIT = min(96 << 20, (_VMEM_BYTES * 3) // 4)
TM_CAP = 1024 if _VMEM_BYTES >= (100 << 20) else 512
TILE_BUDGET = VMEM_LIMIT // 4


def _round_up(x, m):
    return (x + m - 1) // m * m


def _pick_tile_m(m, row_bytes):
    """Pick a row-tile size and the (possibly padded) total row count."""
    limit = min(m, TM_CAP, max(8, TILE_BUDGET // max(row_bytes, 1)))
    limit = max(8, (limit // 8) * 8)
    for t in range(limit, 7, -8):          # prefer an exact divisor: no pad
        if m % t == 0:
            return t, m
    n_tiles = -(-m // limit)               # pad M up to a tile multiple
    tm = min(limit, _round_up(-(-m // n_tiles), 8))
    return tm, _round_up(m, tm)


def _pad_to(a, shape):
    pads = [(0, t - s) for s, t in zip(a.shape, shape)]
    if all(p == (0, 0) for p in pads):
        return a
    return jnp.pad(a, pads)


# ----------------------------- Pallas kernels ------------------------------ #

def _conv1x1_kernel(*refs, fused, valid_rows):
    """1x1 conv tile: y = [relu(x*scale+shift)] @ w + per-tile (sum, sumsq)."""
    if fused:
        x_ref, w_ref, sc_ref, sh_ref, y_ref, s_ref = refs
    else:
        x_ref, w_ref, y_ref, s_ref = refs

    x = x_ref[...]
    if fused:
        # previous layer's BN + ReLU applied here: no extra HBM round trip
        x = jnp.maximum(x * sc_ref[...] + sh_ref[...], 0.0)
        if valid_rows is not None:
            # zero out padded rows so this conv's BN stats stay exact
            tm = x.shape[0]
            row = (pl.program_id(0) * tm
                   + jax.lax.broadcasted_iota(jnp.int32, (tm, 1), 0))
            x = jnp.where(row < valid_rows, x, 0.0)

    y = jnp.dot(x.astype(MATMUL_DTYPE), w_ref[...],
                preferred_element_type=jnp.float32)
    y_ref[...] = y
    # per-tile partial BN statistics (reduced in the wrapper) -> grid axis
    # stays "parallel" and there is no resident accumulator / RMW.
    s_ref[0, 0:1, :] = jnp.sum(y, axis=0, keepdims=True)
    s_ref[0, 1:2, :] = jnp.sum(y * y, axis=0, keepdims=True)


def _conv3x3_kernel(x_ref, w_ref, sc_ref, sh_ref, y_ref, s_ref, xp_ref, *,
                    stride, Ho, Wo):
    """3x3 conv (pad=1) for one sample; bn+relu of the input fused in-kernel.

    The zero border lives in the VMEM scratch `xp_ref`; nothing padded is ever
    written to HBM.  The interior sits at column offset WPAD (=8) so the store
    is sublane-aligned; taps read at offsets WPAD-1+dx.
    """
    H, W, Cin = x_ref.shape[1], x_ref.shape[2], x_ref.shape[3]
    Cout = w_ref.shape[-1]

    # bn1 + relu of the previous conv's raw output, applied to the whole tile.
    a = jnp.maximum(x_ref[0] * sc_ref[...] + sh_ref[...], 0.0)

    # Build the zero-padded sample in VMEM (zeroed every step: safe under
    # "parallel"/megacore sharding of the grid axis).
    xp_ref[...] = jnp.zeros_like(xp_ref)
    xp_ref[1:H + 1, WPAD:WPAD + W, :] = a.astype(MATMUL_DTYPE)

    out = jnp.zeros((Ho * Wo, Cout), jnp.float32)
    # TODO(synk): fold the taps into one K=3*Cin matmul per dy row (or a full
    # K=9*Cin im2col) for lane-aligned Cin so the MXU, not the VALU, does the
    # accumulation; per-tap keeps lowering simple for small / unaligned Cin.
    t = 0
    for dy in range(3):
        for dx in range(3):
            col = WPAD - 1 + dx
            if stride == 1:
                v = xp_ref[dy:dy + Ho, col:col + Wo, :]
            else:
                v = xp_ref[pl.ds(dy, Ho, stride), pl.ds(col, Wo, stride), :]
            out = out + jnp.dot(v.reshape(Ho * Wo, Cin), w_ref[t],
                                preferred_element_type=jnp.float32)
            t += 1

    y_ref[0] = out
    s_ref[0, 0:1, :] = jnp.sum(out, axis=0, keepdims=True)
    s_ref[0, 1:2, :] = jnp.sum(out * out, axis=0, keepdims=True)


def _bn_resid_relu_kernel(*refs, proj):
    """out = relu(y*scale+shift + residual[*rscale+rshift])  (all fused)."""
    if proj:
        y_ref, sc_ref, sh_ref, r_ref, rsc_ref, rsh_ref, o_ref = refs
    else:
        y_ref, sc_ref, sh_ref, r_ref, o_ref = refs
    out = y_ref[...] * sc_ref[...] + sh_ref[...]
    if proj:
        out = out + (r_ref[...] * rsc_ref[...] + rsh_ref[...])
    else:
        out = out + r_ref[...]
    o_ref[...] = jnp.maximum(out, 0.0)


# ------------------------------ kernel wrappers ----------------------------- #

def _conv1x1(x2d, w, scale=None, shift=None):
    """x2d: (M, Cin), w: (Cin, Cout) -> (y: (M, Cout), stats: (2, Cout)).

    If scale/shift are given, applies relu(x*scale+shift) in the kernel
    prologue (fused BN+ReLU of the previous layer).
    """
    M, Cin = x2d.shape
    Cout = w.shape[-1]
    fused = scale is not None

    tm, Mp = _pick_tile_m(M, 4 * (Cin + Cout) * 2)
    if Mp != M:
        x2d = jnp.pad(x2d, ((0, Mp - M), (0, 0)))
    grid = Mp // tm
    valid_rows = M if (fused and Mp != M) else None

    in_specs = [pl.BlockSpec((tm, Cin), lambda i: (i, 0)),
                pl.BlockSpec((Cin, Cout), lambda i: (0, 0))]
    args = [x2d, w.astype(MATMUL_DTYPE)]
    if fused:
        in_specs += [pl.BlockSpec((1, Cin), lambda i: (0, 0)),
                     pl.BlockSpec((1, Cin), lambda i: (0, 0))]
        args += [scale, shift]

    y, ps = pl.pallas_call(
        functools.partial(_conv1x1_kernel, fused=fused, valid_rows=valid_rows),
        grid=(grid,),
        in_specs=in_specs,
        out_specs=(pl.BlockSpec((tm, Cout), lambda i: (i, 0)),
                   pl.BlockSpec((1, 2, Cout), lambda i: (i, 0, 0))),
        out_shape=(jax.ShapeDtypeStruct((Mp, Cout), jnp.float32),
                   jax.ShapeDtypeStruct((grid, 2, Cout), jnp.float32)),
        compiler_params=pltpu.CompilerParams(
            dimension_semantics=("parallel",),
            vmem_limit_bytes=VMEM_LIMIT),
        cost_estimate=pl.CostEstimate(
            flops=2 * Mp * Cin * Cout, transcendentals=0,
            bytes_accessed=4 * (Mp * Cin + Cin * Cout + Mp * Cout)),
    )(*args)

    if Mp != M:
        y = y[:M]
    return y, jnp.sum(ps, axis=0)


def _conv3x3(x_nhwc, w, scale, shift, stride):
    """x: (N,H,W,Cin) raw conv1 output; applies relu(x*scale+shift) in-kernel,
    then a 3x3/pad=1/stride conv.  Returns (y: (N*Ho*Wo, Cout), stats, (Ho,Wo)).
    """
    N, H, W, Cin = x_nhwc.shape
    Cout = w.shape[-1]
    Ho = (H + 2 - 3) // stride + 1
    Wo = (W + 2 - 3) // stride + 1

    # TODO(synk): for large H*W (real ResNet stages) tile the 3x3 spatially
    # (output-row blocks with a 2-row halo) so per-step VMEM stays bounded on
    # v7x's 64 MiB and the pipeline gets deeper than grid=(N,).
    kern = functools.partial(_conv3x3_kernel, stride=stride, Ho=Ho, Wo=Wo)
    y, ps = pl.pallas_call(
        kern,
        grid=(N,),
        in_specs=(pl.BlockSpec((1, H, W, Cin), lambda n: (n, 0, 0, 0)),
                  pl.BlockSpec((9, Cin, Cout), lambda n: (0, 0, 0)),
                  pl.BlockSpec((1, Cin), lambda n: (0, 0)),
                  pl.BlockSpec((1, Cin), lambda n: (0, 0))),
        out_specs=(pl.BlockSpec((1, Ho * Wo, Cout), lambda n: (n, 0, 0)),
                   pl.BlockSpec((1, 2, Cout), lambda n: (n, 0, 0))),
        out_shape=(jax.ShapeDtypeStruct((N, Ho * Wo, Cout), jnp.float32),
                   jax.ShapeDtypeStruct((N, 2, Cout), jnp.float32)),
        scratch_shapes=[pltpu.VMEM((H + 2, W + 2 * WPAD, Cin), MATMUL_DTYPE)],
        compiler_params=pltpu.CompilerParams(
            dimension_semantics=("parallel",),
            vmem_limit_bytes=VMEM_LIMIT),
        cost_estimate=pl.CostEstimate(
            flops=2 * N * Ho * Wo * 9 * Cin * Cout, transcendentals=0,
            bytes_accessed=4 * (N * H * W * Cin + 9 * Cin * Cout
                                + N * Ho * Wo * Cout)),
    )(x_nhwc, w.astype(MATMUL_DTYPE), scale, shift)
    return y.reshape(N * Ho * Wo, Cout), jnp.sum(ps, axis=0), (Ho, Wo)


def _bn_residual_relu(y, scale, shift, resid, rscale=None, rshift=None):
    """Final fused pass: bn3 + residual add (raw or BN'd projection) + ReLU."""
    M, C = y.shape
    proj = rscale is not None

    tm, Mp = _pick_tile_m(M, 4 * C * 3 * 2)
    if Mp != M:
        y = jnp.pad(y, ((0, Mp - M), (0, 0)))
        resid = jnp.pad(resid, ((0, Mp - M), (0, 0)))

    tiled = pl.BlockSpec((tm, C), lambda i: (i, 0))
    chan = pl.BlockSpec((1, C), lambda i: (0, 0))
    in_specs = [tiled, chan, chan, tiled]
    args = [y, scale, shift, resid]
    if proj:
        in_specs += [chan, chan]
        args += [rscale, rshift]

    out = pl.pallas_call(
        functools.partial(_bn_resid_relu_kernel, proj=proj),
        grid=(Mp // tm,),
        in_specs=in_specs,
        out_specs=tiled,
        out_shape=jax.ShapeDtypeStruct((Mp, C), jnp.float32),
        compiler_params=pltpu.CompilerParams(
            dimension_semantics=("parallel",),
            vmem_limit_bytes=VMEM_LIMIT),
    )(*args)
    return out[:M] if Mp != M else out


def _bn_scale_shift(stats, gamma, beta, count):
    """(2, C) sum/sumsq -> per-channel (scale, shift), each (1, C), in f32.

    NOTE: E[y^2] - mean^2 in f32 can cancel for very large activation
    magnitudes; switch to a shifted / two-pass variance if tighter tolerance
    is ever required.  O(C) -> plain JAX is cheaper than a kernel launch.
    """
    inv = 1.0 / count
    mean = stats[0:1, :] * inv
    var = stats[1:2, :] * inv - mean * mean
    scale = gamma * jax.lax.rsqrt(var + EPS)
    shift = beta - mean * scale
    return scale, shift


# ------------------------------ Bottleneck block ----------------------------- #

def init_params(key, in_planes, planes):
    exp = EXPANSION
    ks = jax.random.split(key, 12)

    def rnd(k, shape):
        return jax.random.normal(k, shape, jnp.float32) * 0.1

    return dict(
        w1=rnd(ks[0], (in_planes, planes)),
        g1=rnd(ks[1], (1, planes)) + 1.0,
        b1=rnd(ks[2], (1, planes)),
        w2=rnd(ks[3], (9, planes, planes)),
        g2=rnd(ks[4], (1, planes)) + 1.0,
        b2=rnd(ks[5], (1, planes)),
        w3=rnd(ks[6], (planes, exp * planes)),
        g3=rnd(ks[7], (1, exp * planes)) + 1.0,
        b3=rnd(ks[8], (1, exp * planes)),
        ws=rnd(ks[9], (in_planes, exp * planes)),
        gs=rnd(ks[10], (1, exp * planes)) + 1.0,
        bs=rnd(ks[11], (1, exp * planes)),
    )


def bottleneck_forward(x_nchw, params, *, in_planes, planes, stride=1):
    exp = EXPANSION
    # Lane-dense channel padding: zero-padded weights / gamma / beta keep the
    # padded channels identically zero, so real channels are unaffected.
    cin_p = _round_up(in_planes, LANE)
    p_p = _round_up(planes, LANE)
    e_p = _round_up(exp * planes, LANE)

    x = jnp.transpose(x_nchw, (0, 2, 3, 1)).astype(jnp.float32)   # NCHW->NHWC
    N, H, W, _ = x.shape
    x = _pad_to(x, (N, H, W, cin_p))
    M1 = N * H * W

    w1 = _pad_to(params['w1'], (cin_p, p_p))
    g1 = _pad_to(params['g1'], (1, p_p))
    b1 = _pad_to(params['b1'], (1, p_p))
    w2 = _pad_to(params['w2'], (9, p_p, p_p))
    g2 = _pad_to(params['g2'], (1, p_p))
    b2 = _pad_to(params['b2'], (1, p_p))
    w3 = _pad_to(params['w3'], (p_p, e_p))
    g3 = _pad_to(params['g3'], (1, e_p))
    b3 = _pad_to(params['b3'], (1, e_p))

    # conv1 (1x1).  bn1 + relu are folded into conv2's prologue.
    y1, s1 = _conv1x1(x.reshape(M1, cin_p), w1)
    sc1, sh1 = _bn_scale_shift(s1, g1, b1, M1)

    # conv2 (3x3, stride, pad=1); applies bn1+relu in-kernel; zero border is
    # built in VMEM (no HBM jnp.pad).  bn2 + relu fold into conv3's prologue.
    y2, s2, (Ho, Wo) = _conv3x3(y1.reshape(N, H, W, p_p), w2, sc1, sh1, stride)
    M2 = N * Ho * Wo
    sc2, sh2 = _bn_scale_shift(s2, g2, b2, M2)

    # conv3 (1x1) with bn2+relu prologue.
    y3, s3 = _conv1x1(y2, w3, scale=sc2, shift=sh2)
    sc3, sh3 = _bn_scale_shift(s3, g3, b3, M2)

    if stride != 1 or in_planes != exp * planes:
        ws = _pad_to(params['ws'], (cin_p, e_p))
        gs = _pad_to(params['gs'], (1, e_p))
        bs = _pad_to(params['bs'], (1, e_p))
        # TODO(synk): when stride != 1, fold the striding into the projection
        # conv's BlockSpec index_map instead of this wrapper-side slice.
        xs = x if stride == 1 else x[:, ::stride, ::stride, :]
        ys, ss = _conv1x1(xs.reshape(M2, cin_p), ws)
        scs, shs = _bn_scale_shift(ss, gs, bs, M2)
        out = _bn_residual_relu(y3, sc3, sh3, ys, scs, shs)
    else:
        out = _bn_residual_relu(y3, sc3, sh3, x.reshape(M1, cin_p))

    out = out.reshape(N, Ho, Wo, e_p)[..., :exp * planes]
    return jnp.transpose(out, (0, 3, 1, 2))          # NHWC -> NCHW


# ------------------------------ pure-JAX reference --------------------------- #

def reference_forward(x_nchw, params, *, in_planes, planes, stride=1):
    exp = EXPANSION
    x = jnp.transpose(x_nchw, (0, 2, 3, 1)).astype(jnp.float32)

    def bn(y, g, b):
        mean = jnp.mean(y, axis=(0, 1, 2), keepdims=True)
        var = jnp.mean((y - mean) ** 2, axis=(0, 1, 2), keepdims=True)
        return (g.reshape(1, 1, 1, -1) * (y - mean) / jnp.sqrt(var + EPS)
                + b.reshape(1, 1, 1, -1))

    def conv1x1(y, w, s=1):
        if s != 1:
            y = y[:, ::s, ::s, :]
        return jnp.einsum('nhwc,co->nhwo', y, w)

    def conv3x3(y, w, s):
        w_hwio = w.reshape(3, 3, w.shape[1], w.shape[2])
        return jax.lax.conv_general_dilated(
            y, w_hwio, window_strides=(s, s), padding=((1, 1), (1, 1)),
            dimension_numbers=('NHWC', 'HWIO', 'NHWC'))

    out = jax.nn.relu(bn(conv1x1(x, params['w1']), params['g1'], params['b1']))
    out = jax.nn.relu(bn(conv3x3(out, params['w2'], stride),
                         params['g2'], params['b2']))
    out = bn(conv1x1(out, params['w3']), params['g3'], params['b3'])
    if stride != 1 or in_planes != exp * planes:
        sc = bn(conv1x1(x, params['ws'], stride), params['gs'], params['bs'])
    else:
        sc = x
    out = jax.nn.relu(out + sc)
    return jnp.transpose(out, (0, 3, 1, 2))


# ----------------------------------- main ------------------------------------ #

if __name__ == "__main__":
    key = jax.random.PRNGKey(0)
    kx, kp = jax.random.split(key)

    in_planes, planes, stride = 4, 4, 1
    x = jax.random.normal(kx, (2, in_planes, 16, 16), jnp.float32)  # NCHW input
    params = init_params(kp, in_planes, planes)

    fwd = jax.jit(functools.partial(bottleneck_forward, in_planes=in_planes,
                                    planes=planes, stride=stride))
    out = jax.block_until_ready(fwd(x, params))
    assert out.shape == (2, EXPANSION * planes, 16, 16)

    ref = jax.block_until_ready(
        reference_forward(x, params, in_planes=in_planes, planes=planes,
                          stride=stride))
    err = float(jnp.max(jnp.abs(out - ref)))
    assert err < 1e-3, f"mismatch vs reference: max abs err = {err}"

    print("KERNEL_OK")
</pallas_src>

<mosaic_0001>
module attributes {stable_mosaic.version = 11 : i64} {
  func.func @_conv1x1_kernel(%arg0: i32, %arg1: memref<512x128xf32, #tpu.memory_space<vmem>>, %arg2: memref<128x128xf32, #tpu.memory_space<vmem>>, %arg3: memref<512x128xf32, #tpu.memory_space<vmem>>, %arg4: memref<1x2x128xf32, #tpu.memory_space<vmem>>) attributes {dimension_semantics = [#tpu.dimension_semantics<parallel>], iteration_bounds = array<i64: 1>, scalar_prefetch = 0 : i64, scratch_operands = 0 : i64, tpu.core_type = #tpu.core_type<tc>, window_params = [{transform_indices = @transform_0, window_bounds = array<i64: 512, 128>}, {pipeline_mode = #tpu.pipeline_mode<synchronous>, transform_indices = @transform_1, window_bounds = array<i64: 128, 128>}, {transform_indices = @transform_2, window_bounds = array<i64: 512, 128>}, {transform_indices = @transform_3, window_bounds = array<i64: 1, 2, 128>}]} {
    %c0 = arith.constant 0 : index
    %c0_0 = arith.constant 0 : index
    %0 = vector.load %arg1[%c0, %c0_0] : memref<512x128xf32, #tpu.memory_space<vmem>>, vector<512x128xf32>
    %c0_1 = arith.constant 0 : index
    %c0_2 = arith.constant 0 : index
    %1 = vector.load %arg2[%c0_1, %c0_2] : memref<128x128xf32, #tpu.memory_space<vmem>>, vector<128x128xf32>
    %cst = arith.constant dense<0.000000e+00> : vector<512x128xf32>
    %2 = tpu.matmul %0, %1, %cst {dimension_numbers = #tpu.dot_dimension_numbers<[1], [0], [0], [1], [0, 0, 1, 1], [], []>} : vector<512x128xf32>, vector<128x128xf32>, vector<512x128xf32> -> vector<512x128xf32>
    %c0_3 = arith.constant 0 : index
    %c0_4 = arith.constant 0 : index
    %3 = vector.load %arg3[%c0_3, %c0_4] : memref<512x128xf32, #tpu.memory_space<vmem>>, vector<512x128xf32>
    tpu.vector_store %arg3[%c0_3, %c0_4], %2 {strides = array<i32>} : memref<512x128xf32, #tpu.memory_space<vmem>>, vector<512x128xf32>,
    %cst_5 = arith.constant dense<0.000000e+00> : vector<128xf32>
    %4 = vector.multi_reduction <add>, %2, %cst_5 [0] : vector<512x128xf32> to vector<128xf32>
    %5 = vector.shape_cast %4 : vector<128xf32> to vector<1x128xf32>
    %c0_6 = arith.constant 0 : index
    %c0_7 = arith.constant 0 : index
    %c0_8 = arith.constant 0 : index
    %6 = vector.load %arg4[%c0_6, %c0_7, %c0_8] : memref<1x2x128xf32, #tpu.memory_space<vmem>>, vector<1x1x128xf32>
    %7 = vector.shape_cast %6 : vector<1x1x128xf32> to vector<1x128xf32>
    %8 = vector.shape_cast %5 : vector<1x128xf32> to vector<1x1x128xf32>
    tpu.vector_store %arg4[%c0_6, %c0_7, %c0_8], %8 {strides = array<i32>} : memref<1x2x128xf32, #tpu.memory_space<vmem>>, vector<1x1x128xf32>,
    %9 = arith.mulf %2, %2 : vector<512x128xf32>
    %cst_9 = arith.constant dense<0.000000e+00> : vector<128xf32>
    %10 = vector.multi_reduction <add>, %9, %cst_9 [0] : vector<512x128xf32> to vector<128xf32>
    %11 = vector.shape_cast %10 : vector<128xf32> to vector<1x128xf32>
    %c0_10 = arith.constant 0 : index
    %c1 = arith.constant 1 : index
    %c0_11 = arith.constant 0 : index
    %12 = vector.load %arg4[%c0_10, %c1, %c0_11] : memref<1x2x128xf32, #tpu.memory_space<vmem>>, vector<1x1x128xf32>
    %13 = vector.shape_cast %12 : vector<1x1x128xf32> to vector<1x128xf32>
    %14 = vector.shape_cast %11 : vector<1x128xf32> to vector<1x1x128xf32>
    tpu.vector_store %arg4[%c0_10, %c1, %c0_11], %14 {strides = array<i32>} : memref<1x2x128xf32, #tpu.memory_space<vmem>>, vector<1x1x128xf32>,
    return
  }
  func.func @transform_0(%arg0: i32) -> (i32, i32) {
    %c0_i32 = arith.constant 0 : i32
    %c0_i32_0 = arith.constant 0 : i32
    return %arg0, %c0_i32 : i32, i32
  }
  func.func @transform_1(%arg0: i32) -> (i32, i32) {
    %c0_i32 = arith.constant 0 : i32
    %c0_i32_0 = arith.constant 0 : i32
    %c0_i32_1 = arith.constant 0 : i32
    return %c0_i32, %c0_i32_0 : i32, i32
  }
  func.func @transform_2(%arg0: i32) -> (i32, i32) {
    %c0_i32 = arith.constant 0 : i32
    %c0_i32_0 = arith.constant 0 : i32
    return %arg0, %c0_i32 : i32, i32
  }
  func.func @transform_3(%arg0: i32) -> (i32, i32, i32) {
    %c0_i32 = arith.constant 0 : i32
    %c0_i32_0 = arith.constant 0 : i32
    %c0_i32_1 = arith.constant 0 : i32
    return %arg0, %c0_i32, %c0_i32_0 : i32, i32, i32
  }
}

module attributes {stable_mosaic.version = 11 : i64} {
  func.func @_conv3x3_kernel(%arg0: i32, %arg1: memref<1x16x16x128xf32, #tpu.memory_space<vmem>>, %arg2: memref<9x128x128xf32, #tpu.memory_space<vmem>>, %arg3: memref<1x128xf32, #tpu.memory_space<vmem>>, %arg4: memref<1x128xf32, #tpu.memory_space<vmem>>, %arg5: memref<1x256x128xf32, #tpu.memory_space<vmem>>, %arg6: memref<1x2x128xf32, #tpu.memory_space<vmem>>, %arg7: memref<18x32x128xf32, #tpu.memory_space<vmem>>) attributes {dimension_semantics = [#tpu.dimension_semantics<parallel>], iteration_bounds = array<i64: 2>, scalar_prefetch = 0 : i64, scratch_operands = 1 : i64, tpu.core_type = #tpu.core_type<tc>, window_params = [{transform_indices = @transform_0, window_bounds = array<i64: 1, 16, 16, 128>}, {pipeline_mode = #tpu.pipeline_mode<synchronous>, transform_indices = @transform_1, window_bounds = array<i64: 9, 128, 128>}, {pipeline_mode = #tpu.pipeline_mode<synchronous>, transform_indices = @transform_2, window_bounds = array<i64: 1, 128>}, {pipeline_mode = #tpu.pipeline_mode<synchronous>, transform_indices = @transform_3, window_bounds = array<i64: 1, 128>}, {transform_indices = @transform_4, window_bounds = array<i64: 1, 256, 128>}, {transform_indices = @transform_5, window_bounds = array<i64: 1, 2, 128>}]} {
    %c0 = arith.constant 0 : index
    %c0_0 = arith.constant 0 : index
    %c0_1 = arith.constant 0 : index
    %c0_2 = arith.constant 0 : index
    %0 = vector.load %arg1[%c0, %c0_0, %c0_1, %c0_2] : memref<1x16x16x128xf32, #tpu.memory_space<vmem>>, vector<1x16x16x128xf32>
    %1 = vector.shape_cast %0 : vector<1x16x16x128xf32> to vector<16x16x128xf32>
    %c0_3 = arith.constant 0 : index
    %c0_4 = arith.constant 0 : index
    %2 = vector.load %arg3[%c0_3, %c0_4] : memref<1x128xf32, #tpu.memory_space<vmem>>, vector<1x128xf32>
    %3 = vector.shape_cast %2 : vector<1x128xf32> to vector<1x1x128xf32>
    %4 = vector.broadcast %3 : vector<1x1x128xf32> to vector<16x16x128xf32>
    %5 = arith.mulf %1, %4 : vector<16x16x128xf32>
    %c0_5 = arith.constant 0 : index
    %c0_6 = arith.constant 0 : index
    %6 = vector.load %arg4[%c0_5, %c0_6] : memref<1x128xf32, #tpu.memory_space<vmem>>, vector<1x128xf32>
    %7 = vector.shape_cast %6 : vector<1x128xf32> to vector<1x1x128xf32>
    %8 = vector.broadcast %7 : vector<1x1x128xf32> to vector<16x16x128xf32>
    %9 = arith.addf %5, %8 : vector<16x16x128xf32>
    %cst = arith.constant 0.000000e+00 : f32
    %10 = vector.broadcast %cst : f32 to vector<16x16x128xf32>
    %11 = arith.maximumf %9, %10 : vector<16x16x128xf32>
    %cst_7 = arith.constant 0.000000e+00 : f32
    %12 = vector.broadcast %cst_7 : f32 to vector<18x32x128xf32>
    %c0_8 = arith.constant 0 : index
    %c0_9 = arith.constant 0 : index
    %c0_10 = arith.constant 0 : index
    %13 = vector.load %arg7[%c0_8, %c0_9, %c0_10] : memref<18x32x128xf32, #tpu.memory_space<vmem>>, vector<18x32x128xf32>
    tpu.vector_store %arg7[%c0_8, %c0_9, %c0_10], %12 {strides = array<i32>} : memref<18x32x128xf32, #tpu.memory_space<vmem>>, vector<18x32x128xf32>,
    %c1 = arith.constant 1 : index
    %c8 = arith.constant 8 : index
    %c0_11 = arith.constant 0 : index
    %14 = vector.load %arg7[%c1, %c8, %c0_11] : memref<18x32x128xf32, #tpu.memory_space<vmem>>, vector<16x16x128xf32>
    tpu.vector_store %arg7[%c1, %c8, %c0_11], %11 {strides = array<i32>} : memref<18x32x128xf32, #tpu.memory_space<vmem>>, vector<16x16x128xf32>,
    %cst_12 = arith.constant 0.000000e+00 : f32
    %15 = vector.broadcast %cst_12 : f32 to vector<256x128xf32>
    %c0_13 = arith.constant 0 : index
    %c7 = arith.constant 7 : index
    %c0_14 = arith.constant 0 : index
    %16 = vector.load %arg7[%c0_13, %c7, %c0_14] : memref<18x32x128xf32, #tpu.memory_space<vmem>>, vector<16x16x128xf32>
    %17 = vector.shape_cast %16 : vector<16x16x128xf32> to vector<256x128xf32>
    %c0_15 = arith.constant 0 : index
    %c0_16 = arith.constant 0 : index
    %c0_17 = arith.constant 0 : index
    %18 = vector.load %arg2[%c0_15, %c0_16, %c0_17] : memref<9x128x128xf32, #tpu.memory_space<vmem>>, vector<1x128x128xf32>
    %19 = vector.shape_cast %18 : vector<1x128x128xf32> to vector<128x128xf32>
    %cst_18 = arith.constant dense<0.000000e+00> : vector<256x128xf32>
    %20 = tpu.matmul %17, %19, %cst_18 {dimension_numbers = #tpu.dot_dimension_numbers<[1], [0], [0], [1], [0, 0, 1, 1], [], []>} : vector<256x128xf32>, vector<128x128xf32>, vector<256x128xf32> -> vector<256x128xf32>
    %21 = arith.addf %15, %20 : vector<256x128xf32>
    %c0_19 = arith.constant 0 : index
    %c8_20 = arith.constant 8 : index
    %c0_21 = arith.constant 0 : index
    %22 = vector.load %arg7[%c0_19, %c8_20, %c0_21] : memref<18x32x128xf32, #tpu.memory_space<vmem>>, vector<16x16x128xf32>
    %23 = vector.shape_cast %22 : vector<16x16x128xf32> to vector<256x128xf32>
    %c1_22 = arith.constant 1 : index
    %c0_23 = arith.constant 0 : index
    %c0_24 = arith.constant 0 : index
    %24 = vector.load %arg2[%c1_22, %c0_23, %c0_24] : memref<9x128x128xf32, #tpu.memory_space<vmem>>, vector<1x128x128xf32>
    %25 = vector.shape_cast %24 : vector<1x128x128xf32> to vector<128x128xf32>
    %cst_25 = arith.constant dense<0.000000e+00> : vector<256x128xf32>
    %26 = tpu.matmul %23, %25, %cst_25 {dimension_numbers = #tpu.dot_dimension_numbers<[1], [0], [0], [1], [0, 0, 1, 1], [], []>} : vector<256x128xf32>, vector<128x128xf32>, vector<256x128xf32> -> vector<256x128xf32>
    %27 = arith.addf %21, %26 : vector<256x128xf32>
    %c0_26 = arith.constant 0 : index
    %c9 = arith.constant 9 : index
    %c0_27 = arith.constant 0 : index
    %28 = vector.load %arg7[%c0_26, %c9, %c0_27] : memref<18x32x128xf32, #tpu.memory_space<vmem>>, vector<16x16x128xf32>
    %29 = vector.shape_cast %28 : vector<16x16x128xf32> to vector<256x128xf32>
    %c2 = arith.constant 2 : index
    %c0_28 = arith.constant 0 : index
    %c0_29 = arith.constant 0 : index
    %30 = vector.load %arg2[%c2, %c0_28, %c0_29] : memref<9x128x128xf32, #tpu.memory_space<vmem>>, vector<1x128x128xf32>
    %31 = vector.shape_cast %30 : vector<1x128x128xf32> to vector<128x128xf32>
    %cst_30 = arith.constant dense<0.000000e+00> : vector<256x128xf32>
    %32 = tpu.matmul %29, %31, %cst_30 {dimension_numbers = #tpu.dot_dimension_numbers<[1], [0], [0], [1], [0, 0, 1, 1], [], []>} : vector<256x128xf32>, vector<128x128xf32>, vector<256x128xf32> -> vector<256x128xf32>
    %33 = arith.addf %27, %32 : vector<256x128xf32>
    %c1_31 = arith.constant 1 : index
    %c7_32 = arith.constant 7 : index
    %c0_33 = arith.constant 0 : index
    %34 = vector.load %arg7[%c1_31, %c7_32, %c0_33] : memref<18x32x128xf32, #tpu.memory_space<vmem>>, vector<16x16x128xf32>
    %35 = vector.shape_cast %34 : vector<16x16x128xf32> to vector<256x128xf32>
    %c3 = arith.constant 3 : index
    %c0_34 = arith.constant 0 : index
    %c0_35 = arith.constant 0 : index
    %36 = vector.load %arg2[%c3, %c0_34, %c0_35] : memref<9x128x128xf32, #tpu.memory_space<vmem>>, vector<1x128x128xf32>
    %37 = vector.shape_cast %36 : vector<1x128x128xf32> to vector<128x128xf32>
    %cst_36 = arith.constant dense<0.000000e+00> : vector<256x128xf32>
    %38 = tpu.matmul %35, %37, %cst_36 {dimension_numbers = #tpu.dot_dimension_numbers<[1], [0], [0], [1], [0, 0, 1, 1], [], []>} : vector<256x128xf32>, vector<128x128xf32>, vector<256x128xf32> -> vector<256x128xf32>
    %39 = arith.addf %33, %38 : vector<256x128xf32>
    %c1_37 = arith.constant 1 : index
    %c8_38 = arith.constant 8 : index
    %c0_39 = arith.constant 0 : index
    %40 = vector.load %arg7[%c1_37, %c8_38, %c0_39] : memref<18x32x128xf32, #tpu.memory_space<vmem>>, vector<16x16x128xf32>
    %41 = vector.shape_cast %40 : vector<16x16x128xf32> to vector<256x128xf32>
    %c4 = arith.constant 4 : index
    %c0_40 = arith.constant 0 : index
    %c0_41 = arith.constant 0 : index
    %42 = vector.load %arg2[%c4, %c0_40, %c0_41] : memref<9x128x128xf32, #tpu.memory_space<vmem>>, vector<1x128x128xf32>
    %43 = vector.shape_cast %42 : vector<1x128x128xf32> to vector<128x128xf32>
    %cst_42 = arith.constant dense<0.000000e+00> : vector<256x128xf32>
    %44 = tpu.matmul %41, %43, %cst_42 {dimension_numbers = #tpu.dot_dimension_numbers<[1], [0], [0], [1], [0, 0, 1, 1], [], []>} : vector<256x128xf32>, vector<128x128xf32>, vector<256x128xf32> -> vector<256x128xf32>
    %45 = arith.addf %39, %44 : vector<256x128xf32>
    %c1_43 = arith.constant 1 : index
    %c9_44 = arith.constant 9 : index
    %c0_45 = arith.constant 0 : index
    %46 = vector.load %arg7[%c1_43, %c9_44, %c0_45] : memref<18x32x128xf32, #tpu.memory_space<vmem>>, vector<16x16x128xf32>
    %47 = vector.shape_cast %46 : vector<16x16x128xf32> to vector<256x128xf32>
    %c5 = arith.constant 5 : index
    %c0_46 = arith.constant 0 : index
    %c0_47 = arith.constant 0 : index
    %48 = vector.load %arg2[%c5, %c0_46, %c0_47] : memref<9x128x128xf32, #tpu.memory_space<vmem>>, vector<1x128x128xf32>
    %49 = vector.shape_cast %48 : vector<1x128x128xf32> to vector<128x128xf32>
    %cst_48 = arith.constant dense<0.000000e+00> : vector<256x128xf32>
    %50 = tpu.matmul %47, %49, %cst_48 {dimension_numbers = #tpu.dot_dimension_numbers<[1], [0], [0], [1], [0, 0, 1, 1], [], []>} : vector<256x128xf32>, vector<128x128xf32>, vector<256x128xf32> -> vector<256x128xf32>
    %51 = arith.addf %45, %50 : vector<256x128xf32>
    %c2_49 = arith.constant 2 : index
    %c7_50 = arith.constant 7 : index
    %c0_51 = arith.constant 0 : index
    %52 = vector.load %arg7[%c2_49, %c7_50, %c0_51] : memref<18x32x128xf32, #tpu.memory_space<vmem>>, vector<16x16x128xf32>
    %53 = vector.shape_cast %52 : vector<16x16x128xf32> to vector<256x128xf32>
    %c6 = arith.constant 6 : index
    %c0_52 = arith.constant 0 : index
    %c0_53 = arith.constant 0 : index
    %54 = vector.load %arg2[%c6, %c0_52, %c0_53] : memref<9x128x128xf32, #tpu.memory_space<vmem>>, vector<1x128x128xf32>
    %55 = vector.shape_cast %54 : vector<1x128x128xf32> to vector<128x128xf32>
    %cst_54 = arith.constant dense<0.000000e+00> : vector<256x128xf32>
    %56 = tpu.matmul %53, %55, %cst_54 {dimension_numbers = #tpu.dot_dimension_numbers<[1], [0], [0], [1], [0, 0, 1, 1], [], []>} : vector<256x128xf32>, vector<128x128xf32>, vector<256x128xf32> -> vector<256x128xf32>
    %57 = arith.addf %51, %56 : vector<256x128xf32>
    %c2_55 = arith.constant 2 : index
    %c8_56 = arith.constant 8 : index
    %c0_57 = arith.constant 0 : index
    %58 = vector.load %arg7[%c2_55, %c8_56, %c0_57] : memref<18x32x128xf32, #tpu.memory_space<vmem>>, vector<16x16x128xf32>
    %59 = vector.shape_cast %58 : vector<16x16x128xf32> to vector<256x128xf32>
    %c7_58 = arith.constant 7 : index
    %c0_59 = arith.constant 0 : index
    %c0_60 = arith.constant 0 : index
    %60 = vector.load %arg2[%c7_58, %c0_59, %c0_60] : memref<9x128x128xf32, #tpu.memory_space<vmem>>, vector<1x128x128xf32>
    %61 = vector.shape_cast %60 : vector<1x128x128xf32> to vector<128x128xf32>
    %cst_61 = arith.constant dense<0.000000e+00> : vector<256x128xf32>
    %62 = tpu.matmul %59, %61, %cst_61 {dimension_numbers = #tpu.dot_dimension_numbers<[1], [0], [0], [1], [0, 0, 1, 1], [], []>} : vector<256x128xf32>, vector<128x128xf32>, vector<256x128xf32> -> vector<256x128xf32>
    %63 = arith.addf %57, %62 : vector<256x128xf32>
    %c2_62 = arith.constant 2 : index
    %c9_63 = arith.constant 9 : index
    %c0_64 = arith.constant 0 : index
    %64 = vector.load %arg7[%c2_62, %c9_63, %c0_64] : memref<18x32x128xf32, #tpu.memory_space<vmem>>, vector<16x16x128xf32>
    %65 = vector.shape_cast %64 : vector<16x16x128xf32> to vector<256x128xf32>
    %c8_65 = arith.constant 8 : index
    %c0_66 = arith.constant 0 : index
    %c0_67 = arith.constant 0 : index
    %66 = vector.load %arg2[%c8_65, %c0_66, %c0_67] : memref<9x128x128xf32, #tpu.memory_space<vmem>>, vector<1x128x128xf32>
    %67 = vector.shape_cast %66 : vector<1x128x128xf32> to vector<128x128xf32>
    %cst_68 = arith.constant dense<0.000000e+00> : vector<256x128xf32>
    %68 = tpu.matmul %65, %67, %cst_68 {dimension_numbers = #tpu.dot_dimension_numbers<[1], [0], [0], [1], [0, 0, 1, 1], [], []>} : vector<256x128xf32>, vector<128x128xf32>, vector<256x128xf32> -> vector<256x128xf32>
    %69 = arith.addf %63, %68 : vector<256x128xf32>
    %c0_69 = arith.constant 0 : index
    %c0_70 = arith.constant 0 : index
    %c0_71 = arith.constant 0 : index
    %70 = vector.load %arg5[%c0_69, %c0_70, %c0_71] : memref<1x256x128xf32, #tpu.memory_space<vmem>>, vector<1x256x128xf32>
    %71 = vector.shape_cast %70 : vector<1x256x128xf32> to vector<256x128xf32>
    %72 = vector.shape_cast %69 : vector<256x128xf32> to vector<1x256x128xf32>
    tpu.vector_store %arg5[%c0_69, %c0_70, %c0_71], %72 {strides = array<i32>} : memref<1x256x128xf32, #tpu.memory_space<vmem>>, vector<1x256x128xf32>,
    %cst_72 = arith.constant dense<0.000000e+00> : vector<128xf32>
    %73 = vector.multi_reduction <add>, %69, %cst_72 [0] : vector<256x128xf32> to vector<128xf32>
    %74 = vector.shape_cast %73 : vector<128xf32> to vector<1x128xf32>
    %c0_73 = arith.constant 0 : index
    %c0_74 = arith.constant 0 : index
    %c0_75 = arith.constant 0 : index
    %75 = vector.load %arg6[%c0_73, %c0_74, %c0_75] : memref<1x2x128xf32, #tpu.memory_space<vmem>>, vector<1x1x128xf32>
    %76 = vector.shape_cast %75 : vector<1x1x128xf32> to vector<1x128xf32>
    %77 = vector.shape_cast %74 : vector<1x128xf32> to vector<1x1x128xf32>
    tpu.vector_store %arg6[%c0_73, %c0_74, %c0_75], %77 {strides = array<i32>} : memref<1x2x128xf32, #tpu.memory_space<vmem>>, vector<1x1x128xf32>,
    %78 = arith.mulf %69, %69 : vector<256x128xf32>
    %cst_76 = arith.constant dense<0.000000e+00> : vector<128xf32>
    %79 = vector.multi_reduction <add>, %78, %cst_76 [0] : vector<256x128xf32> to vector<128xf32>
    %80 = vector.shape_cast %79 : vector<128xf32> to vector<1x128xf32>
    %c0_77 = arith.constant 0 : index
    %c1_78 = arith.constant 1 : index
    %c0_79 = arith.constant 0 : index
    %81 = vector.load %arg6[%c0_77, %c1_78, %c0_79] : memref<1x2x128xf32, #tpu.memory_space<vmem>>, vector<1x1x128xf32>
    %82 = vector.shape_cast %81 : vector<1x1x128xf32> to vector<1x128xf32>
    %83 = vector.shape_cast %80 : vector<1x128xf32> to vector<1x1x128xf32>
    tpu.vector_store %arg6[%c0_77, %c1_78, %c0_79], %83 {strides = array<i32>} : memref<1x2x128xf32, #tpu.memory_space<vmem>>, vector<1x1x128xf32>,
    return
  }
  func.func @transform_0(%arg0: i32) -> (i32, i32, i32, i32) {
    %c0_i32 = arith.constant 0 : i32
    %c0_i32_0 = arith.constant 0 : i32
    %c0_i32_1 = arith.constant 0 : i32
    %c0_i32_2 = arith.constant 0 : i32
    return %arg0, %c0_i32, %c0_i32_0, %c0_i32_1 : i32, i32, i32, i32
  }
  func.func @transform_1(%arg0: i32) -> (i32, i32, i32) {
    %c0_i32 = arith.constant 0 : i32
    %c0_i32_0 = arith.constant 0 : i32
    %c0_i32_1 = arith.constant 0 : i32
    %c0_i32_2 = arith.constant 0 : i32
    return %c0_i32, %c0_i32_0, %c0_i32_1 : i32, i32, i32
  }
  func.func @transform_2(%arg0: i32) -> (i32, i32) {
    %c0_i32 = arith.constant 0 : i32
    %c0_i32_0 = arith.constant 0 : i32
    %c0_i32_1 = arith.constant 0 : i32
    return %c0_i32, %c0_i32_0 : i32, i32
  }
  func.func @transform_3(%arg0: i32) -> (i32, i32) {
    %c0_i32 = arith.constant 0 : i32
    %c0_i32_0 = arith.constant 0 : i32
    %c0_i32_1 = arith.constant 0 : i32
    return %c0_i32, %c0_i32_0 : i32, i32
  }
  func.func @transform_4(%arg0: i32) -> (i32, i32, i32) {
    %c0_i32 = arith.constant 0 : i32
    %c0_i32_0 = arith.constant 0 : i32
    %c0_i32_1 = arith.constant 0 : i32
    return %arg0, %c0_i32, %c0_i32_0 : i32, i32, i32
  }
  func.func @transform_5(%arg0: i32) -> (i32, i32, i32) {
    %c0_i32 = arith.constant 0 : i32
    %c0_i32_0 = arith.constant 0 : i32
    %c0_i32_1 = arith.constant 0 : i32
    return %arg0, %c0_i32, %c0_i32_0 : i32, i32, i32
  }
}

module attributes {stable_mosaic.version = 11 : i64} {
  func.func @_conv1x1_kernel(%arg0: i32, %arg1: memref<512x128xf32, #tpu.memory_space<vmem>>, %arg2: memref<128x128xf32, #tpu.memory_space<vmem>>, %arg3: memref<1x128xf32, #tpu.memory_space<vmem>>, %arg4: memref<1x128xf32, #tpu.memory_space<vmem>>, %arg5: memref<512x128xf32, #tpu.memory_space<vmem>>, %arg6: memref<1x2x128xf32, #tpu.memory_space<vmem>>) attributes {dimension_semantics = [#tpu.dimension_semantics<parallel>], iteration_bounds = array<i64: 1>, scalar_prefetch = 0 : i64, scratch_operands = 0 : i64, tpu.core_type = #tpu.core_type<tc>, window_params = [{transform_indices = @transform_0, window_bounds = array<i64: 512, 128>}, {pipeline_mode = #tpu.pipeline_mode<synchronous>, transform_indices = @transform_1, window_bounds = array<i64: 128, 128>}, {pipeline_mode = #tpu.pipeline_mode<synchronous>, transform_indices = @transform_2, window_bounds = array<i64: 1, 128>}, {pipeline_mode = #tpu.pipeline_mode<synchronous>, transform_indices = @transform_3, window_bounds = array<i64: 1, 128>}, {transform_indices = @transform_4, window_bounds = array<i64: 512, 128>}, {transform_indices = @transform_5, window_bounds = array<i64: 1, 2, 128>}]} {
    %c0 = arith.constant 0 : index
    %c0_0 = arith.constant 0 : index
    %0 = vector.load %arg1[%c0, %c0_0] : memref<512x128xf32, #tpu.memory_space<vmem>>, vector<512x128xf32>
    %c0_1 = arith.constant 0 : index
    %c0_2 = arith.constant 0 : index
    %1 = vector.load %arg3[%c0_1, %c0_2] : memref<1x128xf32, #tpu.memory_space<vmem>>, vector<1x128xf32>
    %2 = vector.broadcast %1 : vector<1x128xf32> to vector<512x128xf32>
    %3 = arith.mulf %0, %2 : vector<512x128xf32>
    %c0_3 = arith.constant 0 : index
    %c0_4 = arith.constant 0 : index
    %4 = vector.load %arg4[%c0_3, %c0_4] : memref<1x128xf32, #tpu.memory_space<vmem>>, vector<1x128xf32>
    %5 = vector.broadcast %4 : vector<1x128xf32> to vector<512x128xf32>
    %6 = arith.addf %3, %5 : vector<512x128xf32>
    %cst = arith.constant 0.000000e+00 : f32
    %7 = vector.broadcast %cst : f32 to vector<512x128xf32>
    %8 = arith.maximumf %6, %7 : vector<512x128xf32>
    %c0_5 = arith.constant 0 : index
    %c0_6 = arith.constant 0 : index
    %9 = vector.load %arg2[%c0_5, %c0_6] : memref<128x128xf32, #tpu.memory_space<vmem>>, vector<128x128xf32>
    %cst_7 = arith.constant dense<0.000000e+00> : vector<512x128xf32>
    %10 = tpu.matmul %8, %9, %cst_7 {dimension_numbers = #tpu.dot_dimension_numbers<[1], [0], [0], [1], [0, 0, 1, 1], [], []>} : vector<512x128xf32>, vector<128x128xf32>, vector<512x128xf32> -> vector<512x128xf32>
    %c0_8 = arith.constant 0 : index
    %c0_9 = arith.constant 0 : index
    %11 = vector.load %arg5[%c0_8, %c0_9] : memref<512x128xf32, #tpu.memory_space<vmem>>, vector<512x128xf32>
    tpu.vector_store %arg5[%c0_8, %c0_9], %10 {strides = array<i32>} : memref<512x128xf32, #tpu.memory_space<vmem>>, vector<512x128xf32>,
    %cst_10 = arith.constant dense<0.000000e+00> : vector<128xf32>
    %12 = vector.multi_reduction <add>, %10, %cst_10 [0] : vector<512x128xf32> to vector<128xf32>
    %13 = vector.shape_cast %12 : vector<128xf32> to vector<1x128xf32>
    %c0_11 = arith.constant 0 : index
    %c0_12 = arith.constant 0 : index
    %c0_13 = arith.constant 0 : index
    %14 = vector.load %arg6[%c0_11, %c0_12, %c0_13] : memref<1x2x128xf32, #tpu.memory_space<vmem>>, vector<1x1x128xf32>
    %15 = vector.shape_cast %14 : vector<1x1x128xf32> to vector<1x128xf32>
    %16 = vector.shape_cast %13 : vector<1x128xf32> to vector<1x1x128xf32>
    tpu.vector_store %arg6[%c0_11, %c0_12, %c0_13], %16 {strides = array<i32>} : memref<1x2x128xf32, #tpu.memory_space<vmem>>, vector<1x1x128xf32>,
    %17 = arith.mulf %10, %10 : vector<512x128xf32>
    %cst_14 = arith.constant dense<0.000000e+00> : vector<128xf32>
    %18 = vector.multi_reduction <add>, %17, %cst_14 [0] : vector<512x128xf32> to vector<128xf32>
    %19 = vector.shape_cast %18 : vector<128xf32> to vector<1x128xf32>
    %c0_15 = arith.constant 0 : index
    %c1 = arith.constant 1 : index
    %c0_16 = arith.constant 0 : index
    %20 = vector.load %arg6[%c0_15, %c1, %c0_16] : memref<1x2x128xf32, #tpu.memory_space<vmem>>, vector<1x1x128xf32>
    %21 = vector.shape_cast %20 : vector<1x1x128xf32> to vector<1x128xf32>
    %22 = vector.shape_cast %19 : vector<1x128xf32> to vector<1x1x128xf32>
    tpu.vector_store %arg6[%c0_15, %c1, %c0_16], %22 {strides = array<i32>} : memref<1x2x128xf32, #tpu.memory_space<vmem>>, vector<1x1x128xf32>,
    return
  }
  func.func @transform_0(%arg0: i32) -> (i32, i32) {
    %c0_i32 = arith.constant 0 : i32
    %c0_i32_0 = arith.constant 0 : i32
    return %arg0, %c0_i32 : i32, i32
  }
  func.func @transform_1(%arg0: i32) -> (i32, i32) {
    %c0_i32 = arith.constant 0 : i32
    %c0_i32_0 = arith.constant 0 : i32
    %c0_i32_1 = arith.constant 0 : i32
    return %c0_i32, %c0_i32_0 : i32, i32
  }
  func.func @transform_2(%arg0: i32) -> (i32, i32) {
    %c0_i32 = arith.constant 0 : i32
    %c0_i32_0 = arith.constant 0 : i32
    %c0_i32_1 = arith.constant 0 : i32
    return %c0_i32, %c0_i32_0 : i32, i32
  }
  func.func @transform_3(%arg0: i32) -> (i32, i32) {
    %c0_i32 = arith.constant 0 : i32
    %c0_i32_0 = arith.constant 0 : i32
    %c0_i32_1 = arith.constant 0 : i32
    return %c0_i32, %c0_i32_0 : i32, i32
  }
  func.func @transform_4(%arg0: i32) -> (i32, i32) {
    %c0_i32 = arith.constant 0 : i32
    %c0_i32_0 = arith.constant 0 : i32
    return %arg0, %c0_i32 : i32, i32
  }
  func.func @transform_5(%arg0: i32) -> (i32, i32, i32) {
    %c0_i32 = arith.constant 0 : i32
    %c0_i32_0 = arith.constant 0 : i32
    %c0_i32_1 = arith.constant 0 : i32
    return %arg0, %c0_i32, %c0_i32_0 : i32, i32, i32
  }
}

module attributes {stable_mosaic.version = 11 : i64} {
  func.func @_bn_resid_relu_kernel(%arg0: i32, %arg1: memref<512x128xf32, #tpu.memory_space<vmem>>, %arg2: memref<1x128xf32, #tpu.memory_space<vmem>>, %arg3: memref<1x128xf32, #tpu.memory_space<vmem>>, %arg4: memref<512x128xf32, #tpu.memory_space<vmem>>, %arg5: memref<1x128xf32, #tpu.memory_space<vmem>>, %arg6: memref<1x128xf32, #tpu.memory_space<vmem>>, %arg7: memref<512x128xf32, #tpu.memory_space<vmem>>) attributes {dimension_semantics = [#tpu.dimension_semantics<parallel>], iteration_bounds = array<i64: 1>, scalar_prefetch = 0 : i64, scratch_operands = 0 : i64, tpu.core_type = #tpu.core_type<tc>, window_params = [{transform_indices = @transform_0, window_bounds = array<i64: 512, 128>}, {pipeline_mode = #tpu.pipeline_mode<synchronous>, transform_indices = @transform_1, window_bounds = array<i64: 1, 128>}, {pipeline_mode = #tpu.pipeline_mode<synchronous>, transform_indices = @transform_2, window_bounds = array<i64: 1, 128>}, {transform_indices = @transform_3, window_bounds = array<i64: 512, 128>}, {pipeline_mode = #tpu.pipeline_mode<synchronous>, transform_indices = @transform_4, window_bounds = array<i64: 1, 128>}, {pipeline_mode = #tpu.pipeline_mode<synchronous>, transform_indices = @transform_5, window_bounds = array<i64: 1, 128>}, {transform_indices = @transform_6, window_bounds = array<i64: 512, 128>}]} {
    %c0 = arith.constant 0 : index
    %c0_0 = arith.constant 0 : index
    %0 = vector.load %arg1[%c0, %c0_0] : memref<512x128xf32, #tpu.memory_space<vmem>>, vector<512x128xf32>
    %c0_1 = arith.constant 0 : index
    %c0_2 = arith.constant 0 : index
    %1 = vector.load %arg2[%c0_1, %c0_2] : memref<1x128xf32, #tpu.memory_space<vmem>>, vector<1x128xf32>
    %2 = vector.broadcast %1 : vector<1x128xf32> to vector<512x128xf32>
    %3 = arith.mulf %0, %2 : vector<512x128xf32>
    %c0_3 = arith.constant 0 : index
    %c0_4 = arith.constant 0 : index
    %4 = vector.load %arg3[%c0_3, %c0_4] : memref<1x128xf32, #tpu.memory_space<vmem>>, vector<1x128xf32>
    %5 = vector.broadcast %4 : vector<1x128xf32> to vector<512x128xf32>
    %6 = arith.addf %3, %5 : vector<512x128xf32>
    %c0_5 = arith.constant 0 : index
    %c0_6 = arith.constant 0 : index
    %7 = vector.load %arg4[%c0_5, %c0_6] : memref<512x128xf32, #tpu.memory_space<vmem>>, vector<512x128xf32>
    %c0_7 = arith.constant 0 : index
    %c0_8 = arith.constant 0 : index
    %8 = vector.load %arg5[%c0_7, %c0_8] : memref<1x128xf32, #tpu.memory_space<vmem>>, vector<1x128xf32>
    %9 = vector.broadcast %8 : vector<1x128xf32> to vector<512x128xf32>
    %10 = arith.mulf %7, %9 : vector<512x128xf32>
    %c0_9 = arith.constant 0 : index
    %c0_10 = arith.constant 0 : index
    %11 = vector.load %arg6[%c0_9, %c0_10] : memref<1x128xf32, #tpu.memory_space<vmem>>, vector<1x128xf32>
    %12 = vector.broadcast %11 : vector<1x128xf32> to vector<512x128xf32>
    %13 = arith.addf %10, %12 : vector<512x128xf32>
    %14 = arith.addf %6, %13 : vector<512x128xf32>
    %cst = arith.constant 0.000000e+00 : f32
    %15 = vector.broadcast %cst : f32 to vector<512x128xf32>
    %16 = arith.maximumf %14, %15 : vector<512x128xf32>
    %c0_11 = arith.constant 0 : index
    %c0_12 = arith.constant 0 : index
    %17 = vector.load %arg7[%c0_11, %c0_12] : memref<512x128xf32, #tpu.memory_space<vmem>>, vector<512x128xf32>
    tpu.vector_store %arg7[%c0_11, %c0_12], %16 {strides = array<i32>} : memref<512x128xf32, #tpu.memory_space<vmem>>, vector<512x128xf32>,
    return
  }
  func.func @transform_0(%arg0: i32) -> (i32, i32) {
    %c0_i32 = arith.constant 0 : i32
    %c0_i32_0 = arith.constant 0 : i32
    return %arg0, %c0_i32 : i32, i32
  }
  func.func @transform_1(%arg0: i32) -> (i32, i32) {
    %c0_i32 = arith.constant 0 : i32
    %c0_i32_0 = arith.constant 0 : i32
    %c0_i32_1 = arith.constant 0 : i32
    return %c0_i32, %c0_i32_0 : i32, i32
  }
  func.func @transform_2(%arg0: i32) -> (i32, i32) {
    %c0_i32 = arith.constant 0 : i32
    %c0_i32_0 = arith.constant 0 : i32
    %c0_i32_1 = arith.constant 0 : i32
    return %c0_i32, %c0_i32_0 : i32, i32
  }
  func.func @transform_3(%arg0: i32) -> (i32, i32) {
    %c0_i32 = arith.constant 0 : i32
    %c0_i32_0 = arith.constant 0 : i32
    return %arg0, %c0_i32 : i32, i32
  }
  func.func @transform_4(%arg0: i32) -> (i32, i32) {
    %c0_i32 = arith.constant 0 : i32
    %c0_i32_0 = arith.constant 0 : i32
    %c0_i32_1 = arith.constant 0 : i32
    return %c0_i32, %c0_i32_0 : i32, i32
  }
  func.func @transform_5(%arg0: i32) -> (i32, i32) {
    %c0_i32 = arith.constant 0 : i32
    %c0_i32_0 = arith.constant 0 : i32
    %c0_i32_1 = arith.constant 0 : i32
    return %c0_i32, %c0_i32_0 : i32, i32
  }
  func.func @transform_6(%arg0: i32) -> (i32, i32) {
    %c0_i32 = arith.constant 0 : i32
    %c0_i32_0 = arith.constant 0 : i32
    return %arg0, %c0_i32 : i32, i32
  }
}

</mosaic_0001>

<bundles_post_ra>
// kernel: bottleneck_forward.5
= control target key start
LH: loop header
LB: loop body
LE: loop exit
PB: predicated region body
PF: predicated region fallthrough
CT: control target
= control target key end

     0   :  { %s1366_s1 = inlined_call_operand.vmem [shape: f32[128,128], index: 1, kind: input, shape index: {}]   ;;  %s1367_s0 = inlined_call_operand.vmem [shape: f32[512,128], index: 0, kind: input, shape index: {}]   ;;  %s1368_s2 = inlined_call_operand.vmem [shape: f32[512,128], index: 2, kind: output, shape index: {0}]   ;;  %s1369_s3 = inlined_call_operand.vmem [shape: f32[1,2,128], index: 3, kind: output, shape index: {1}]  }
   0x1   :  { %v92_v0 = vld [vmem:[%s1366_s1 + $0x78] sm:$0xff]  ;;  %v91_v1 = vld [vmem:[%s1366_s1 + $0x70] sm:$0xff]  ;;  %v90_v2 = vld [vmem:[%s1366_s1 + $0x68] sm:$0xff] }
   0x2   :  { %93 = vmatpush.msra.mxu0 %v92_v0  ;;  %578 = vmatpush.msra.mxu1 %v92_v0  ;;  %v89_v3 = vld [vmem:[%s1366_s1 + $0x60] sm:$0xff]  ;;  %v88_v4 = vld [vmem:[%s1366_s1 + $0x58] sm:$0xff]  ;;  %v87_v5 = vld [vmem:[%s1366_s1 + $0x50] sm:$0xff] }
   0x3   :  { %579 = vmatpush.msra.mxu2 %v92_v0  ;;  %580 = vmatpush.msra.mxu3 %v92_v0  ;;  %v86_v6 = vld [vmem:[%s1366_s1 + $0x48] sm:$0xff]  ;;  %v85_v7 = vld [vmem:[%s1366_s1 + $0x40] sm:$0xff]  ;;  %v84_v8 = vld [vmem:[%s1366_s1 + $0x38] sm:$0xff] }
   0x4   :  { %94 = vmatpush.msra.mxu0 %v91_v1  ;;  %581 = vmatpush.msra.mxu1 %v91_v1  ;;  %v83_v9 = vld [vmem:[%s1366_s1 + $0x30] sm:$0xff]  ;;  %v82_v10 = vld [vmem:[%s1366_s1 + $0x28] sm:$0xff]  ;;  %v81_v11 = vld [vmem:[%s1366_s1 + $0x20] sm:$0xff] }
   0x5   :  { %582 = vmatpush.msra.mxu2 %v91_v1  ;;  %583 = vmatpush.msra.mxu3 %v91_v1  ;;  %v80_v12 = vld [vmem:[%s1366_s1 + $0x18] sm:$0xff]  ;;  %v79_v13 = vld [vmem:[%s1366_s1 + $0x10] sm:$0xff]  ;;  %v78_v14 = vld [vmem:[%s1366_s1 + $0x8] sm:$0xff] }
   0x6   :  { %95 = vmatpush.msra.mxu0 %v90_v2  ;;  %584 = vmatpush.msra.mxu1 %v90_v2  ;;  %v77_v15 = vld [vmem:[%s1366_s1] sm:$0xff]  ;;  %v14_v18 = vld [vmem:[%s1367_s0 + $0x8] sm:$0xff]  ;;  %v15_v20 = vld [vmem:[%s1367_s0 + $0x10] sm:$0xff] }
   0x7   :  { %585 = vmatpush.msra.mxu2 %v90_v2  ;;  %586 = vmatpush.msra.mxu3 %v90_v2  ;;  %v13_v16 = vld [vmem:[%s1367_s0] sm:$0xff]  ;;  %v30_v19 = vld [vmem:[%s1367_s0 + $0x88] sm:$0xff]  ;;  %v31_v21 = vld [vmem:[%s1367_s0 + $0x90] sm:$0xff] }
   0x8   :  { %96 = vmatpush.msra.mxu0 %v89_v3  ;;  %587 = vmatpush.msra.mxu1 %v89_v3  ;;  %v29_v17 = vld [vmem:[%s1367_s0 + $0x80] sm:$0xff]  ;;  %v16_v22 = vld [vmem:[%s1367_s0 + $0x18] sm:$0xff]  ;;  %v46_v27 = vld [vmem:[%s1367_s0 + $0x108] sm:$0xff] }
   0x9   :  { %588 = vmatpush.msra.mxu2 %v89_v3  ;;  %589 = vmatpush.msra.mxu3 %v89_v3  ;;  %v32_v23 = vld [vmem:[%s1367_s0 + $0x98] sm:$0xff]  ;;  %v45_v24 = vld [vmem:[%s1367_s0 + $0x100] sm:$0xff]  ;;  %v18_v28 = vld [vmem:[%s1367_s0 + $0x28] sm:$0xff] }
   0xa   :  { %97 = vmatpush.msra.mxu0 %v88_v4  ;;  %590 = vmatpush.msra.mxu1 %v88_v4  ;;  %v17_v25 = vld [vmem:[%s1367_s0 + $0x20] sm:$0xff]  ;;  %v34_v29 = vld [vmem:[%s1367_s0 + $0xa8] sm:$0xff]  ;;  %v47_v30 = vld [vmem:[%s1367_s0 + $0x110] sm:$0xff] }
   0xb   :  { %591 = vmatpush.msra.mxu2 %v88_v4  ;;  %592 = vmatpush.msra.mxu3 %v88_v4  ;;  %v33_v26 = vld [vmem:[%s1367_s0 + $0xa0] sm:$0xff]  ;;  %v19_v31 = vld [vmem:[%s1367_s0 + $0x30] sm:$0xff]  ;;  %v48_v33 = vld [vmem:[%s1367_s0 + $0x118] sm:$0xff] }
   0xc   :  { %98 = vmatpush.msra.mxu0 %v87_v5  ;;  %593 = vmatpush.msra.mxu1 %v87_v5  ;;  %v35_v32 = vld [vmem:[%s1367_s0 + $0xb0] sm:$0xff]  ;;  %v20_v34 = vld [vmem:[%s1367_s0 + $0x38] sm:$0xff]  ;;  %v49_v36 = vld [vmem:[%s1367_s0 + $0x120] sm:$0xff] }
   0xd   :  { %594 = vmatpush.msra.mxu2 %v87_v5  ;;  %595 = vmatpush.msra.mxu3 %v87_v5  ;;  %v36_v35 = vld [vmem:[%s1367_s0 + $0xb8] sm:$0xff]  ;;  %v61_v37 = vld [vmem:[%s1367_s0 + $0x180] sm:$0xff]  ;;  %v50_v40 = vld [vmem:[%s1367_s0 + $0x128] sm:$0xff] }
   0xe   :  { %99 = vmatpush.msra.mxu0 %v86_v6  ;;  %596 = vmatpush.msra.mxu1 %v86_v6  ;;  %v21_v38 = vld [vmem:[%s1367_s0 + $0x40] sm:$0xff]  ;;  %v62_v41 = vld [vmem:[%s1367_s0 + $0x188] sm:$0xff]  ;;  %v51_v44 = vld [vmem:[%s1367_s0 + $0x130] sm:$0xff] }
   0xf   :  { %597 = vmatpush.msra.mxu2 %v86_v6  ;;  %598 = vmatpush.msra.mxu3 %v86_v6  ;;  %v37_v39 = vld [vmem:[%s1367_s0 + $0xc0] sm:$0xff]  ;;  %v22_v42 = vld [vmem:[%s1367_s0 + $0x48] sm:$0xff]  ;;  %v63_v45 = vld [vmem:[%s1367_s0 + $0x190] sm:$0xff] }
  0x10   :  { %100 = vmatpush.msra.mxu0 %v85_v7  ;;  %599 = vmatpush.msra.mxu1 %v85_v7  ;;  %v38_v43 = vld [vmem:[%s1367_s0 + $0xc8] sm:$0xff]  ;;  %v23_v46 = vld [vmem:[%s1367_s0 + $0x50] sm:$0xff]  ;;  %v52_v48 = vld [vmem:[%s1367_s0 + $0x138] sm:$0xff] }
  0x11   :  { %600 = vmatpush.msra.mxu2 %v85_v7  ;;  %601 = vmatpush.msra.mxu3 %v85_v7  ;;  %v39_v47 = vld [vmem:[%s1367_s0 + $0xd0] sm:$0xff]  ;;  %v64_v49 = vld [vmem:[%s1367_s0 + $0x198] sm:$0xff]  ;;  %v53_v52 = vld [vmem:[%s1367_s0 + $0x140] sm:$0xff] }
  0x12   :  { %101 = vmatpush.msra.mxu0 %v84_v8  ;;  %602 = vmatpush.msra.mxu1 %v84_v8  ;;  %v24_v50 = vld [vmem:[%s1367_s0 + $0x58] sm:$0xff]  ;;  %v65_v53 = vld [vmem:[%s1367_s0 + $0x1a0] sm:$0xff]  ;;  %v54_v56 = vld [vmem:[%s1367_s0 + $0x148] sm:$0xff] }
  0x13   :  { %603 = vmatpush.msra.mxu2 %v84_v8  ;;  %604 = vmatpush.msra.mxu3 %v84_v8  ;;  %v40_v51 = vld [vmem:[%s1367_s0 + $0xd8] sm:$0xff]  ;;  %v25_v54 = vld [vmem:[%s1367_s0 + $0x60] sm:$0xff]  ;;  %v66_v57 = vld [vmem:[%s1367_s0 + $0x1a8] sm:$0xff] }
  0x14   :  { %102 = vmatpush.msra.mxu0 %v83_v9  ;;  %605 = vmatpush.msra.mxu1 %v83_v9  ;;  %v41_v55 = vld [vmem:[%s1367_s0 + $0xe0] sm:$0xff]  ;;  %v26_v58 = vld [vmem:[%s1367_s0 + $0x68] sm:$0xff]  ;;  %v55_v60 = vld [vmem:[%s1367_s0 + $0x150] sm:$0xff] }
  0x15   :  { %606 = vmatpush.msra.mxu2 %v83_v9  ;;  %607 = vmatpush.msra.mxu3 %v83_v9  ;;  %v42_v59 = vld [vmem:[%s1367_s0 + $0xe8] sm:$0xff]  ;;  %v67_v61 = vld [vmem:[%s1367_s0 + $0x1b0] sm:$0xff]  ;;  %v56_v0 = vld [vmem:[%s1367_s0 + $0x158] sm:$0xff] }
  0x16   :  { %103 = vmatpush.msra.mxu0 %v82_v10  ;;  %608 = vmatpush.msra.mxu1 %v82_v10  ;;  %v27_v62 = vld [vmem:[%s1367_s0 + $0x70] sm:$0xff]  ;;  %v68_v1 = vld [vmem:[%s1367_s0 + $0x1b8] sm:$0xff]  ;;  %v57_v4 = vld [vmem:[%s1367_s0 + $0x160] sm:$0xff] }
  0x17   :  { %609 = vmatpush.msra.mxu2 %v82_v10  ;;  %610 = vmatpush.msra.mxu3 %v82_v10  ;;  %v43_v63 = vld [vmem:[%s1367_s0 + $0xf0] sm:$0xff]  ;;  %v28_v2 = vld [vmem:[%s1367_s0 + $0x78] sm:$0xff]  ;;  %v69_v5 = vld [vmem:[%s1367_s0 + $0x1c0] sm:$0xff] }
  0x18   :  { %104 = vmatpush.msra.mxu0 %v81_v11  ;;  %611 = vmatpush.msra.mxu1 %v81_v11  ;;  %v44_v3 = vld [vmem:[%s1367_s0 + $0xf8] sm:$0xff]  ;;  %v58_v8 = vld [vmem:[%s1367_s0 + $0x168] sm:$0xff] }
  0x19   :  { %612 = vmatpush.msra.mxu2 %v81_v11  ;;  %613 = vmatpush.msra.mxu3 %v81_v11  ;;  %v70_v9 = vld [vmem:[%s1367_s0 + $0x1c8] sm:$0xff] }
  0x1a   :  { %105 = vmatpush.msra.mxu0 %v80_v12  ;;  %614 = vmatpush.msra.mxu1 %v80_v12 }
  0x1b   :  { %615 = vmatpush.msra.mxu2 %v80_v12  ;;  %616 = vmatpush.msra.mxu3 %v80_v12 }
  0x1c   :  { %106 = vmatpush.msra.mxu0 %v79_v13  ;;  %617 = vmatpush.msra.mxu1 %v79_v13 }
  0x1d   :  { %618 = vmatpush.msra.mxu2 %v79_v13  ;;  %619 = vmatpush.msra.mxu3 %v79_v13 }
  0x1e   :  { %107 = vmatpush.msra.mxu0 %v78_v14  ;;  %620 = vmatpush.msra.mxu1 %v78_v14 }
  0x1f   :  { %621 = vmatpush.msra.mxu2 %v78_v14  ;;  %622 = vmatpush.msra.mxu3 %v78_v14 }
  0x20   :  { %108 = vmatpush.msra.mxu0 %v77_v15  ;;  %623 = vmatpush.msra.mxu1 %v77_v15 }
  0x21   :  { %109 = vmatmul.f32.vlgmr.msra.gmra.mxu0 %v13_v16  ;;  %157 = vmatmul.f32.vlgmr.msra.gmra.mxu1 %v29_v17  ;;  %v59_v16 = vld [vmem:[%s1367_s0 + $0x170] sm:$0xff] }
  0x22   :  { %624 = vmatpush.msra.mxu2 %v77_v15  ;;  %625 = vmatpush.msra.mxu3 %v77_v15  ;;  %v71_v17 = vld [vmem:[%s1367_s0 + $0x1d0] sm:$0xff] }
  0x23   :  { %205 = vmatmul.f32.vlgmr.msra.gmra.mxu2 %v45_v24  ;;  %253 = vmatmul.f32.vlgmr.msra.gmra.mxu3 %v61_v37  ;;  %v72_v24 = vld [vmem:[%s1367_s0 + $0x1d8] sm:$0xff]  ;;  %v74_v37 = vld [vmem:[%s1367_s0 + $0x1e8] sm:$0xff] }
  0x29   :  { %112 = vmatmul.f32.gmra.mxu0 %v14_v18  ;;  %160 = vmatmul.f32.gmra.mxu1 %v30_v19 }
  0x2b   :  { %208 = vmatmul.f32.gmra.mxu2 %v46_v27  ;;  %256 = vmatmul.f32.gmra.mxu3 %v62_v41  ;;  %v75_v41 = vld [vmem:[%s1367_s0 + $0x1f0] sm:$0xff] }
  0x31   :  { %115 = vmatmul.f32.gmra.mxu0 %v15_v20  ;;  %163 = vmatmul.f32.gmra.mxu1 %v31_v21 }
  0x33   :  { %211 = vmatmul.f32.gmra.mxu2 %v47_v30  ;;  %259 = vmatmul.f32.gmra.mxu3 %v63_v45  ;;  %v73_v30 = vld [vmem:[%s1367_s0 + $0x1e0] sm:$0xff]  ;;  %v76_v45 = vld [vmem:[%s1367_s0 + $0x1f8] sm:$0xff] }
  0x39   :  { %118 = vmatmul.f32.gmra.mxu0 %v16_v22  ;;  %166 = vmatmul.f32.gmra.mxu1 %v32_v23  ;;  %v60_v23 = vld [vmem:[%s1367_s0 + $0x178] sm:$0xff] }
  0x3b   :  { %214 = vmatmul.f32.gmra.mxu2 %v48_v33  ;;  %262 = vmatmul.f32.gmra.mxu3 %v64_v49 }
  0x41   :  { %121 = vmatmul.f32.gmra.mxu0 %v17_v25  ;;  %169 = vmatmul.f32.gmra.mxu1 %v33_v26 }
  0x43   :  { %217 = vmatmul.f32.gmra.mxu2 %v49_v36  ;;  %265 = vmatmul.f32.gmra.mxu3 %v65_v53 }
  0x49   :  { %124 = vmatmul.f32.gmra.mxu0 %v18_v28  ;;  %172 = vmatmul.f32.gmra.mxu1 %v34_v29 }
  0x4b   :  { %220 = vmatmul.f32.gmra.mxu2 %v50_v40  ;;  %268 = vmatmul.f32.gmra.mxu3 %v66_v57 }
  0x51   :  { %127 = vmatmul.f32.gmra.mxu0 %v19_v31  ;;  %175 = vmatmul.f32.gmra.mxu1 %v35_v32 }
  0x53   :  { %223 = vmatmul.f32.gmra.mxu2 %v51_v44  ;;  %271 = vmatmul.f32.gmra.mxu3 %v67_v61 }
  0x59   :  { %130 = vmatmul.f32.gmra.mxu0 %v20_v34  ;;  %178 = vmatmul.f32.gmra.mxu1 %v36_v35 }
  0x5b   :  { %226 = vmatmul.f32.gmra.mxu2 %v52_v48  ;;  %274 = vmatmul.f32.gmra.mxu3 %v68_v1 }
  0x61   :  { %133 = vmatmul.f32.gmra.mxu0 %v21_v38  ;;  %181 = vmatmul.f32.gmra.mxu1 %v37_v39 }
  0x63   :  { %229 = vmatmul.f32.gmra.mxu2 %v53_v52  ;;  %277 = vmatmul.f32.gmra.mxu3 %v69_v5 }
  0x69   :  { %136 = vmatmul.f32.gmra.mxu0 %v22_v42  ;;  %184 = vmatmul.f32.gmra.mxu1 %v38_v43 }
  0x6b   :  { %232 = vmatmul.f32.gmra.mxu2 %v54_v56  ;;  %280 = vmatmul.f32.gmra.mxu3 %v70_v9 }
  0x71   :  { %139 = vmatmul.f32.gmra.mxu0 %v23_v46  ;;  %187 = vmatmul.f32.gmra.mxu1 %v39_v47 }
  0x73   :  { %235 = vmatmul.f32.gmra.mxu2 %v55_v60  ;;  %283 = vmatmul.f32.gmra.mxu3 %v71_v17 }
  0x79   :  { %142 = vmatmul.f32.gmra.mxu0 %v24_v50  ;;  %190 = vmatmul.f32.gmra.mxu1 %v40_v51 }
  0x7b   :  { %238 = vmatmul.f32.gmra.mxu2 %v56_v0  ;;  %286 = vmatmul.f32.gmra.mxu3 %v72_v24 }
  0x81   :  { %145 = vmatmul.f32.gmra.mxu0 %v25_v54  ;;  %193 = vmatmul.f32.gmra.mxu1 %v41_v55 }
  0x83   :  { %241 = vmatmul.f32.gmra.mxu2 %v57_v4  ;;  %289 = vmatmul.f32.gmra.mxu3 %v73_v30 }
  0x89   :  { %148 = vmatmul.f32.gmra.mxu0 %v26_v58  ;;  %196 = vmatmul.f32.gmra.mxu1 %v42_v59 }
  0x8b   :  { %244 = vmatmul.f32.gmra.mxu2 %v58_v8  ;;  %292 = vmatmul.f32.gmra.mxu3 %v74_v37 }
  0x91   :  { %151 = vmatmul.f32.gmra.mxu0 %v27_v62  ;;  %199 = vmatmul.f32.gmra.mxu1 %v43_v63 }
  0x93   :  { %247 = vmatmul.f32.gmra.mxu2 %v59_v16  ;;  %295 = vmatmul.f32.gmra.mxu3 %v75_v41 }
  0x99   :  { %154 = vmatmul.f32.gmra.mxu0 %v28_v2  ;;  %202 = vmatmul.f32.gmra.mxu1 %v44_v3 }
  0x9b   :  { %250 = vmatmul.f32.gmra.mxu2 %v60_v23  ;;  %298 = vmatmul.f32.gmra.mxu3 %v76_v45 }
  0x9e   :  { %v110_v6 = vpop.f32.mrf.mxu0  ;;  %v856_v7 = vpop.f32.mrf.mxu1 }
  0x9f   :  { %302 = vst [vmem:[%s1368_s2] sm:$0xff] %v110_v6  ;;  %v436_v12 = vmul.f32 %v110_v6, %v110_v6 }
  0xa0   :  { %318 = vst [vmem:[%s1368_s2 + $0x80] sm:$0xff] %v856_v7 }
  0xa6   :  { %v113_v10 = vpop.f32.mrf.mxu0  ;;  %v871_v11 = vpop.f32.mrf.mxu1 }
  0xa7   :  { %303 = vst [vmem:[%s1368_s2 + $0x8] sm:$0xff] %v113_v10  ;;  %v366_v13 = vadd.f32 %v113_v10, %v110_v6  ;;  %v437_v14 = vmul.f32 %v113_v10, %v113_v10  ;;  %v920_v35 = vpop.f32.mrf.mxu2  ;;  %v996_v52 = vpop.f32.mrf.mxu3 }
  0xa8   :  { %319 = vst [vmem:[%s1368_s2 + $0x88] sm:$0xff] %v871_v11 }
  0xa9   :  { %v500_v15 = vadd.f32 %v437_v14, %v436_v12  ;;  %334 = vst [vmem:[%s1368_s2 + $0x100] sm:$0xff] %v920_v35 }
  0xaa   :  { %350 = vst [vmem:[%s1368_s2 + $0x180] sm:$0xff] %v996_v52 }
  0xae   :  { %v116_v18 = vpop.f32.mrf.mxu0  ;;  %v886_v19 = vpop.f32.mrf.mxu1 }
  0xaf   :  { %304 = vst [vmem:[%s1368_s2 + $0x10] sm:$0xff] %v116_v18  ;;  %v367_v20 = vadd.f32 %v366_v13, %v116_v18  ;;  %v438_v21 = vmul.f32 %v116_v18, %v116_v18  ;;  %v943_v40 = vpop.f32.mrf.mxu2  ;;  %v1017_v56 = vpop.f32.mrf.mxu3 }
  0xb0   :  { %320 = vst [vmem:[%s1368_s2 + $0x90] sm:$0xff] %v886_v19 }
  0xb1   :  { %v501_v22 = vadd.f32 %v500_v15, %v438_v21  ;;  %335 = vst [vmem:[%s1368_s2 + $0x108] sm:$0xff] %v943_v40 }
  0xb2   :  { %351 = vst [vmem:[%s1368_s2 + $0x188] sm:$0xff] %v1017_v56 }
  0xb6   :  { %v119_v25 = vpop.f32.mrf.mxu0  ;;  %v901_v26 = vpop.f32.mrf.mxu1 }
  0xb7   :  { %305 = vst [vmem:[%s1368_s2 + $0x18] sm:$0xff] %v119_v25  ;;  %v368_v27 = vadd.f32 %v367_v20, %v119_v25  ;;  %v439_v28 = vmul.f32 %v119_v25, %v119_v25  ;;  %v961_v44 = vpop.f32.mrf.mxu2  ;;  %v1038_v60 = vpop.f32.mrf.mxu3 }
  0xb8   :  { %321 = vst [vmem:[%s1368_s2 + $0x98] sm:$0xff] %v901_v26 }
  0xb9   :  { %v502_v29 = vadd.f32 %v501_v22, %v439_v28  ;;  %336 = vst [vmem:[%s1368_s2 + $0x110] sm:$0xff] %v961_v44 }
  0xba   :  { %352 = vst [vmem:[%s1368_s2 + $0x190] sm:$0xff] %v1038_v60 }
  0xbe   :  { %v122_v31 = vpop.f32.mrf.mxu0  ;;  %v913_v32 = vpop.f32.mrf.mxu1 }
  0xbf   :  { %306 = vst [vmem:[%s1368_s2 + $0x20] sm:$0xff] %v122_v31  ;;  %v918_v33 = vadd.f32 %v368_v27, %v122_v31  ;;  %v440_v34 = vmul.f32 %v122_v31, %v122_v31  ;;  %v979_v48 = vpop.f32.mrf.mxu2  ;;  %v1059_v0 = vpop.f32.mrf.mxu3 }
  0xc0   :  { %322 = vst [vmem:[%s1368_s2 + $0xa0] sm:$0xff] %v913_v32 }
  0xc1   :  { %v926_v36 = vadd.f32 %v502_v29, %v440_v34  ;;  %337 = vst [vmem:[%s1368_s2 + $0x118] sm:$0xff] %v979_v48 }
  0xc2   :  { %353 = vst [vmem:[%s1368_s2 + $0x198] sm:$0xff] %v1059_v0 }
  0xc6   :  { %v935_v38 = vpop.f32.mrf.mxu0  ;;  %v937_v39 = vpop.f32.mrf.mxu1 }
  0xc7   :  { %307 = vst [vmem:[%s1368_s2 + $0x28] sm:$0xff] %v935_v38  ;;  %v994_v51 = vpop.f32.mrf.mxu2  ;;  %v1080_v4 = vpop.f32.mrf.mxu3  ;;  %v441_v5 = vmul.f32 %v935_v38, %v935_v38  ;;  %v370_v6 = vadd.f32 %v918_v33, %v935_v38 }
  0xc8   :  { %323 = vst [vmem:[%s1368_s2 + $0xa8] sm:$0xff] %v937_v39 }
  0xc9   :  { %338 = vst [vmem:[%s1368_s2 + $0x120] sm:$0xff] %v994_v51  ;;  %v504_v9 = vadd.f32 %v926_v36, %v441_v5 }
  0xca   :  { %354 = vst [vmem:[%s1368_s2 + $0x1a0] sm:$0xff] %v1080_v4 }
  0xce   :  { %v128_v42 = vpop.f32.mrf.mxu0  ;;  %v956_v43 = vpop.f32.mrf.mxu1 }
  0xcf   :  { %308 = vst [vmem:[%s1368_s2 + $0x30] sm:$0xff] %v128_v42  ;;  %v1015_v55 = vpop.f32.mrf.mxu2  ;;  %v442_v8 = vmul.f32 %v128_v42, %v128_v42  ;;  %v371_v10 = vadd.f32 %v370_v6, %v128_v42  ;;  %v1106_v20 = vpop.f32.mrf.mxu3 }
  0xd0   :  { %324 = vst [vmem:[%s1368_s2 + $0xb0] sm:$0xff] %v956_v43 }
  0xd1   :  { %339 = vst [vmem:[%s1368_s2 + $0x128] sm:$0xff] %v1015_v55  ;;  %v505_v15 = vadd.f32 %v504_v9, %v442_v8 }
  0xd2   :  { %355 = vst [vmem:[%s1368_s2 + $0x1a8] sm:$0xff] %v1106_v20 }
  0xd6   :  { %v131_v46 = vpop.f32.mrf.mxu0  ;;  %v974_v47 = vpop.f32.mrf.mxu1 }
  0xd7   :  { %309 = vst [vmem:[%s1368_s2 + $0x38] sm:$0xff] %v131_v46  ;;  %v1036_v59 = vpop.f32.mrf.mxu2  ;;  %v443_v12 = vmul.f32 %v131_v46, %v131_v46  ;;  %v372_v16 = vadd.f32 %v371_v10, %v131_v46  ;;  %v1127_v41 = vpop.f32.mrf.mxu3 }
  0xd8   :  { %325 = vst [vmem:[%s1368_s2 + $0xb8] sm:$0xff] %v974_v47 }
  0xd9   :  { %340 = vst [vmem:[%s1368_s2 + $0x130] sm:$0xff] %v1036_v59  ;;  %v506_v21 = vadd.f32 %v505_v15, %v443_v12 }
  0xda   :  { %356 = vst [vmem:[%s1368_s2 + $0x1b0] sm:$0xff] %v1127_v41 }
  0xde   :  { %v134_v49 = vpop.f32.mrf.mxu0  ;;  %v989_v50 = vpop.f32.mrf.mxu1 }
  0xdf   :  { %310 = vst [vmem:[%s1368_s2 + $0x40] sm:$0xff] %v134_v49  ;;  %v1057_v63 = vpop.f32.mrf.mxu2  ;;  %v444_v17 = vmul.f32 %v134_v49, %v134_v49  ;;  %v373_v22 = vadd.f32 %v372_v16, %v134_v49  ;;  %v1148_v15 = vpop.f32.mrf.mxu3 }
  0xe0   :  { %326 = vst [vmem:[%s1368_s2 + $0xc0] sm:$0xff] %v989_v50 }
  0xe1   :  { %341 = vst [vmem:[%s1368_s2 + $0x138] sm:$0xff] %v1057_v63  ;;  %v507_v24 = vadd.f32 %v506_v21, %v444_v17  ;;  %v453_v21 = vmul.f32 %v871_v11, %v871_v11 }
  0xe2   :  { %357 = vst [vmem:[%s1368_s2 + $0x1b8] sm:$0xff] %v1148_v15 }
  0xe6   :  { %v137_v53 = vpop.f32.mrf.mxu0  ;;  %v1010_v54 = vpop.f32.mrf.mxu1 }
  0xe7   :  { %311 = vst [vmem:[%s1368_s2 + $0x48] sm:$0xff] %v137_v53  ;;  %v1078_v3 = vpop.f32.mrf.mxu2  ;;  %v445_v23 = vmul.f32 %v137_v53, %v137_v53  ;;  %v374_v25 = vadd.f32 %v373_v22, %v137_v53 }
  0xe8   :  { %327 = vst [vmem:[%s1368_s2 + $0xc8] sm:$0xff] %v1010_v54 }
  0xe9   :  { %342 = vst [vmem:[%s1368_s2 + $0x140] sm:$0xff] %v1078_v3  ;;  %v508_v28 = vadd.f32 %v507_v24, %v445_v23 }
  0xee   :  { %v140_v57 = vpop.f32.mrf.mxu0  ;;  %v1031_v58 = vpop.f32.mrf.mxu1 }
  0xef   :  { %312 = vst [vmem:[%s1368_s2 + $0x50] sm:$0xff] %v140_v57  ;;  %v1104_v18 = vpop.f32.mrf.mxu2  ;;  %v446_v27 = vmul.f32 %v140_v57, %v140_v57  ;;  %v375_v29 = vadd.f32 %v374_v25, %v140_v57 }
  0xf0   :  { %328 = vst [vmem:[%s1368_s2 + $0xd0] sm:$0xff] %v1031_v58 }
  0xf1   :  { %343 = vst [vmem:[%s1368_s2 + $0x148] sm:$0xff] %v1104_v18  ;;  %v509_v34 = vadd.f32 %v508_v28, %v446_v27  ;;  %v455_v27 = vmul.f32 %v901_v26, %v901_v26 }
  0xf6   :  { %v143_v61 = vpop.f32.mrf.mxu0  ;;  %v1052_v62 = vpop.f32.mrf.mxu1 }
  0xf7   :  { %313 = vst [vmem:[%s1368_s2 + $0x58] sm:$0xff] %v143_v61  ;;  %v447_v30 = vmul.f32 %v143_v61, %v143_v61  ;;  %v376_v36 = vadd.f32 %v375_v29, %v143_v61  ;;  %v1125_v38 = vpop.f32.mrf.mxu2 }
  0xf8   :  { %329 = vst [vmem:[%s1368_s2 + $0xd8] sm:$0xff] %v1052_v62 }
  0xf9   :  { %v510_v42 = vadd.f32 %v509_v34, %v447_v30  ;;  %344 = vst [vmem:[%s1368_s2 + $0x150] sm:$0xff] %v1125_v38 }
  0xfe   :  { %v146_v1 = vpop.f32.mrf.mxu0  ;;  %v1073_v2 = vpop.f32.mrf.mxu1 }
  0xff   :  { %314 = vst [vmem:[%s1368_s2 + $0x60] sm:$0xff] %v146_v1  ;;  %v448_v37 = vmul.f32 %v146_v1, %v146_v1  ;;  %v377_v45 = vadd.f32 %v376_v36, %v146_v1  ;;  %v1146_v12 = vpop.f32.mrf.mxu2 }
 0x100   :  { %330 = vst [vmem:[%s1368_s2 + $0xe0] sm:$0xff] %v1073_v2 }
 0x101   :  { %v511_v49 = vadd.f32 %v510_v42, %v448_v37  ;;  %345 = vst [vmem:[%s1368_s2 + $0x158] sm:$0xff] %v1146_v12  ;;  %v458_v42 = vmul.f32 %v956_v43, %v956_v43 }
 0x106   :  { %v149_v13 = vpop.f32.mrf.mxu0  ;;  %v1099_v14 = vpop.f32.mrf.mxu1 }
 0x107   :  { %315 = vst [vmem:[%s1368_s2 + $0x68] sm:$0xff] %v149_v13  ;;  %v449_v46 = vmul.f32 %v149_v13, %v149_v13  ;;  %v378_v53 = vadd.f32 %v377_v45, %v149_v13  ;;  %v452_v13 = vmul.f32 %v856_v7, %v856_v7  ;;  %v1174_v30 = vpop.f32.mrf.mxu2 }
 0x108   :  { %331 = vst [vmem:[%s1368_s2 + $0xe8] sm:$0xff] %v1099_v14 }
 0x109   :  { %v512_v61 = vadd.f32 %v511_v49, %v449_v46  ;;  %346 = vst [vmem:[%s1368_s2 + $0x160] sm:$0xff] %v1174_v30 }
 0x10e   :  { %v152_v31 = vpop.f32.mrf.mxu0  ;;  %v1120_v33 = vpop.f32.mrf.mxu1 }
 0x10f   :  { %316 = vst [vmem:[%s1368_s2 + $0x70] sm:$0xff] %v152_v31  ;;  %v450_v57 = vmul.f32 %v152_v31, %v152_v31  ;;  %v379_v5 = vadd.f32 %v378_v53, %v152_v31  ;;  %v1176_v31 = vpop.f32.mrf.mxu3 }
 0x110   :  { %332 = vst [vmem:[%s1368_s2 + $0xf0] sm:$0xff] %v1120_v33 }
 0x111   :  { %v513_v1 = vadd.f32 %v512_v61, %v450_v57  ;;  %358 = vst [vmem:[%s1368_s2 + $0x1c0] sm:$0xff] %v1176_v31  ;;  %v1198_v57 = vpop.f32.mrf.mxu2 }
 0x112   :  { %347 = vst [vmem:[%s1368_s2 + $0x168] sm:$0xff] %v1198_v57 }
 0x116   :  { %v155_v6 = vpop.f32.mrf.mxu0  ;;  %v1141_v8 = vpop.f32.mrf.mxu1 }
 0x117   :  { %317 = vst [vmem:[%s1368_s2 + $0x78] sm:$0xff] %v155_v6  ;;  %v380_v9 = vadd.f32 %v379_v5, %v155_v6  ;;  %v451_v10 = vmul.f32 %v155_v6, %v155_v6  ;;  %v1200_v61 = vpop.f32.mrf.mxu3 }
 0x118   :  { %333 = vst [vmem:[%s1368_s2 + $0xf8] sm:$0xff] %v1141_v8 }
 0x119   :  { %v381_v16 = vadd.f32 %v380_v9, %v856_v7  ;;  %v514_v17 = vadd.f32 %v513_v1, %v451_v10  ;;  %v454_v7 = vmul.f32 %v886_v19, %v886_v19  ;;  %359 = vst [vmem:[%s1368_s2 + $0x1c8] sm:$0xff] %v1200_v61  ;;  %v462_v9 = vmul.f32 %v1031_v58, %v1031_v58 }
 0x11b   :  { %v382_v22 = vadd.f32 %v381_v16, %v871_v11  ;;  %v515_v23 = vadd.f32 %v514_v17, %v452_v13  ;;  %v456_v11 = vmul.f32 %v913_v32, %v913_v32  ;;  %v463_v16 = vmul.f32 %v1052_v62, %v1052_v62 }
 0x11d   :  { %v383_v24 = vadd.f32 %v382_v22, %v886_v19  ;;  %v516_v25 = vadd.f32 %v515_v23, %v453_v21  ;;  %v1222_v21 = vpop.f32.mrf.mxu2 }
 0x11e   :  { %348 = vst [vmem:[%s1368_s2 + $0x170] sm:$0xff] %v1222_v21 }
 0x11f   :  { %v384_v28 = vadd.f32 %v383_v24, %v901_v26  ;;  %v517_v29 = vadd.f32 %v516_v25, %v454_v7  ;;  %v457_v26 = vmul.f32 %v937_v39, %v937_v39  ;;  %v1224_v22 = vpop.f32.mrf.mxu3  ;;  %v465_v24 = vmul.f32 %v1099_v14, %v1099_v14 }
 0x120   :  { %360 = vst [vmem:[%s1368_s2 + $0x1d0] sm:$0xff] %v1224_v22 }
 0x121   :  { %v385_v19 = vadd.f32 %v384_v28, %v913_v32  ;;  %v518_v34 = vadd.f32 %v517_v29, %v455_v27  ;;  %v459_v32 = vmul.f32 %v974_v47, %v974_v47  ;;  %v466_v28 = vmul.f32 %v1120_v33, %v1120_v33 }
 0x123   :  { %v386_v36 = vadd.f32 %v385_v19, %v937_v39  ;;  %v519_v37 = vadd.f32 %v518_v34, %v456_v11  ;;  %v460_v39 = vmul.f32 %v989_v50, %v989_v50 }
 0x125   :  { %v520_v45 = vadd.f32 %v519_v37, %v457_v26  ;;  %v387_v46 = vadd.f32 %v386_v36, %v956_v43  ;;  %v251_v19 = vpop.f32.mrf.mxu2 }
 0x126   :  { %349 = vst [vmem:[%s1368_s2 + $0x178] sm:$0xff] %v251_v19 }
 0x127   :  { %v388_v49 = vadd.f32 %v387_v46, %v974_v47  ;;  %v521_v53 = vadd.f32 %v520_v45, %v458_v42  ;;  %v461_v47 = vmul.f32 %v1010_v54, %v1010_v54  ;;  %v1246_v34 = vpop.f32.mrf.mxu3  ;;  %v470_v42 = vmul.f32 %v961_v44, %v961_v44 }
 0x128   :  { %361 = vst [vmem:[%s1368_s2 + $0x1d8] sm:$0xff] %v1246_v34 }
 0x129   :  { %v389_v43 = vadd.f32 %v388_v49, %v989_v50  ;;  %v522_v5 = vadd.f32 %v521_v53, %v459_v32 }
 0x12b   :  { %v390_v6 = vadd.f32 %v389_v43, %v1010_v54  ;;  %v523_v1 = vadd.f32 %v522_v5, %v460_v39  ;;  %v473_v43 = vmul.f32 %v1015_v55, %v1015_v55 }
 0x12d   :  { %v391_v10 = vadd.f32 %v390_v6, %v1031_v58  ;;  %v524_v13 = vadd.f32 %v523_v1, %v461_v47  ;;  %v464_v58 = vmul.f32 %v1073_v2, %v1073_v2  ;;  %v474_v47 = vmul.f32 %v1036_v59, %v1036_v59 }
 0x12f   :  { %v392_v50 = vadd.f32 %v391_v10, %v1052_v62  ;;  %v525_v17 = vadd.f32 %v524_v13, %v462_v9  ;;  %v1267_v53 = vpop.f32.mrf.mxu3  ;;  %v475_v9 = vmul.f32 %v1057_v63, %v1057_v63 }
 0x130   :  { %362 = vst [vmem:[%s1368_s2 + $0x1e0] sm:$0xff] %v1267_v53 }
 0x131   :  { %v526_v54 = vadd.f32 %v525_v17, %v463_v16  ;;  %v393_v23 = vadd.f32 %v392_v50, %v1073_v2  ;;  %v467_v2 = vmul.f32 %v1141_v8, %v1141_v8 }
 0x133   :  { %v527_v62 = vadd.f32 %v526_v54, %v464_v58  ;;  %v394_v7 = vadd.f32 %v393_v23, %v1099_v14  ;;  %v468_v14 = vmul.f32 %v920_v35, %v920_v35  ;;  %v478_v54 = vmul.f32 %v1125_v38, %v1125_v38 }
 0x135   :  { %v528_v25 = vadd.f32 %v527_v62, %v465_v24  ;;  %v395_v27 = vadd.f32 %v394_v7, %v1120_v33  ;;  %v469_v33 = vmul.f32 %v943_v40, %v943_v40  ;;  %v479_v7 = vmul.f32 %v1146_v12, %v1146_v12 }
 0x137   :  { %v529_v29 = vadd.f32 %v528_v25, %v466_v28  ;;  %v396_v11 = vadd.f32 %v395_v27, %v1141_v8  ;;  %v480_v27 = vmul.f32 %v1174_v30, %v1174_v30 }
 0x139   :  { %v397_v26 = vadd.f32 %v396_v11, %v920_v35  ;;  %v530_v36 = vadd.f32 %v529_v29, %v467_v2  ;;  %v471_v35 = vmul.f32 %v979_v48, %v979_v48  ;;  %v481_v2 = vmul.f32 %v1198_v57, %v1198_v57 }
 0x13a   :  { %v482_v11 = vmul.f32 %v1222_v21, %v1222_v21 }
 0x13b   :  { %v398_v8 = vadd.f32 %v397_v26, %v943_v40  ;;  %v531_v37 = vadd.f32 %v530_v36, %v468_v14  ;;  %v472_v40 = vmul.f32 %v994_v51, %v994_v51  ;;  %v483_v14 = vmul.f32 %v251_v19, %v251_v19 }
 0x13d   :  { %v399_v45 = vadd.f32 %v398_v8, %v961_v44  ;;  %v532_v46 = vadd.f32 %v531_v37, %v469_v33  ;;  %v485_v37 = vmul.f32 %v1017_v56, %v1017_v56 }
 0x13f   :  { %v400_v32 = vadd.f32 %v399_v45, %v979_v48  ;;  %v533_v49 = vadd.f32 %v532_v46, %v470_v42 }
 0x141   :  { %v401_v39 = vadd.f32 %v400_v32, %v994_v51  ;;  %v534_v44 = vadd.f32 %v533_v49, %v471_v35  ;;  %v1285_v51 = vpop.f32.mrf.mxu3  ;;  %v487_v35 = vmul.f32 %v1059_v0, %v1059_v0 }
 0x142   :  { %363 = vst [vmem:[%s1368_s2 + $0x1e8] sm:$0xff] %v1285_v51 }
 0x143   :  { %v402_v5 = vadd.f32 %v401_v39, %v1015_v55  ;;  %v535_v48 = vadd.f32 %v534_v44, %v472_v40  ;;  %v476_v55 = vmul.f32 %v1078_v3, %v1078_v3 }
 0x145   :  { %v536_v6 = vadd.f32 %v535_v48, %v473_v43  ;;  %v403_v1 = vadd.f32 %v402_v5, %v1036_v59  ;;  %v477_v59 = vmul.f32 %v1104_v18, %v1104_v18 }
 0x147   :  { %v404_v10 = vadd.f32 %v403_v1, %v1057_v63  ;;  %v537_v13 = vadd.f32 %v536_v6, %v474_v47 }
 0x149   :  { %v405_v50 = vadd.f32 %v404_v10, %v1078_v3  ;;  %v538_v16 = vadd.f32 %v537_v13, %v475_v9  ;;  %v296_v3 = vpop.f32.mrf.mxu3 }
 0x14a   :  { %364 = vst [vmem:[%s1368_s2 + $0x1f0] sm:$0xff] %v296_v3 }
 0x14b   :  { %v406_v17 = vadd.f32 %v405_v50, %v1104_v18  ;;  %v539_v63 = vadd.f32 %v538_v16, %v476_v55  ;;  %v495_v16 = vmul.f32 %v1246_v34, %v1246_v34 }
 0x14d   :  { %v407_v23 = vadd.f32 %v406_v17, %v1125_v38  ;;  %v540_v58 = vadd.f32 %v539_v63, %v477_v59  ;;  %v496_v63 = vmul.f32 %v1267_v53, %v1267_v53 }
 0x14f   :  { %v408_v62 = vadd.f32 %v407_v23, %v1146_v12  ;;  %v541_v24 = vadd.f32 %v540_v58, %v478_v54  ;;  %v497_v23 = vmul.f32 %v1285_v51, %v1285_v51 }
 0x151   :  { %v542_v25 = vadd.f32 %v541_v24, %v479_v7  ;;  %v409_v18 = vadd.f32 %v408_v62, %v1174_v30  ;;  %v299_v33 = vpop.f32.mrf.mxu3  ;;  %v484_v30 = vmul.f32 %v996_v52, %v996_v52  ;;  %v498_v62 = vmul.f32 %v296_v3, %v296_v3 }
 0x152   :  { %365 = vst [vmem:[%s1368_s2 + $0x1f8] sm:$0xff] %v299_v33  ;;  %v499_v7 = vmul.f32 %v299_v33, %v299_v33 }
 0x153   :  { %v543_v28 = vadd.f32 %v542_v25, %v480_v27  ;;  %v410_v38 = vadd.f32 %v409_v18, %v1198_v57 }
 0x155   :  { %v544_v29 = vadd.f32 %v543_v28, %v481_v2  ;;  %v411_v12 = vadd.f32 %v410_v38, %v1222_v21 }
 0x157   :  { %v545_v26 = vadd.f32 %v544_v29, %v482_v11  ;;  %v412_v36 = vadd.f32 %v411_v12, %v251_v19  ;;  %v486_v19 = vmul.f32 %v1038_v60, %v1038_v60 }
 0x159   :  { %v413_v8 = vadd.f32 %v412_v36, %v996_v52  ;;  %v546_v57 = vadd.f32 %v545_v26, %v483_v14  ;;  %v488_v52 = vmul.f32 %v1080_v4, %v1080_v4 }
 0x15b   :  { %v414_v42 = vadd.f32 %v413_v8, %v1017_v56  ;;  %v547_v21 = vadd.f32 %v546_v57, %v484_v30  ;;  %v489_v56 = vmul.f32 %v1106_v20, %v1106_v20 }
 0x15d   :  { %v415_v45 = vadd.f32 %v414_v42, %v1038_v60  ;;  %v548_v46 = vadd.f32 %v547_v21, %v485_v37  ;;  %v490_v60 = vmul.f32 %v1127_v41, %v1127_v41 }
 0x15f   :  { %v416_v32 = vadd.f32 %v415_v45, %v1059_v0  ;;  %v549_v49 = vadd.f32 %v548_v46, %v486_v19  ;;  %v491_v0 = vmul.f32 %v1148_v15, %v1148_v15 }
 0x161   :  { %v417_v40 = vadd.f32 %v416_v32, %v1080_v4  ;;  %v550_v39 = vadd.f32 %v549_v49, %v487_v35  ;;  %v492_v4 = vmul.f32 %v1176_v31, %v1176_v31 }
 0x163   :  { %v418_v44 = vadd.f32 %v417_v40, %v1106_v20  ;;  %v551_v43 = vadd.f32 %v550_v39, %v488_v52  ;;  %v493_v20 = vmul.f32 %v1200_v61, %v1200_v61 }
 0x165   :  { %v552_v5 = vadd.f32 %v551_v43, %v489_v56  ;;  %v419_v48 = vadd.f32 %v418_v44, %v1127_v41  ;;  %v494_v41 = vmul.f32 %v1224_v22, %v1224_v22 }
 0x167   :  { %v420_v47 = vadd.f32 %v419_v48, %v1148_v15  ;;  %v553_v6 = vadd.f32 %v552_v5, %v490_v60 }
 0x169   :  { %v421_v1 = vadd.f32 %v420_v47, %v1176_v31  ;;  %v554_v9 = vadd.f32 %v553_v6, %v491_v0 }
 0x16b   :  { %v422_v10 = vadd.f32 %v421_v1, %v1200_v61  ;;  %v555_v13 = vadd.f32 %v554_v9, %v492_v4 }
 0x16d   :  { %v423_v55 = vadd.f32 %v422_v10, %v1224_v22  ;;  %v556_v50 = vadd.f32 %v555_v13, %v493_v20 }
 0x16f   :  { %v424_v15 = vadd.f32 %v423_v55, %v1246_v34  ;;  %v557_v59 = vadd.f32 %v556_v50, %v494_v41 }
 0x171   :  { %v558_v31 = vadd.f32 %v557_v59, %v495_v16  ;;  %v425_v17 = vadd.f32 %v424_v15, %v1267_v53 }
 0x173   :  { %v559_v61 = vadd.f32 %v558_v31, %v496_v63  ;;  %v426_v54 = vadd.f32 %v425_v17, %v1285_v51 }
 0x175   :  { %v560_v22 = vadd.f32 %v559_v61, %v497_v23  ;;  %v427_v58 = vadd.f32 %v426_v54, %v296_v3 }
 0x177   :  { %v561_v24 = vadd.f32 %v560_v22, %v498_v62  ;;  %v428_v25 = vadd.f32 %v427_v58, %v299_v33 }
 0x179   :  { %v429_v34 = vrot.slane %v428_v25, 4  ;;  %v562_v18 = vadd.f32 %v561_v24, %v499_v7 }
 0x17b   :  { %v430_v27 = vadd.f32 %v429_v34, %v428_v25  ;;  %v563_v28 = vrot.slane %v562_v18, 4 }
 0x17d   :  { %v431_v38 = vrot.slane %v430_v27, 2  ;;  %v564_v2 = vadd.f32 %v563_v28, %v562_v18 }
 0x17f   :  { %v432_v29 = vadd.f32 %v431_v38, %v430_v27  ;;  %v565_v53 = vrot.slane %v564_v2, 2 }
 0x181   :  { %v433_v12 = vrot.slane %v432_v29, 1  ;;  %v566_v11 = vadd.f32 %v565_v53, %v564_v2 }
 0x183   :  { %v434_v14 = vadd.f32 %v433_v12, %v432_v29  ;;  %v567_v26 = vrot.slane %v566_v11, 1 }
 0x185   :  { %435 = vst [vmem:[%s1369_s3] sm:$0x1] %v434_v14  ;;  %v568_v51 = vadd.f32 %v567_v26, %v566_v11 }
 0x187   :  { %569 = vst [vmem:[%s1369_s3 + $0x1] sm:$0x1] %v568_v51 }

// kernel: bottleneck_forward.7
= control target key start
LH: loop header
LB: loop body
LE: loop exit
PB: predicated region body
PF: predicated region fallthrough
CT: control target
= control target key end

     0   :  { %s1722_s1 = inlined_call_operand.vmem [shape: f32[128,128], index: 1, kind: input, shape index: {}]   ;;  %s1723_s2 = inlined_call_operand.vmem [shape: f32[1,128], index: 2, kind: input, shape index: {}]   ;;  %s1724_s3 = inlined_call_operand.vmem [shape: f32[1,128], index: 3, kind: input, shape index: {}]   ;;  %s1725_s0 = inlined_call_operand.vmem [shape: f32[512,128], index: 0, kind: input, shape index: {}]   ;;  %s1726_s4 = inlined_call_operand.vmem [shape: f32[512,128], index: 4, kind: output, shape index: {0}]   ;;  %s1727_s5 = inlined_call_operand.vmem [shape: f32[1,2,128], index: 5, kind: output, shape index: {1}]  }
   0x1   :  { %v298_v0 = vld [vmem:[%s1722_s1 + $0x78] sm:$0xff]  ;;  %v297_v1 = vld [vmem:[%s1722_s1 + $0x70] sm:$0xff]  ;;  %v296_v2 = vld [vmem:[%s1722_s1 + $0x68] sm:$0xff] }
   0x2   :  { %299 = vmatpush.msra.mxu0 %v298_v0  ;;  %784 = vmatpush.msra.mxu1 %v298_v0  ;;  %v295_v3 = vld [vmem:[%s1722_s1 + $0x60] sm:$0xff]  ;;  %v294_v4 = vld [vmem:[%s1722_s1 + $0x58] sm:$0xff]  ;;  %v293_v5 = vld [vmem:[%s1722_s1 + $0x50] sm:$0xff] }
   0x3   :  { %785 = vmatpush.msra.mxu2 %v298_v0  ;;  %786 = vmatpush.msra.mxu3 %v298_v0  ;;  %v292_v6 = vld [vmem:[%s1722_s1 + $0x48] sm:$0xff]  ;;  %v291_v7 = vld [vmem:[%s1722_s1 + $0x40] sm:$0xff]  ;;  %v290_v8 = vld [vmem:[%s1722_s1 + $0x38] sm:$0xff] }
   0x4   :  { %300 = vmatpush.msra.mxu0 %v297_v1  ;;  %787 = vmatpush.msra.mxu1 %v297_v1  ;;  %v289_v9 = vld [vmem:[%s1722_s1 + $0x30] sm:$0xff]  ;;  %v897_v10 = vld [vmem:[%s1723_s2] ss:$0 sm:$0xff]  ;;  %v288_v12 = vld [vmem:[%s1722_s1 + $0x28] sm:$0xff] }
   0x5   :  { %788 = vmatpush.msra.mxu2 %v297_v1  ;;  %789 = vmatpush.msra.mxu3 %v297_v1  ;;  %v19_v11 = vld [vmem:[%s1725_s0] sm:$0xff]  ;;  %v286_v16 = vld [vmem:[%s1722_s1 + $0x18] sm:$0xff]  ;;  %v285_v17 = vld [vmem:[%s1722_s1 + $0x10] sm:$0xff] }
   0x6   :  { %301 = vmatpush.msra.mxu0 %v296_v2  ;;  %790 = vmatpush.msra.mxu1 %v296_v2  ;;  %v287_v13 = vld [vmem:[%s1722_s1 + $0x20] sm:$0xff]  ;;  %v87_v14 = vmul.f32 %v897_v10, %v19_v11  ;;  %v20_v19 = vld [vmem:[%s1725_s0 + $0x8] sm:$0xff]  ;;  %v21_v29 = vld [vmem:[%s1725_s0 + $0x10] sm:$0xff] }
   0x7   :  { %791 = vmatpush.msra.mxu2 %v296_v2  ;;  %792 = vmatpush.msra.mxu3 %v296_v2  ;;  %v912_v15 = vld [vmem:[%s1724_s3] ss:$0 sm:$0xff]  ;;  %v284_v21 = vld [vmem:[%s1722_s1 + $0x8] sm:$0xff]  ;;  %v88_v25 = vmul.f32 %v897_v10, %v20_v19  ;;  %v89_v33 = vmul.f32 %v897_v10, %v21_v29  ;;  %v22_v37 = vld [vmem:[%s1725_s0 + $0x18] sm:$0xff] }
   0x8   :  { %302 = vmatpush.msra.mxu0 %v295_v3  ;;  %793 = vmatpush.msra.mxu1 %v295_v3  ;;  %v155_v18 = vadd.f32 %v912_v15, %v87_v14  ;;  %v35_v20 = vld [vmem:[%s1725_s0 + $0x80] sm:$0xff]  ;;  %v36_v30 = vld [vmem:[%s1725_s0 + $0x88] sm:$0xff]  ;;  %v37_v38 = vld [vmem:[%s1725_s0 + $0x90] sm:$0xff]  ;;  %v90_v41 = vmul.f32 %v897_v10, %v22_v37 }
   0x9   :  { %794 = vmatpush.msra.mxu2 %v295_v3  ;;  %795 = vmatpush.msra.mxu3 %v295_v3  ;;  %v103_v22 = vmul.f32 %v897_v10, %v35_v20  ;;  %v283_v23 = vld [vmem:[%s1722_s1] sm:$0xff]  ;;  %v156_v28 = vadd.f32 %v912_v15, %v88_v25  ;;  %v104_v31 = vmul.f32 %v897_v10, %v36_v30  ;;  %v38_v46 = vld [vmem:[%s1725_s0 + $0x98] sm:$0xff]  ;;  %v24_v57 = vld [vmem:[%s1725_s0 + $0x28] sm:$0xff] }
   0xa   :  { %303 = vmatpush.msra.mxu0 %v294_v4  ;;  %796 = vmatpush.msra.mxu1 %v294_v4  ;;  %v219_v24 = vmax.f32 %v155_v18, 0.0  ;;  %v157_v36 = vadd.f32 %v912_v15, %v89_v33  ;;  %v105_v39 = vmul.f32 %v897_v10, %v37_v38  ;;  %v158_v44 = vadd.f32 %v912_v15, %v90_v41  ;;  %v23_v45 = vld [vmem:[%s1725_s0 + $0x20] sm:$0xff]  ;;  %v52_v60 = vld [vmem:[%s1725_s0 + $0x108] sm:$0xff]  ;;  %v26_v19 = vld [vmem:[%s1725_s0 + $0x38] sm:$0xff] }
   0xb   :  { %797 = vmatpush.msra.mxu2 %v294_v4  ;;  %798 = vmatpush.msra.mxu3 %v294_v4  ;;  %v171_v26 = vadd.f32 %v912_v15, %v103_v22  ;;  %v220_v32 = vmax.f32 %v156_v28, 0.0  ;;  %v172_v34 = vadd.f32 %v912_v15, %v104_v31  ;;  %v106_v47 = vmul.f32 %v897_v10, %v38_v46  ;;  %v51_v48 = vld [vmem:[%s1725_s0 + $0x100] sm:$0xff]  ;;  %v41_v20 = vld [vmem:[%s1725_s0 + $0xb0] sm:$0xff]  ;;  %v54_v22 = vld [vmem:[%s1725_s0 + $0x118] sm:$0xff] }
   0xc   :  { %304 = vmatpush.msra.mxu0 %v293_v5  ;;  %799 = vmatpush.msra.mxu1 %v293_v5  ;;  %v221_v40 = vmax.f32 %v157_v36, 0.0  ;;  %v173_v42 = vadd.f32 %v912_v15, %v105_v39  ;;  %v222_v49 = vmax.f32 %v158_v44, 0.0  ;;  %v91_v50 = vmul.f32 %v897_v10, %v23_v45  ;;  %v39_v58 = vld [vmem:[%s1725_s0 + $0xa0] sm:$0xff] }
   0xd   :  { %800 = vmatpush.msra.mxu2 %v293_v5  ;;  %801 = vmatpush.msra.mxu3 %v293_v5  ;;  %v235_v27 = vmax.f32 %v171_v26, 0.0  ;;  %v236_v35 = vmax.f32 %v172_v34, 0.0  ;;  %v174_v51 = vadd.f32 %v912_v15, %v106_v47  ;;  %v119_v52 = vmul.f32 %v897_v10, %v51_v48  ;;  %v25_v5 = vld [vmem:[%s1725_s0 + $0x30] sm:$0xff]  ;;  %v27_v30 = vld [vmem:[%s1725_s0 + $0x40] sm:$0xff]  ;;  %v28_v47 = vld [vmem:[%s1725_s0 + $0x48] sm:$0xff] }
   0xe   :  { %305 = vmatpush.msra.mxu0 %v292_v6  ;;  %802 = vmatpush.msra.mxu1 %v292_v6  ;;  %v237_v43 = vmax.f32 %v173_v42, 0.0  ;;  %v159_v55 = vadd.f32 %v912_v15, %v91_v50  ;;  %v107_v59 = vmul.f32 %v897_v10, %v39_v58  ;;  %v92_v62 = vmul.f32 %v897_v10, %v24_v57  ;;  %v67_v36 = vld [vmem:[%s1725_s0 + $0x180] sm:$0xff] }
   0xf   :  { %803 = vmatpush.msra.mxu2 %v292_v6  ;;  %804 = vmatpush.msra.mxu3 %v292_v6  ;;  %v238_v53 = vmax.f32 %v174_v51, 0.0  ;;  %v187_v54 = vadd.f32 %v912_v15, %v119_v52  ;;  %v120_v0 = vmul.f32 %v897_v10, %v52_v60  ;;  %v40_v6 = vld [vmem:[%s1725_s0 + $0xa8] sm:$0xff]  ;;  %v93_v11 = vmul.f32 %v897_v10, %v25_v5  ;;  %v43_v48 = vld [vmem:[%s1725_s0 + $0xc0] sm:$0xff] }
  0x10   :  { %306 = vmatpush.msra.mxu0 %v291_v7  ;;  %805 = vmatpush.msra.mxu1 %v291_v7  ;;  %v223_v61 = vmax.f32 %v159_v55, 0.0  ;;  %v175_v63 = vadd.f32 %v912_v15, %v107_v59  ;;  %v160_v3 = vadd.f32 %v912_v15, %v92_v62  ;;  %v122_v26 = vmul.f32 %v897_v10, %v54_v22  ;;  %v56_v51 = vld [vmem:[%s1725_s0 + $0x128] sm:$0xff]  ;;  %v70_v22 = vld [vmem:[%s1725_s0 + $0x198] sm:$0xff] }
  0x11   :  { %806 = vmatpush.msra.mxu2 %v291_v7  ;;  %807 = vmatpush.msra.mxu3 %v291_v7  ;;  %v251_v56 = vmax.f32 %v187_v54, 0.0  ;;  %v188_v2 = vadd.f32 %v912_v15, %v120_v0  ;;  %v108_v7 = vmul.f32 %v897_v10, %v40_v6  ;;  %v95_v34 = vmul.f32 %v897_v10, %v27_v30  ;;  %v68_v52 = vld [vmem:[%s1725_s0 + $0x188] sm:$0xff] }
  0x12   :  { %307 = vmatpush.msra.mxu0 %v290_v8  ;;  %808 = vmatpush.msra.mxu1 %v290_v8  ;;  %v239_v1 = vmax.f32 %v175_v63, 0.0  ;;  %v190_v28 = vadd.f32 %v912_v15, %v122_v26  ;;  %v124_v55 = vmul.f32 %v897_v10, %v56_v51  ;;  %v44_v0 = vld [vmem:[%s1725_s0 + $0xc8] sm:$0xff]  ;;  %v138_v26 = vmul.f32 %v897_v10, %v70_v22 }
  0x13   :  { %809 = vmatpush.msra.mxu2 %v290_v8  ;;  %810 = vmatpush.msra.mxu3 %v290_v8  ;;  %v252_v4 = vmax.f32 %v188_v2, 0.0  ;;  %v53_v8 = vld [vmem:[%s1725_s0 + $0x110] sm:$0xff]  ;;  %v163_v44 = vadd.f32 %v912_v15, %v95_v34  ;;  %v46_v34 = vld [vmem:[%s1725_s0 + $0xd8] sm:$0xff] }
  0x14   :  { %308 = vmatpush.msra.mxu0 %v289_v9  ;;  %811 = vmatpush.msra.mxu1 %v289_v9  ;;  %v254_v31 = vmax.f32 %v190_v28, 0.0  ;;  %v192_v58 = vadd.f32 %v912_v15, %v124_v55 }
  0x15   :  { %812 = vmatpush.msra.mxu2 %v289_v9  ;;  %813 = vmatpush.msra.mxu3 %v289_v9  ;;  %v224_v9 = vmax.f32 %v160_v3, 0.0  ;;  %v227_v50 = vmax.f32 %v163_v44, 0.0  ;;  %v57_v3 = vld [vmem:[%s1725_s0 + $0x130] sm:$0xff] }
  0x16   :  { %309 = vmatpush.msra.mxu0 %v288_v12  ;;  %814 = vmatpush.msra.mxu1 %v288_v12  ;;  %v256_v62 = vmax.f32 %v192_v58, 0.0 }
  0x17   :  { %815 = vmatpush.msra.mxu2 %v288_v12  ;;  %816 = vmatpush.msra.mxu3 %v288_v12  ;;  %v176_v12 = vadd.f32 %v912_v15, %v108_v7  ;;  %v125_v7 = vmul.f32 %v897_v10, %v57_v3 }
  0x18   :  { %310 = vmatpush.msra.mxu0 %v287_v13  ;;  %817 = vmatpush.msra.mxu1 %v287_v13 }
  0x19   :  { %818 = vmatpush.msra.mxu2 %v287_v13  ;;  %819 = vmatpush.msra.mxu3 %v287_v13  ;;  %v121_v13 = vmul.f32 %v897_v10, %v53_v8  ;;  %v240_v14 = vmax.f32 %v176_v12, 0.0 }
  0x1a   :  { %311 = vmatpush.msra.mxu0 %v286_v16  ;;  %820 = vmatpush.msra.mxu1 %v286_v16 }
  0x1b   :  { %821 = vmatpush.msra.mxu2 %v286_v16  ;;  %822 = vmatpush.msra.mxu3 %v286_v16  ;;  %v189_v16 = vadd.f32 %v912_v15, %v121_v13 }
  0x1c   :  { %312 = vmatpush.msra.mxu0 %v285_v17  ;;  %823 = vmatpush.msra.mxu1 %v285_v17 }
  0x1d   :  { %824 = vmatpush.msra.mxu2 %v285_v17  ;;  %825 = vmatpush.msra.mxu3 %v285_v17  ;;  %v161_v17 = vadd.f32 %v912_v15, %v93_v11  ;;  %v253_v18 = vmax.f32 %v189_v16, 0.0  ;;  %v193_v11 = vadd.f32 %v912_v15, %v125_v7 }
  0x1e   :  { %313 = vmatpush.msra.mxu0 %v284_v21  ;;  %826 = vmatpush.msra.mxu1 %v284_v21 }
  0x1f   :  { %827 = vmatpush.msra.mxu2 %v284_v21  ;;  %828 = vmatpush.msra.mxu3 %v284_v21  ;;  %v109_v21 = vmul.f32 %v897_v10, %v41_v20 }
  0x20   :  { %314 = vmatpush.msra.mxu0 %v283_v23  ;;  %829 = vmatpush.msra.mxu1 %v283_v23 }
  0x21   :  { %315 = vmatmul.f32.vlgmr.msra.gmra.mxu0 %v219_v24  ;;  %363 = vmatmul.f32.vlgmr.msra.gmra.mxu1 %v235_v27  ;;  %v94_v24 = vmul.f32 %v897_v10, %v26_v19  ;;  %v177_v25 = vadd.f32 %v912_v15, %v109_v21  ;;  %v58_v21 = vld [vmem:[%s1725_s0 + $0x138] sm:$0xff] }
  0x22   :  { %830 = vmatpush.msra.mxu2 %v283_v23  ;;  %831 = vmatpush.msra.mxu3 %v283_v23  ;;  %v225_v23 = vmax.f32 %v161_v17, 0.0  ;;  %v30_v17 = vld [vmem:[%s1725_s0 + $0x58] sm:$0xff] }
  0x23   :  { %411 = vmatmul.f32.vlgmr.msra.gmra.mxu2 %v251_v56  ;;  %v241_v27 = vmax.f32 %v177_v25, 0.0  ;;  %v162_v29 = vadd.f32 %v912_v15, %v94_v24  ;;  %v136_v56 = vmul.f32 %v897_v10, %v68_v52  ;;  %v126_v25 = vmul.f32 %v897_v10, %v58_v21 }
  0x25   :  { %v226_v37 = vmax.f32 %v162_v29, 0.0  ;;  %v204_v59 = vadd.f32 %v912_v15, %v136_v56  ;;  %v194_v28 = vadd.f32 %v912_v15, %v126_v25  ;;  %v206_v29 = vadd.f32 %v912_v15, %v138_v26 }
  0x27   :  { %v268_v63 = vmax.f32 %v204_v59, 0.0 }
  0x29   :  { %318 = vmatmul.f32.gmra.mxu0 %v220_v32  ;;  %366 = vmatmul.f32.gmra.mxu1 %v236_v35  ;;  %v42_v32 = vld [vmem:[%s1725_s0 + $0xb8] sm:$0xff]  ;;  %v55_v35 = vld [vmem:[%s1725_s0 + $0x120] sm:$0xff] }
  0x2a   :  { %v110_v33 = vmul.f32 %v897_v10, %v42_v32  ;;  %v123_v39 = vmul.f32 %v897_v10, %v55_v35  ;;  %v258_v32 = vmax.f32 %v194_v28, 0.0  ;;  %v114_v35 = vmul.f32 %v897_v10, %v46_v34 }
  0x2b   :  { %414 = vmatmul.f32.gmra.mxu2 %v252_v4  ;;  %v69_v4 = vld [vmem:[%s1725_s0 + $0x190] sm:$0xff] }
  0x2c   :  { %v178_v38 = vadd.f32 %v912_v15, %v110_v33  ;;  %v191_v42 = vadd.f32 %v912_v15, %v123_v39  ;;  %v137_v8 = vmul.f32 %v897_v10, %v69_v4  ;;  %v270_v33 = vmax.f32 %v206_v29, 0.0 }
  0x2e   :  { %v242_v41 = vmax.f32 %v178_v38, 0.0  ;;  %v255_v45 = vmax.f32 %v191_v42, 0.0  ;;  %v205_v12 = vadd.f32 %v912_v15, %v137_v8  ;;  %v71_v38 = vld [vmem:[%s1725_s0 + $0x1a0] sm:$0xff] }
  0x2f   :  { %v139_v42 = vmul.f32 %v897_v10, %v71_v38  ;;  %v75_v38 = vld [vmem:[%s1725_s0 + $0x1c0] sm:$0xff] }
  0x30   :  { %v269_v16 = vmax.f32 %v205_v12, 0.0 }
  0x31   :  { %321 = vmatmul.f32.gmra.mxu0 %v221_v40  ;;  %369 = vmatmul.f32.gmra.mxu1 %v237_v43  ;;  %v135_v40 = vmul.f32 %v897_v10, %v67_v36 }
  0x33   :  { %417 = vmatmul.f32.gmra.mxu2 %v253_v18  ;;  %v203_v43 = vadd.f32 %v912_v15, %v135_v40  ;;  %v45_v18 = vld [vmem:[%s1725_s0 + $0xd0] sm:$0xff]  ;;  %v182_v40 = vadd.f32 %v912_v15, %v114_v35  ;;  %v50_v35 = vld [vmem:[%s1725_s0 + $0xf8] sm:$0xff] }
  0x34   :  { %v113_v19 = vmul.f32 %v897_v10, %v45_v18 }
  0x35   :  { %v267_v46 = vmax.f32 %v203_v43, 0.0  ;;  %v246_v43 = vmax.f32 %v182_v40, 0.0 }
  0x36   :  { %v181_v24 = vadd.f32 %v912_v15, %v113_v19  ;;  %v34_v19 = vld [vmem:[%s1725_s0 + $0x78] sm:$0xff] }
  0x37   :  { %459 = vmatmul.f32.vlgmr.msra.gmra.mxu3 %v267_v46  ;;  %v102_v25 = vmul.f32 %v897_v10, %v34_v19 }
  0x39   :  { %324 = vmatmul.f32.gmra.mxu0 %v222_v49  ;;  %372 = vmatmul.f32.gmra.mxu1 %v238_v53  ;;  %v111_v49 = vmul.f32 %v897_v10, %v43_v48  ;;  %v96_v53 = vmul.f32 %v897_v10, %v28_v47 }
  0x3b   :  { %420 = vmatmul.f32.gmra.mxu2 %v254_v31  ;;  %v179_v54 = vadd.f32 %v912_v15, %v111_v49  ;;  %v164_v60 = vadd.f32 %v912_v15, %v96_v53  ;;  %v31_v31 = vld [vmem:[%s1725_s0 + $0x60] sm:$0xff]  ;;  %v32_v49 = vld [vmem:[%s1725_s0 + $0x68] sm:$0xff] }
  0x3c   :  { %v99_v36 = vmul.f32 %v897_v10, %v31_v31  ;;  %v60_v53 = vld [vmem:[%s1725_s0 + $0x148] sm:$0xff]  ;;  %v100_v55 = vmul.f32 %v897_v10, %v32_v49 }
  0x3d   :  { %v243_v57 = vmax.f32 %v179_v54, 0.0  ;;  %v228_v5 = vmax.f32 %v164_v60, 0.0  ;;  %v72_v54 = vld [vmem:[%s1725_s0 + $0x1a8] sm:$0xff] }
  0x3e   :  { %v167_v46 = vadd.f32 %v912_v15, %v99_v36  ;;  %v140_v58 = vmul.f32 %v897_v10, %v72_v54  ;;  %v118_v36 = vmul.f32 %v897_v10, %v50_v35  ;;  %v76_v49 = vld [vmem:[%s1725_s0 + $0x1c8] sm:$0xff] }
  0x3f   :  { %462 = vmatmul.f32.gmra.mxu3 %v268_v63  ;;  %v33_v63 = vld [vmem:[%s1725_s0 + $0x70] sm:$0xff] }
  0x40   :  { %v231_v52 = vmax.f32 %v167_v46, 0.0  ;;  %v101_v4 = vmul.f32 %v897_v10, %v33_v63  ;;  %v186_v40 = vadd.f32 %v912_v15, %v118_v36 }
  0x41   :  { %327 = vmatmul.f32.gmra.mxu0 %v223_v61  ;;  %375 = vmatmul.f32.gmra.mxu1 %v239_v1  ;;  %v29_v61 = vld [vmem:[%s1725_s0 + $0x50] sm:$0xff]  ;;  %v112_v1 = vmul.f32 %v897_v10, %v44_v0 }
  0x42   :  { %v97_v2 = vmul.f32 %v897_v10, %v29_v61  ;;  %v208_v61 = vadd.f32 %v912_v15, %v140_v58  ;;  %v65_v58 = vld [vmem:[%s1725_s0 + $0x170] sm:$0xff] }
  0x43   :  { %423 = vmatmul.f32.gmra.mxu2 %v255_v45  ;;  %v180_v6 = vadd.f32 %v912_v15, %v112_v1  ;;  %v207_v45 = vadd.f32 %v912_v15, %v139_v42  ;;  %v143_v42 = vmul.f32 %v897_v10, %v75_v38 }
  0x44   :  { %v165_v13 = vadd.f32 %v912_v15, %v97_v2  ;;  %v272_v1 = vmax.f32 %v208_v61, 0.0  ;;  %v48_v2 = vld [vmem:[%s1725_s0 + $0xe8] sm:$0xff] }
  0x45   :  { %v271_v48 = vmax.f32 %v207_v45, 0.0  ;;  %v116_v3 = vmul.f32 %v897_v10, %v48_v2  ;;  %v211_v45 = vadd.f32 %v912_v15, %v143_v42  ;;  %v81_v42 = vld [vmem:[%s1725_s0 + $0x1f0] sm:$0xff] }
  0x46   :  { %v229_v20 = vmax.f32 %v165_v13, 0.0 }
  0x47   :  { %465 = vmatmul.f32.gmra.mxu3 %v269_v16  ;;  %v184_v8 = vadd.f32 %v912_v15, %v116_v3  ;;  %v169_v16 = vadd.f32 %v912_v15, %v101_v4 }
  0x49   :  { %330 = vmatmul.f32.gmra.mxu0 %v224_v9  ;;  %378 = vmatmul.f32.gmra.mxu1 %v240_v14  ;;  %v244_v9 = vmax.f32 %v180_v6, 0.0  ;;  %v257_v14 = vmax.f32 %v193_v11, 0.0  ;;  %v73_v6 = vld [vmem:[%s1725_s0 + $0x1b0] sm:$0xff]  ;;  %v248_v12 = vmax.f32 %v184_v8, 0.0  ;;  %v233_v22 = vmax.f32 %v169_v16, 0.0  ;;  %v66_v8 = vld [vmem:[%s1725_s0 + $0x178] sm:$0xff] }
  0x4a   :  { %v141_v11 = vmul.f32 %v897_v10, %v73_v6 }
  0x4b   :  { %426 = vmatmul.f32.gmra.mxu2 %v256_v62  ;;  %v168_v62 = vadd.f32 %v912_v15, %v100_v55 }
  0x4d   :  { %v232_v7 = vmax.f32 %v168_v62, 0.0 }
  0x4f   :  { %468 = vmatmul.f32.gmra.mxu3 %v270_v33 }
  0x51   :  { %333 = vmatmul.f32.gmra.mxu0 %v225_v23  ;;  %381 = vmatmul.f32.gmra.mxu1 %v241_v27  ;;  %v98_v23 = vmul.f32 %v897_v10, %v30_v17  ;;  %v245_v27 = vmax.f32 %v181_v24, 0.0  ;;  %v74_v24 = vld [vmem:[%s1725_s0 + $0x1b8] sm:$0xff] }
  0x52   :  { %v142_v28 = vmul.f32 %v897_v10, %v74_v24 }
  0x53   :  { %429 = vmatmul.f32.gmra.mxu2 %v257_v14  ;;  %v166_v30 = vadd.f32 %v912_v15, %v98_v23  ;;  %v209_v14 = vadd.f32 %v912_v15, %v141_v11  ;;  %v62_v23 = vld [vmem:[%s1725_s0 + $0x158] sm:$0xff]  ;;  %v134_v11 = vmul.f32 %v897_v10, %v66_v8 }
  0x54   :  { %v210_v31 = vadd.f32 %v912_v15, %v142_v28 }
  0x55   :  { %v230_v39 = vmax.f32 %v166_v30, 0.0  ;;  %v273_v18 = vmax.f32 %v209_v14, 0.0 }
  0x56   :  { %v274_v34 = vmax.f32 %v210_v31, 0.0 }
  0x57   :  { %471 = vmatmul.f32.gmra.mxu3 %v271_v48  ;;  %v64_v48 = vld [vmem:[%s1725_s0 + $0x168] sm:$0xff] }
  0x59   :  { %336 = vmatmul.f32.gmra.mxu0 %v226_v37  ;;  %384 = vmatmul.f32.gmra.mxu1 %v242_v41  ;;  %v59_v37 = vld [vmem:[%s1725_s0 + $0x140] sm:$0xff] }
  0x5a   :  { %v127_v41 = vmul.f32 %v897_v10, %v59_v37  ;;  %v63_v37 = vld [vmem:[%s1725_s0 + $0x160] sm:$0xff] }
  0x5b   :  { %432 = vmatmul.f32.gmra.mxu2 %v258_v32  ;;  %v170_v32 = vadd.f32 %v912_v15, %v102_v25 }
  0x5c   :  { %v195_v44 = vadd.f32 %v912_v15, %v127_v41  ;;  %v131_v41 = vmul.f32 %v897_v10, %v63_v37 }
  0x5e   :  { %v259_v47 = vmax.f32 %v195_v44, 0.0  ;;  %v199_v44 = vadd.f32 %v912_v15, %v131_v41 }
  0x5f   :  { %474 = vmatmul.f32.gmra.mxu3 %v272_v1 }
  0x60   :  { %v263_v46 = vmax.f32 %v199_v44, 0.0 }
  0x61   :  { %339 = vmatmul.f32.gmra.mxu0 %v227_v50  ;;  %387 = vmatmul.f32.gmra.mxu1 %v243_v57  ;;  %v47_v50 = vld [vmem:[%s1725_s0 + $0xe0] sm:$0xff]  ;;  %v128_v57 = vmul.f32 %v897_v10, %v60_v53 }
  0x62   :  { %v115_v51 = vmul.f32 %v897_v10, %v47_v50  ;;  %v132_v50 = vmul.f32 %v897_v10, %v64_v48 }
  0x63   :  { %435 = vmatmul.f32.gmra.mxu2 %v259_v47  ;;  %v196_v60 = vadd.f32 %v912_v15, %v128_v57  ;;  %v275_v47 = vmax.f32 %v211_v45, 0.0 }
  0x64   :  { %v183_v56 = vadd.f32 %v912_v15, %v115_v51  ;;  %v144_v51 = vmul.f32 %v897_v10, %v76_v49  ;;  %v200_v54 = vadd.f32 %v912_v15, %v132_v50  ;;  %v82_v49 = vld [vmem:[%s1725_s0 + $0x1f8] sm:$0xff] }
  0x65   :  { %v260_v0 = vmax.f32 %v196_v60, 0.0  ;;  %v133_v60 = vmul.f32 %v897_v10, %v65_v58  ;;  %v150_v50 = vmul.f32 %v897_v10, %v82_v49 }
  0x66   :  { %v247_v59 = vmax.f32 %v183_v56, 0.0  ;;  %v212_v55 = vadd.f32 %v912_v15, %v144_v51  ;;  %v264_v56 = vmax.f32 %v200_v54, 0.0 }
  0x67   :  { %477 = vmatmul.f32.gmra.mxu3 %v273_v18  ;;  %v201_v3 = vadd.f32 %v912_v15, %v133_v60  ;;  %v202_v18 = vadd.f32 %v912_v15, %v134_v11 }
  0x68   :  { %v276_v57 = vmax.f32 %v212_v55, 0.0  ;;  %v218_v55 = vadd.f32 %v912_v15, %v150_v50 }
  0x69   :  { %342 = vmatmul.f32.gmra.mxu0 %v228_v5  ;;  %390 = vmatmul.f32.gmra.mxu1 %v244_v9  ;;  %v61_v5 = vld [vmem:[%s1725_s0 + $0x150] sm:$0xff]  ;;  %v265_v6 = vmax.f32 %v201_v3, 0.0 }
  0x6a   :  { %v129_v9 = vmul.f32 %v897_v10, %v61_v5 }
  0x6b   :  { %438 = vmatmul.f32.gmra.mxu2 %v260_v0 }
  0x6c   :  { %v197_v13 = vadd.f32 %v912_v15, %v129_v9  ;;  %v78_v9 = vld [vmem:[%s1725_s0 + $0x1d8] sm:$0xff] }
  0x6e   :  { %v261_v17 = vmax.f32 %v197_v13, 0.0 }
  0x6f   :  { %480 = vmatmul.f32.gmra.mxu3 %v274_v34 }
  0x71   :  { %345 = vmatmul.f32.gmra.mxu0 %v229_v20  ;;  %393 = vmatmul.f32.gmra.mxu1 %v245_v27  ;;  %v49_v20 = vld [vmem:[%s1725_s0 + $0xf0] sm:$0xff]  ;;  %v130_v27 = vmul.f32 %v897_v10, %v62_v23  ;;  %v79_v23 = vld [vmem:[%s1725_s0 + $0x1e0] sm:$0xff] }
  0x72   :  { %v117_v21 = vmul.f32 %v897_v10, %v49_v20  ;;  %v147_v24 = vmul.f32 %v897_v10, %v79_v23 }
  0x73   :  { %441 = vmatmul.f32.gmra.mxu2 %v261_v17  ;;  %v198_v30 = vadd.f32 %v912_v15, %v130_v27 }
  0x74   :  { %v185_v26 = vadd.f32 %v912_v15, %v117_v21  ;;  %v266_v21 = vmax.f32 %v202_v18, 0.0 }
  0x75   :  { %v262_v33 = vmax.f32 %v198_v30, 0.0 }
  0x76   :  { %v249_v29 = vmax.f32 %v185_v26, 0.0 }
  0x77   :  { %483 = vmatmul.f32.gmra.mxu3 %v275_v47 }
  0x79   :  { %348 = vmatmul.f32.gmra.mxu0 %v230_v39  ;;  %396 = vmatmul.f32.gmra.mxu1 %v246_v43  ;;  %v234_v39 = vmax.f32 %v170_v32, 0.0  ;;  %v250_v43 = vmax.f32 %v186_v40, 0.0  ;;  %v80_v32 = vld [vmem:[%s1725_s0 + $0x1e8] sm:$0xff] }
  0x7b   :  { %444 = vmatmul.f32.gmra.mxu2 %v262_v33  ;;  %v148_v33 = vmul.f32 %v897_v10, %v80_v32 }
  0x7f   :  { %486 = vmatmul.f32.gmra.mxu3 %v276_v57 }
  0x81   :  { %351 = vmatmul.f32.gmra.mxu0 %v231_v52  ;;  %399 = vmatmul.f32.gmra.mxu1 %v247_v59  ;;  %v77_v59 = vld [vmem:[%s1725_s0 + $0x1d0] sm:$0xff] }
  0x82   :  { %v145_v61 = vmul.f32 %v897_v10, %v77_v59 }
  0x83   :  { %447 = vmatmul.f32.gmra.mxu2 %v263_v46 }
  0x84   :  { %v213_v4 = vadd.f32 %v912_v15, %v145_v61 }
  0x89   :  { %354 = vmatmul.f32.gmra.mxu0 %v232_v7  ;;  %402 = vmatmul.f32.gmra.mxu1 %v248_v12  ;;  %v277_v7 = vmax.f32 %v213_v4, 0.0  ;;  %v146_v12 = vmul.f32 %v897_v10, %v78_v9 }
  0x8b   :  { %450 = vmatmul.f32.gmra.mxu2 %v264_v56  ;;  %489 = vmatmul.f32.gmra.mxu3 %v277_v7  ;;  %v214_v19 = vadd.f32 %v912_v15, %v146_v12 }
  0x91   :  { %357 = vmatmul.f32.gmra.mxu0 %v233_v22  ;;  %405 = vmatmul.f32.gmra.mxu1 %v249_v29  ;;  %v278_v22 = vmax.f32 %v214_v19, 0.0  ;;  %v215_v29 = vadd.f32 %v912_v15, %v147_v24 }
  0x93   :  { %453 = vmatmul.f32.gmra.mxu2 %v265_v6  ;;  %492 = vmatmul.f32.gmra.mxu3 %v278_v22  ;;  %v279_v31 = vmax.f32 %v215_v29, 0.0 }
  0x99   :  { %360 = vmatmul.f32.gmra.mxu0 %v234_v39  ;;  %408 = vmatmul.f32.gmra.mxu1 %v250_v43  ;;  %v216_v39 = vadd.f32 %v912_v15, %v148_v33  ;;  %v149_v43 = vmul.f32 %v897_v10, %v81_v42  ;;  %v282_v10 = vmax.f32 %v218_v55, 0.0 }
  0x9b   :  { %456 = vmatmul.f32.gmra.mxu2 %v266_v21  ;;  %495 = vmatmul.f32.gmra.mxu3 %v279_v31  ;;  %v280_v41 = vmax.f32 %v216_v39, 0.0  ;;  %v217_v47 = vadd.f32 %v912_v15, %v149_v43 }
  0x9d   :  { %v281_v48 = vmax.f32 %v217_v47, 0.0 }
  0x9e   :  { %v316_v52 = vpop.f32.mrf.mxu0  ;;  %v1200_v53 = vpop.f32.mrf.mxu1 }
  0x9f   :  { %508 = vst [vmem:[%s1726_s4] sm:$0xff] %v316_v52  ;;  %v642_v0 = vmul.f32 %v316_v52, %v316_v52 }
  0xa0   :  { %524 = vst [vmem:[%s1726_s4 + $0x80] sm:$0xff] %v1200_v53 }
  0xa3   :  { %498 = vmatmul.f32.gmra.mxu3 %v280_v41 }
  0xa6   :  { %v319_v62 = vpop.f32.mrf.mxu0  ;;  %v1219_v63 = vpop.f32.mrf.mxu1 }
  0xa7   :  { %509 = vst [vmem:[%s1726_s4 + $0x8] sm:$0xff] %v319_v62  ;;  %v572_v1 = vadd.f32 %v319_v62, %v316_v52  ;;  %v643_v2 = vmul.f32 %v319_v62, %v319_v62  ;;  %v1274_v38 = vpop.f32.mrf.mxu2 }
  0xa8   :  { %525 = vst [vmem:[%s1726_s4 + $0x88] sm:$0xff] %v1219_v63 }
  0xa9   :  { %v706_v5 = vadd.f32 %v643_v2, %v642_v0  ;;  %540 = vst [vmem:[%s1726_s4 + $0x100] sm:$0xff] %v1274_v38 }
  0xab   :  { %501 = vmatmul.f32.gmra.mxu3 %v281_v48 }
  0xae   :  { %v322_v13 = vpop.f32.mrf.mxu0  ;;  %v1238_v14 = vpop.f32.mrf.mxu1 }
  0xaf   :  { %510 = vst [vmem:[%s1726_s4 + $0x10] sm:$0xff] %v322_v13  ;;  %v573_v16 = vadd.f32 %v572_v1, %v322_v13  ;;  %v644_v17 = vmul.f32 %v322_v13, %v322_v13  ;;  %v1299_v46 = vpop.f32.mrf.mxu2 }
  0xb0   :  { %526 = vst [vmem:[%s1726_s4 + $0x90] sm:$0xff] %v1238_v14 }
  0xb1   :  { %v707_v20 = vadd.f32 %v706_v5, %v644_v17  ;;  %541 = vst [vmem:[%s1726_s4 + $0x108] sm:$0xff] %v1299_v46 }
  0xb3   :  { %504 = vmatmul.f32.gmra.mxu3 %v282_v10 }
  0xb6   :  { %v325_v25 = vpop.f32.mrf.mxu0  ;;  %v1253_v26 = vpop.f32.mrf.mxu1 }
  0xb7   :  { %511 = vst [vmem:[%s1726_s4 + $0x18] sm:$0xff] %v325_v25  ;;  %v574_v27 = vadd.f32 %v573_v16, %v325_v25  ;;  %v645_v28 = vmul.f32 %v325_v25, %v325_v25  ;;  %v1319_v54 = vpop.f32.mrf.mxu2 }
  0xb8   :  { %527 = vst [vmem:[%s1726_s4 + $0x98] sm:$0xff] %v1253_v26 }
  0xb9   :  { %v708_v30 = vadd.f32 %v707_v20, %v645_v28  ;;  %542 = vst [vmem:[%s1726_s4 + $0x110] sm:$0xff] %v1319_v54 }
  0xba   :  { %v1352_v61 = vpop.f32.mrf.mxu3 }
  0xbb   :  { %556 = vst [vmem:[%s1726_s4 + $0x180] sm:$0xff] %v1352_v61 }
  0xbe   :  { %v328_v34 = vpop.f32.mrf.mxu0  ;;  %v1267_v35 = vpop.f32.mrf.mxu1 }
  0xbf   :  { %512 = vst [vmem:[%s1726_s4 + $0x20] sm:$0xff] %v328_v34  ;;  %v1272_v36 = vadd.f32 %v574_v27, %v328_v34  ;;  %v646_v37 = vmul.f32 %v328_v34, %v328_v34  ;;  %v1335_v15 = vpop.f32.mrf.mxu2 }
  0xc0   :  { %528 = vst [vmem:[%s1726_s4 + $0xa0] sm:$0xff] %v1267_v35 }
  0xc1   :  { %v1281_v40 = vadd.f32 %v708_v30, %v646_v37  ;;  %543 = vst [vmem:[%s1726_s4 + $0x118] sm:$0xff] %v1335_v15 }
  0xc2   :  { %v1373_v2 = vpop.f32.mrf.mxu3 }
  0xc3   :  { %557 = vst [vmem:[%s1726_s4 + $0x188] sm:$0xff] %v1373_v2 }
  0xc6   :  { %v1291_v44 = vpop.f32.mrf.mxu0  ;;  %v1293_v45 = vpop.f32.mrf.mxu1 }
  0xc7   :  { %513 = vst [vmem:[%s1726_s4 + $0x28] sm:$0xff] %v1291_v44  ;;  %v1350_v60 = vpop.f32.mrf.mxu2  ;;  %v647_v18 = vmul.f32 %v1291_v44, %v1291_v44  ;;  %v576_v19 = vadd.f32 %v1272_v36, %v1291_v44 }
  0xc8   :  { %529 = vst [vmem:[%s1726_s4 + $0xa8] sm:$0xff] %v1293_v45 }
  0xc9   :  { %544 = vst [vmem:[%s1726_s4 + $0x120] sm:$0xff] %v1350_v60  ;;  %v710_v21 = vadd.f32 %v1281_v40, %v647_v18 }
  0xca   :  { %v1394_v6 = vpop.f32.mrf.mxu3 }
  0xcb   :  { %558 = vst [vmem:[%s1726_s4 + $0x190] sm:$0xff] %v1394_v6 }
  0xce   :  { %v334_v51 = vpop.f32.mrf.mxu0  ;;  %v1314_v52 = vpop.f32.mrf.mxu1 }
  0xcf   :  { %514 = vst [vmem:[%s1726_s4 + $0x30] sm:$0xff] %v334_v51  ;;  %v1371_v1 = vpop.f32.mrf.mxu2  ;;  %v648_v20 = vmul.f32 %v334_v51, %v334_v51  ;;  %v577_v22 = vadd.f32 %v576_v19, %v334_v51 }
  0xd0   :  { %530 = vst [vmem:[%s1726_s4 + $0xb0] sm:$0xff] %v1314_v52 }
  0xd1   :  { %545 = vst [vmem:[%s1726_s4 + $0x128] sm:$0xff] %v1371_v1  ;;  %v711_v27 = vadd.f32 %v710_v21, %v648_v20 }
  0xd2   :  { %v1415_v11 = vpop.f32.mrf.mxu3 }
  0xd3   :  { %559 = vst [vmem:[%s1726_s4 + $0x198] sm:$0xff] %v1415_v11 }
  0xd6   :  { %v337_v56 = vpop.f32.mrf.mxu0  ;;  %v1330_v57 = vpop.f32.mrf.mxu1 }
  0xd7   :  { %515 = vst [vmem:[%s1726_s4 + $0x38] sm:$0xff] %v337_v56  ;;  %v1392_v5 = vpop.f32.mrf.mxu2  ;;  %v649_v23 = vmul.f32 %v337_v56, %v337_v56  ;;  %v578_v28 = vadd.f32 %v577_v22, %v337_v56 }
  0xd8   :  { %531 = vst [vmem:[%s1726_s4 + $0xb8] sm:$0xff] %v1330_v57 }
  0xd9   :  { %546 = vst [vmem:[%s1726_s4 + $0x130] sm:$0xff] %v1392_v5  ;;  %v712_v32 = vadd.f32 %v711_v27, %v649_v23 }
  0xda   :  { %v1436_v17 = vpop.f32.mrf.mxu3 }
  0xdb   :  { %560 = vst [vmem:[%s1726_s4 + $0x1a0] sm:$0xff] %v1436_v17 }
  0xde   :  { %v340_v58 = vpop.f32.mrf.mxu0  ;;  %v1345_v59 = vpop.f32.mrf.mxu1 }
  0xdf   :  { %516 = vst [vmem:[%s1726_s4 + $0x40] sm:$0xff] %v340_v58  ;;  %v1413_v9 = vpop.f32.mrf.mxu2  ;;  %v650_v29 = vmul.f32 %v340_v58, %v340_v58  ;;  %v579_v33 = vadd.f32 %v578_v28, %v340_v58 }
  0xe0   :  { %532 = vst [vmem:[%s1726_s4 + $0xc0] sm:$0xff] %v1345_v59 }
  0xe1   :  { %547 = vst [vmem:[%s1726_s4 + $0x138] sm:$0xff] %v1413_v9  ;;  %v713_v36 = vadd.f32 %v712_v32, %v650_v29  ;;  %v659_v32 = vmul.f32 %v1219_v63, %v1219_v63 }
  0xe2   :  { %v1462_v31 = vpop.f32.mrf.mxu3 }
  0xe3   :  { %561 = vst [vmem:[%s1726_s4 + $0x1a8] sm:$0xff] %v1462_v31 }
  0xe6   :  { %v343_v62 = vpop.f32.mrf.mxu0  ;;  %v1366_v0 = vpop.f32.mrf.mxu1 }
  0xe7   :  { %517 = vst [vmem:[%s1726_s4 + $0x48] sm:$0xff] %v343_v62  ;;  %v1434_v16 = vpop.f32.mrf.mxu2  ;;  %v651_v34 = vmul.f32 %v343_v62, %v343_v62  ;;  %v580_v37 = vadd.f32 %v579_v33, %v343_v62 }
  0xe8   :  { %533 = vst [vmem:[%s1726_s4 + $0xc8] sm:$0xff] %v1366_v0 }
  0xe9   :  { %548 = vst [vmem:[%s1726_s4 + $0x140] sm:$0xff] %v1434_v16  ;;  %v714_v40 = vadd.f32 %v713_v36, %v651_v34 }
  0xea   :  { %v1483_v51 = vpop.f32.mrf.mxu3 }
  0xeb   :  { %562 = vst [vmem:[%s1726_s4 + $0x1b0] sm:$0xff] %v1483_v51 }
  0xee   :  { %v346_v3 = vpop.f32.mrf.mxu0  ;;  %v1387_v4 = vpop.f32.mrf.mxu1 }
  0xef   :  { %518 = vst [vmem:[%s1726_s4 + $0x50] sm:$0xff] %v346_v3  ;;  %v1460_v30 = vpop.f32.mrf.mxu2  ;;  %v652_v39 = vmul.f32 %v346_v3, %v346_v3  ;;  %v581_v41 = vadd.f32 %v580_v37, %v346_v3 }
  0xf0   :  { %534 = vst [vmem:[%s1726_s4 + $0xd0] sm:$0xff] %v1387_v4 }
  0xf1   :  { %549 = vst [vmem:[%s1726_s4 + $0x148] sm:$0xff] %v1460_v30  ;;  %v715_v47 = vadd.f32 %v714_v40, %v652_v39  ;;  %v661_v39 = vmul.f32 %v1253_v26, %v1253_v26 }
  0xf2   :  { %v1504_v27 = vpop.f32.mrf.mxu3 }
  0xf3   :  { %563 = vst [vmem:[%s1726_s4 + $0x1b8] sm:$0xff] %v1504_v27 }
  0xf6   :  { %v349_v7 = vpop.f32.mrf.mxu0  ;;  %v1408_v8 = vpop.f32.mrf.mxu1 }
  0xf7   :  { %519 = vst [vmem:[%s1726_s4 + $0x58] sm:$0xff] %v349_v7  ;;  %v653_v42 = vmul.f32 %v349_v7, %v349_v7  ;;  %v582_v48 = vadd.f32 %v581_v41, %v349_v7  ;;  %v1481_v50 = vpop.f32.mrf.mxu2 }
  0xf8   :  { %535 = vst [vmem:[%s1726_s4 + $0xd8] sm:$0xff] %v1408_v8 }
  0xf9   :  { %v716_v55 = vadd.f32 %v715_v47, %v653_v42  ;;  %550 = vst [vmem:[%s1726_s4 + $0x150] sm:$0xff] %v1481_v50 }
  0xfe   :  { %v352_v12 = vpop.f32.mrf.mxu0  ;;  %v1429_v13 = vpop.f32.mrf.mxu1 }
  0xff   :  { %520 = vst [vmem:[%s1726_s4 + $0x60] sm:$0xff] %v352_v12  ;;  %v654_v49 = vmul.f32 %v352_v12, %v352_v12  ;;  %v583_v10 = vadd.f32 %v582_v48, %v352_v12  ;;  %v1502_v23 = vpop.f32.mrf.mxu2 }
 0x100   :  { %536 = vst [vmem:[%s1726_s4 + $0xe0] sm:$0xff] %v1429_v13 }
 0x101   :  { %v717_v58 = vadd.f32 %v716_v55, %v654_v49  ;;  %551 = vst [vmem:[%s1726_s4 + $0x158] sm:$0xff] %v1502_v23  ;;  %v664_v55 = vmul.f32 %v1314_v52, %v1314_v52 }
 0x106   :  { %v355_v24 = vpop.f32.mrf.mxu0  ;;  %v1455_v25 = vpop.f32.mrf.mxu1 }
 0x107   :  { %521 = vst [vmem:[%s1726_s4 + $0x68] sm:$0xff] %v355_v24  ;;  %v655_v56 = vmul.f32 %v355_v24, %v355_v24  ;;  %v584_v62 = vadd.f32 %v583_v10, %v355_v24  ;;  %v658_v24 = vmul.f32 %v1200_v53, %v1200_v53  ;;  %v1530_v42 = vpop.f32.mrf.mxu2 }
 0x108   :  { %537 = vst [vmem:[%s1726_s4 + $0xe8] sm:$0xff] %v1455_v25 }
 0x109   :  { %v718_v7 = vadd.f32 %v717_v58, %v655_v56  ;;  %552 = vst [vmem:[%s1726_s4 + $0x160] sm:$0xff] %v1530_v42 }
 0x10e   :  { %v358_v43 = vpop.f32.mrf.mxu0  ;;  %v1476_v44 = vpop.f32.mrf.mxu1 }
 0x10f   :  { %522 = vst [vmem:[%s1726_s4 + $0x70] sm:$0xff] %v358_v43  ;;  %v656_v3 = vmul.f32 %v358_v43, %v358_v43  ;;  %v585_v18 = vadd.f32 %v584_v62, %v358_v43  ;;  %v1532_v43 = vpop.f32.mrf.mxu3 }
 0x110   :  { %538 = vst [vmem:[%s1726_s4 + $0xf0] sm:$0xff] %v1476_v44 }
 0x111   :  { %v719_v12 = vadd.f32 %v718_v7, %v656_v3  ;;  %564 = vst [vmem:[%s1726_s4 + $0x1c0] sm:$0xff] %v1532_v43  ;;  %v1554_v3 = vpop.f32.mrf.mxu2 }
 0x112   :  { %553 = vst [vmem:[%s1726_s4 + $0x168] sm:$0xff] %v1554_v3 }
 0x116   :  { %v361_v19 = vpop.f32.mrf.mxu0  ;;  %v1497_v20 = vpop.f32.mrf.mxu1 }
 0x117   :  { %523 = vst [vmem:[%s1726_s4 + $0x78] sm:$0xff] %v361_v19  ;;  %v586_v21 = vadd.f32 %v585_v18, %v361_v19  ;;  %v657_v22 = vmul.f32 %v361_v19, %v361_v19  ;;  %v1556_v7 = vpop.f32.mrf.mxu3 }
 0x118   :  { %539 = vst [vmem:[%s1726_s4 + $0xf8] sm:$0xff] %v1497_v20 }
 0x119   :  { %v587_v28 = vadd.f32 %v586_v21, %v1200_v53  ;;  %v720_v29 = vadd.f32 %v719_v12, %v657_v22  ;;  %v660_v53 = vmul.f32 %v1238_v14, %v1238_v14  ;;  %565 = vst [vmem:[%s1726_s4 + $0x1c8] sm:$0xff] %v1556_v7  ;;  %v668_v21 = vmul.f32 %v1387_v4, %v1387_v4 }
 0x11b   :  { %v588_v33 = vadd.f32 %v587_v28, %v1219_v63  ;;  %v721_v34 = vadd.f32 %v720_v29, %v658_v24  ;;  %v662_v63 = vmul.f32 %v1267_v35, %v1267_v35  ;;  %v669_v28 = vmul.f32 %v1408_v8, %v1408_v8 }
 0x11d   :  { %v589_v36 = vadd.f32 %v588_v33, %v1238_v14  ;;  %v722_v37 = vadd.f32 %v721_v34, %v659_v32  ;;  %v1578_v32 = vpop.f32.mrf.mxu2 }
 0x11e   :  { %554 = vst [vmem:[%s1726_s4 + $0x170] sm:$0xff] %v1578_v32 }
 0x11f   :  { %v590_v40 = vadd.f32 %v589_v36, %v1253_v26  ;;  %v723_v41 = vadd.f32 %v722_v37, %v660_v53  ;;  %v663_v26 = vmul.f32 %v1293_v45, %v1293_v45  ;;  %v1580_v33 = vpop.f32.mrf.mxu3  ;;  %v671_v36 = vmul.f32 %v1455_v25, %v1455_v25 }
 0x120   :  { %566 = vst [vmem:[%s1726_s4 + $0x1d0] sm:$0xff] %v1580_v33 }
 0x121   :  { %v591_v14 = vadd.f32 %v590_v40, %v1267_v35  ;;  %v724_v47 = vadd.f32 %v723_v41, %v661_v39  ;;  %v665_v35 = vmul.f32 %v1330_v57, %v1330_v57  ;;  %v672_v40 = vmul.f32 %v1476_v44, %v1476_v44 }
 0x123   :  { %v592_v48 = vadd.f32 %v591_v14, %v1293_v45  ;;  %v725_v49 = vadd.f32 %v724_v47, %v662_v63  ;;  %v666_v45 = vmul.f32 %v1345_v59, %v1345_v59 }
 0x125   :  { %v726_v10 = vadd.f32 %v725_v49, %v663_v26  ;;  %v593_v56 = vadd.f32 %v592_v48, %v1314_v52  ;;  %v457_v14 = vpop.f32.mrf.mxu2 }
 0x126   :  { %555 = vst [vmem:[%s1726_s4 + $0x178] sm:$0xff] %v457_v14 }
 0x127   :  { %v594_v58 = vadd.f32 %v593_v56, %v1330_v57  ;;  %v727_v62 = vadd.f32 %v726_v10, %v664_v55  ;;  %v667_v57 = vmul.f32 %v1366_v0, %v1366_v0  ;;  %v1602_v47 = vpop.f32.mrf.mxu3  ;;  %v676_v55 = vmul.f32 %v1319_v54, %v1319_v54 }
 0x128   :  { %567 = vst [vmem:[%s1726_s4 + $0x1d8] sm:$0xff] %v1602_v47 }
 0x129   :  { %v595_v52 = vadd.f32 %v594_v58, %v1345_v59  ;;  %v728_v18 = vadd.f32 %v727_v62, %v665_v35 }
 0x12b   :  { %v596_v19 = vadd.f32 %v595_v52, %v1366_v0  ;;  %v729_v12 = vadd.f32 %v728_v18, %v666_v45  ;;  %v679_v52 = vmul.f32 %v1371_v1, %v1371_v1 }
 0x12d   :  { %v597_v22 = vadd.f32 %v596_v19, %v1387_v4  ;;  %v730_v24 = vadd.f32 %v729_v12, %v667_v57  ;;  %v670_v4 = vmul.f32 %v1429_v13, %v1429_v13  ;;  %v680_v57 = vmul.f32 %v1392_v5, %v1392_v5 }
 0x12f   :  { %v598_v59 = vadd.f32 %v597_v22, %v1408_v8  ;;  %v731_v29 = vadd.f32 %v730_v24, %v668_v21  ;;  %v1623_v62 = vpop.f32.mrf.mxu3  ;;  %v681_v21 = vmul.f32 %v1413_v9, %v1413_v9 }
 0x130   :  { %568 = vst [vmem:[%s1726_s4 + $0x1e0] sm:$0xff] %v1623_v62 }
 0x131   :  { %v732_v0 = vadd.f32 %v731_v29, %v669_v28  ;;  %v599_v34 = vadd.f32 %v598_v59, %v1429_v13  ;;  %v673_v13 = vmul.f32 %v1497_v20, %v1497_v20 }
 0x133   :  { %v733_v8 = vadd.f32 %v732_v0, %v670_v4  ;;  %v600_v53 = vadd.f32 %v599_v34, %v1455_v25  ;;  %v674_v25 = vmul.f32 %v1274_v38, %v1274_v38  ;;  %v684_v0 = vmul.f32 %v1481_v50, %v1481_v50 }
 0x135   :  { %v734_v37 = vadd.f32 %v733_v8, %v671_v36  ;;  %v601_v39 = vadd.f32 %v600_v53, %v1476_v44  ;;  %v675_v44 = vmul.f32 %v1299_v46, %v1299_v46  ;;  %v685_v53 = vmul.f32 %v1502_v23, %v1502_v23 }
 0x137   :  { %v735_v41 = vadd.f32 %v734_v37, %v672_v40  ;;  %v602_v63 = vadd.f32 %v601_v39, %v1497_v20  ;;  %v686_v39 = vmul.f32 %v1530_v42, %v1530_v42 }
 0x139   :  { %v603_v26 = vadd.f32 %v602_v63, %v1274_v38  ;;  %v736_v48 = vadd.f32 %v735_v41, %v673_v13  ;;  %v677_v38 = vmul.f32 %v1335_v15, %v1335_v15  ;;  %v687_v13 = vmul.f32 %v1554_v3, %v1554_v3 }
 0x13a   :  { %v688_v63 = vmul.f32 %v1578_v32, %v1578_v32 }
 0x13b   :  { %v604_v20 = vadd.f32 %v603_v26, %v1299_v46  ;;  %v737_v49 = vadd.f32 %v736_v48, %v674_v25  ;;  %v678_v46 = vmul.f32 %v1350_v60, %v1350_v60  ;;  %v689_v25 = vmul.f32 %v457_v14, %v457_v14 }
 0x13d   :  { %v605_v10 = vadd.f32 %v604_v20, %v1319_v54  ;;  %v738_v56 = vadd.f32 %v737_v49, %v675_v44  ;;  %v691_v49 = vmul.f32 %v1373_v2, %v1373_v2 }
 0x13f   :  { %v606_v35 = vadd.f32 %v605_v10, %v1335_v15  ;;  %v739_v58 = vadd.f32 %v738_v56, %v676_v55 }
 0x141   :  { %v607_v45 = vadd.f32 %v606_v35, %v1350_v60  ;;  %v740_v54 = vadd.f32 %v739_v58, %v677_v38  ;;  %v1641_v60 = vpop.f32.mrf.mxu3  ;;  %v693_v38 = vmul.f32 %v1415_v11, %v1415_v11 }
 0x142   :  { %569 = vst [vmem:[%s1726_s4 + $0x1e8] sm:$0xff] %v1641_v60 }
 0x143   :  { %v608_v18 = vadd.f32 %v607_v45, %v1371_v1  ;;  %v741_v15 = vadd.f32 %v740_v54, %v678_v46  ;;  %v682_v1 = vmul.f32 %v1434_v16, %v1434_v16 }
 0x145   :  { %v742_v19 = vadd.f32 %v741_v15, %v679_v52  ;;  %v609_v12 = vadd.f32 %v608_v18, %v1392_v5  ;;  %v683_v5 = vmul.f32 %v1460_v30, %v1460_v30 }
 0x147   :  { %v610_v22 = vadd.f32 %v609_v12, %v1413_v9  ;;  %v743_v24 = vadd.f32 %v742_v19, %v680_v57 }
 0x149   :  { %v611_v59 = vadd.f32 %v610_v22, %v1434_v16  ;;  %v744_v28 = vadd.f32 %v743_v24, %v681_v21  ;;  %v502_v16 = vpop.f32.mrf.mxu3 }
 0x14a   :  { %570 = vst [vmem:[%s1726_s4 + $0x1f0] sm:$0xff] %v502_v16 }
 0x14b   :  { %v612_v29 = vadd.f32 %v611_v59, %v1460_v30  ;;  %v745_v9 = vadd.f32 %v744_v28, %v682_v1  ;;  %v701_v28 = vmul.f32 %v1602_v47, %v1602_v47 }
 0x14d   :  { %v613_v34 = vadd.f32 %v612_v29, %v1481_v50  ;;  %v746_v4 = vadd.f32 %v745_v9, %v683_v5  ;;  %v702_v9 = vmul.f32 %v1623_v62, %v1623_v62 }
 0x14f   :  { %v614_v8 = vadd.f32 %v613_v34, %v1502_v23  ;;  %v747_v36 = vadd.f32 %v746_v4, %v684_v0  ;;  %v703_v34 = vmul.f32 %v1641_v60, %v1641_v60 }
 0x151   :  { %v748_v37 = vadd.f32 %v747_v36, %v685_v53  ;;  %v615_v30 = vadd.f32 %v614_v8, %v1530_v42  ;;  %v505_v44 = vpop.f32.mrf.mxu3  ;;  %v690_v42 = vmul.f32 %v1352_v61, %v1352_v61  ;;  %v704_v8 = vmul.f32 %v502_v16, %v502_v16 }
 0x152   :  { %571 = vst [vmem:[%s1726_s4 + $0x1f8] sm:$0xff] %v505_v44  ;;  %v705_v53 = vmul.f32 %v505_v44, %v505_v44 }
 0x153   :  { %v749_v40 = vadd.f32 %v748_v37, %v686_v39  ;;  %v616_v50 = vadd.f32 %v615_v30, %v1554_v3 }
 0x155   :  { %v750_v41 = vadd.f32 %v749_v40, %v687_v13  ;;  %v617_v23 = vadd.f32 %v616_v50, %v1578_v32 }
 0x157   :  { %v751_v26 = vadd.f32 %v750_v41, %v688_v63  ;;  %v618_v48 = vadd.f32 %v617_v23, %v457_v14  ;;  %v692_v14 = vmul.f32 %v1394_v6, %v1394_v6 }
 0x159   :  { %v619_v20 = vadd.f32 %v618_v48, %v1352_v61  ;;  %v752_v3 = vadd.f32 %v751_v26, %v689_v25  ;;  %v694_v61 = vmul.f32 %v1436_v17, %v1436_v17 }
 0x15b   :  { %v620_v55 = vadd.f32 %v619_v20, %v1373_v2  ;;  %v753_v32 = vadd.f32 %v752_v3, %v690_v42  ;;  %v695_v2 = vmul.f32 %v1462_v31, %v1462_v31 }
 0x15d   :  { %v621_v10 = vadd.f32 %v620_v55, %v1394_v6  ;;  %v754_v56 = vadd.f32 %v753_v32, %v691_v49  ;;  %v696_v6 = vmul.f32 %v1483_v51, %v1483_v51 }
 0x15f   :  { %v622_v35 = vadd.f32 %v621_v10, %v1415_v11  ;;  %v755_v58 = vadd.f32 %v754_v56, %v692_v14  ;;  %v697_v11 = vmul.f32 %v1504_v27, %v1504_v27 }
 0x161   :  { %v623_v46 = vadd.f32 %v622_v35, %v1436_v17  ;;  %v756_v45 = vadd.f32 %v755_v58, %v693_v38  ;;  %v698_v17 = vmul.f32 %v1532_v43, %v1532_v43 }
 0x163   :  { %v624_v54 = vadd.f32 %v623_v46, %v1462_v31  ;;  %v757_v52 = vadd.f32 %v756_v45, %v694_v61  ;;  %v699_v31 = vmul.f32 %v1556_v7, %v1556_v7 }
 0x165   :  { %v758_v18 = vadd.f32 %v757_v52, %v695_v2  ;;  %v625_v15 = vadd.f32 %v624_v54, %v1483_v51  ;;  %v700_v51 = vmul.f32 %v1580_v33, %v1580_v33 }
 0x167   :  { %v626_v57 = vadd.f32 %v625_v15, %v1504_v27  ;;  %v759_v19 = vadd.f32 %v758_v18, %v696_v6 }
 0x169   :  { %v627_v12 = vadd.f32 %v626_v57, %v1532_v43  ;;  %v760_v21 = vadd.f32 %v759_v19, %v697_v11 }
 0x16b   :  { %v628_v22 = vadd.f32 %v627_v12, %v1556_v7  ;;  %v761_v24 = vadd.f32 %v760_v21, %v698_v17 }
 0x16d   :  { %v629_v1 = vadd.f32 %v628_v22, %v1580_v33  ;;  %v762_v59 = vadd.f32 %v761_v24, %v699_v31 }
 0x16f   :  { %v630_v27 = vadd.f32 %v629_v1, %v1602_v47  ;;  %v763_v5 = vadd.f32 %v762_v59, %v700_v51 }
 0x171   :  { %v764_v43 = vadd.f32 %v763_v5, %v701_v28  ;;  %v631_v29 = vadd.f32 %v630_v27, %v1623_v62 }
 0x173   :  { %v765_v7 = vadd.f32 %v764_v43, %v702_v9  ;;  %v632_v0 = vadd.f32 %v631_v29, %v1641_v60 }
 0x175   :  { %v766_v33 = vadd.f32 %v765_v7, %v703_v34  ;;  %v633_v4 = vadd.f32 %v632_v0, %v502_v16 }
 0x177   :  { %v767_v36 = vadd.f32 %v766_v33, %v704_v8  ;;  %v634_v37 = vadd.f32 %v633_v4, %v505_v44 }
 0x179   :  { %v635_v47 = vrot.slane %v634_v37, 4  ;;  %v768_v30 = vadd.f32 %v767_v36, %v705_v53 }
 0x17b   :  { %v636_v39 = vadd.f32 %v635_v47, %v634_v37  ;;  %v769_v40 = vrot.slane %v768_v30, 4 }
 0x17d   :  { %v637_v50 = vrot.slane %v636_v39, 2  ;;  %v770_v13 = vadd.f32 %v769_v40, %v768_v30 }
 0x17f   :  { %v638_v41 = vadd.f32 %v637_v50, %v636_v39  ;;  %v771_v62 = vrot.slane %v770_v13, 2 }
 0x181   :  { %v639_v23 = vrot.slane %v638_v41, 1  ;;  %v772_v63 = vadd.f32 %v771_v62, %v770_v13 }
 0x183   :  { %v640_v25 = vadd.f32 %v639_v23, %v638_v41  ;;  %v773_v26 = vrot.slane %v772_v63, 1 }
 0x185   :  { %641 = vst [vmem:[%s1727_s5] sm:$0x1] %v640_v25  ;;  %v774_v60 = vadd.f32 %v773_v26, %v772_v63 }
 0x187   :  { %775 = vst [vmem:[%s1727_s5 + $0x1] sm:$0x1] %v774_v60 }

// kernel: bottleneck_forward.9
= control target key start
LH: loop header
LB: loop body
LE: loop exit
PB: predicated region body
PF: predicated region fallthrough
CT: control target
= control target key end

     0   :  { %s1499_s0 = inlined_call_operand.vmem [shape: f32[512,128], index: 0, kind: input, shape index: {}]   ;;  %s1500_s1 = inlined_call_operand.vmem [shape: f32[1,128], index: 1, kind: input, shape index: {}]   ;;  %s1501_s2 = inlined_call_operand.vmem [shape: f32[1,128], index: 2, kind: input, shape index: {}]   ;;  %s1502_s3 = inlined_call_operand.vmem [shape: f32[512,128], index: 3, kind: input, shape index: {}]   ;;  %s1503_s4 = inlined_call_operand.vmem [shape: f32[1,128], index: 4, kind: input, shape index: {}]   ;;  %s1504_s5 = inlined_call_operand.vmem [shape: f32[1,128], index: 5, kind: input, shape index: {}]   ;;  %s1505_s6 = inlined_call_operand.vmem [shape: f32[512,128], index: 6, kind: output, shape index: {}]  }
   0x1   :  { %v23_v0 = vld [vmem:[%s1499_s0] sm:$0xff]  ;;  %v24_v7 = vld [vmem:[%s1499_s0 + $0x8] sm:$0xff]  ;;  %v25_v13 = vld [vmem:[%s1499_s0 + $0x10] sm:$0xff] }
   0x2   :  { %v668_v1 = vld [vmem:[%s1500_s1] ss:$0 sm:$0xff]  ;;  %v224_v8 = vld [vmem:[%s1502_s3 + $0x8] sm:$0xff]  ;;  %v225_v14 = vld [vmem:[%s1502_s3 + $0x10] sm:$0xff] }
   0x3   :  { %v673_v2 = vld [vmem:[%s1501_s2] ss:$0 sm:$0xff]  ;;  %v91_v4 = vmul.f32 %v668_v1, %v23_v0  ;;  %v92_v11 = vmul.f32 %v668_v1, %v24_v7  ;;  %v26_v15 = vld [vmem:[%s1499_s0 + $0x18] sm:$0xff]  ;;  %v93_v16 = vmul.f32 %v668_v1, %v25_v13  ;;  %v28_v26 = vld [vmem:[%s1499_s0 + $0x28] sm:$0xff] }
   0x4   :  { %v223_v3 = vld [vmem:[%s1502_s3] sm:$0xff]  ;;  %v94_v18 = vmul.f32 %v668_v1, %v26_v15  ;;  %v226_v19 = vld [vmem:[%s1502_s3 + $0x18] sm:$0xff]  ;;  %v228_v27 = vld [vmem:[%s1502_s3 + $0x28] sm:$0xff]  ;;  %v96_v39 = vmul.f32 %v668_v1, %v28_v26 }
   0x5   :  { %v682_v5 = vld [vmem:[%s1503_s4] ss:$0 sm:$0xff]  ;;  %v159_v9 = vadd.f32 %v673_v2, %v91_v4  ;;  %v160_v23 = vadd.f32 %v673_v2, %v92_v11  ;;  %v161_v28 = vadd.f32 %v673_v2, %v93_v16  ;;  %v29_v36 = vld [vmem:[%s1499_s0 + $0x30] sm:$0xff]  ;;  %v30_v42 = vld [vmem:[%s1499_s0 + $0x38] sm:$0xff] }
   0x6   :  { %v687_v6 = vld [vmem:[%s1504_s5] ss:$0 sm:$0xff]  ;;  %v291_v10 = vmul.f32 %v682_v5, %v223_v3  ;;  %v292_v12 = vmul.f32 %v682_v5, %v224_v8  ;;  %v293_v17 = vmul.f32 %v682_v5, %v225_v14  ;;  %v294_v25 = vmul.f32 %v682_v5, %v226_v19  ;;  %v229_v41 = vld [vmem:[%s1502_s3 + $0x30] sm:$0xff]  ;;  %v230_v47 = vld [vmem:[%s1502_s3 + $0x38] sm:$0xff] }
   0x7   :  { %v27_v20 = vld [vmem:[%s1499_s0 + $0x20] sm:$0xff]  ;;  %v162_v30 = vadd.f32 %v673_v2, %v94_v18  ;;  %v296_v40 = vmul.f32 %v682_v5, %v228_v27  ;;  %v164_v50 = vadd.f32 %v673_v2, %v96_v39  ;;  %v97_v52 = vmul.f32 %v668_v1, %v29_v36  ;;  %v32_v58 = vld [vmem:[%s1499_s0 + $0x48] sm:$0xff]  ;;  %v33_v0 = vld [vmem:[%s1499_s0 + $0x50] sm:$0xff] }
   0x8   :  { %v227_v21 = vld [vmem:[%s1502_s3 + $0x20] sm:$0xff]  ;;  %v359_v22 = vadd.f32 %v687_v6, %v291_v10  ;;  %v360_v24 = vadd.f32 %v687_v6, %v292_v12  ;;  %v361_v29 = vadd.f32 %v687_v6, %v293_v17  ;;  %v95_v31 = vmul.f32 %v668_v1, %v27_v20  ;;  %v232_v63 = vld [vmem:[%s1502_s3 + $0x48] sm:$0xff]  ;;  %v34_v10 = vld [vmem:[%s1499_s0 + $0x58] sm:$0xff] }
   0x9   :  { %v362_v34 = vadd.f32 %v687_v6, %v294_v25  ;;  %v295_v35 = vmul.f32 %v682_v5, %v227_v21  ;;  %v31_v48 = vld [vmem:[%s1499_s0 + $0x40] sm:$0xff]  ;;  %v364_v51 = vadd.f32 %v687_v6, %v296_v40  ;;  %v297_v56 = vmul.f32 %v682_v5, %v229_v41  ;;  %v234_v19 = vld [vmem:[%s1502_s3 + $0x58] sm:$0xff]  ;;  %v37_v36 = vld [vmem:[%s1499_s0 + $0x70] sm:$0xff] }
   0xa   :  { %v423_v32 = vadd.f32 %v359_v22, %v159_v9  ;;  %v424_v33 = vadd.f32 %v360_v24, %v160_v23  ;;  %v425_v37 = vadd.f32 %v361_v29, %v161_v28  ;;  %v163_v38 = vadd.f32 %v673_v2, %v95_v31  ;;  %v231_v53 = vld [vmem:[%s1502_s3 + $0x40] sm:$0xff]  ;;  %v233_v9 = vld [vmem:[%s1502_s3 + $0x50] sm:$0xff]  ;;  %v236_v31 = vld [vmem:[%s1502_s3 + $0x68] sm:$0xff] }
   0xb   :  { %v426_v45 = vadd.f32 %v362_v34, %v162_v30  ;;  %v363_v46 = vadd.f32 %v687_v6, %v295_v35  ;;  %v98_v57 = vmul.f32 %v668_v1, %v30_v42  ;;  %v428_v59 = vadd.f32 %v364_v51, %v164_v50  ;;  %v35_v24 = vld [vmem:[%s1499_s0 + $0x60] sm:$0xff]  ;;  %v36_v30 = vld [vmem:[%s1499_s0 + $0x68] sm:$0xff]  ;;  %v238_v51 = vld [vmem:[%s1502_s3 + $0x78] sm:$0xff] }
   0xc   :  { %v487_v43 = vmax.f32 %v423_v32, 0.0  ;;  %v488_v44 = vmax.f32 %v424_v33, 0.0  ;;  %v489_v49 = vmax.f32 %v425_v37, 0.0  ;;  %v165_v60 = vadd.f32 %v673_v2, %v97_v52  ;;  %v235_v25 = vld [vmem:[%s1502_s3 + $0x60] sm:$0xff] }
   0xd   :  { %v490_v54 = vmax.f32 %v426_v45, 0.0  ;;  %v427_v55 = vadd.f32 %v363_v46, %v163_v38  ;;  %v298_v61 = vmul.f32 %v682_v5, %v230_v47  ;;  %v99_v62 = vmul.f32 %v668_v1, %v31_v48  ;;  %v237_v45 = vld [vmem:[%s1502_s3 + $0x70] sm:$0xff]  ;;  %v38_v46 = vld [vmem:[%s1499_s0 + $0x78] sm:$0xff]  ;;  %v39_v52 = vld [vmem:[%s1499_s0 + $0x80] sm:$0xff] }
   0xe   :  { %551 = vst [vmem:[%s1505_s6] sm:$0xff] %v487_v43  ;;  %v365_v4 = vadd.f32 %v687_v6, %v297_v56  ;;  %v166_v7 = vadd.f32 %v673_v2, %v98_v57  ;;  %v299_v8 = vmul.f32 %v682_v5, %v231_v53  ;;  %v492_v11 = vmax.f32 %v428_v59, 0.0  ;;  %v239_v57 = vld [vmem:[%s1502_s3 + $0x80] sm:$0xff] }
   0xf   :  { %552 = vst [vmem:[%s1505_s6 + $0x8] sm:$0xff] %v488_v44  ;;  %v491_v3 = vmax.f32 %v427_v55, 0.0  ;;  %v366_v12 = vadd.f32 %v687_v6, %v298_v61  ;;  %v167_v13 = vadd.f32 %v673_v2, %v99_v62  ;;  %v100_v14 = vmul.f32 %v668_v1, %v32_v58  ;;  %v40_v62 = vld [vmem:[%s1499_s0 + $0x88] sm:$0xff] }
  0x10   :  { %553 = vst [vmem:[%s1505_s6 + $0x10] sm:$0xff] %v489_v49  ;;  %v429_v15 = vadd.f32 %v365_v4, %v165_v60  ;;  %v367_v16 = vadd.f32 %v687_v6, %v299_v8  ;;  %v300_v17 = vmul.f32 %v682_v5, %v232_v63  ;;  %v101_v18 = vmul.f32 %v668_v1, %v33_v0  ;;  %v41_v8 = vld [vmem:[%s1499_s0 + $0x90] sm:$0xff] }
  0x11   :  { %554 = vst [vmem:[%s1505_s6 + $0x18] sm:$0xff] %v490_v54  ;;  %v430_v20 = vadd.f32 %v366_v12, %v166_v7  ;;  %v168_v21 = vadd.f32 %v673_v2, %v100_v14  ;;  %v301_v22 = vmul.f32 %v682_v5, %v233_v9  ;;  %v102_v23 = vmul.f32 %v668_v1, %v34_v10  ;;  %v240_v7 = vld [vmem:[%s1502_s3 + $0x88] sm:$0xff]  ;;  %v42_v14 = vld [vmem:[%s1499_s0 + $0x98] sm:$0xff] }
  0x12   :  { %555 = vst [vmem:[%s1505_s6 + $0x20] sm:$0xff] %v491_v3  ;;  %v493_v26 = vmax.f32 %v429_v15, 0.0  ;;  %v431_v27 = vadd.f32 %v367_v16, %v167_v13  ;;  %v368_v28 = vadd.f32 %v687_v6, %v300_v17  ;;  %v169_v29 = vadd.f32 %v673_v2, %v101_v18  ;;  %v241_v13 = vld [vmem:[%s1502_s3 + $0x90] sm:$0xff] }
  0x13   :  { %556 = vst [vmem:[%s1505_s6 + $0x28] sm:$0xff] %v492_v11  ;;  %v494_v32 = vmax.f32 %v430_v20, 0.0  ;;  %v369_v33 = vadd.f32 %v687_v6, %v301_v22  ;;  %v170_v34 = vadd.f32 %v673_v2, %v102_v23  ;;  %v302_v35 = vmul.f32 %v682_v5, %v234_v19  ;;  %v242_v23 = vld [vmem:[%s1502_s3 + $0x98] sm:$0xff] }
  0x14   :  { %557 = vst [vmem:[%s1505_s6 + $0x30] sm:$0xff] %v493_v26  ;;  %v495_v37 = vmax.f32 %v431_v27, 0.0  ;;  %v432_v38 = vadd.f32 %v368_v28, %v168_v21  ;;  %v103_v39 = vmul.f32 %v668_v1, %v35_v24  ;;  %v303_v40 = vmul.f32 %v682_v5, %v235_v25  ;;  %v43_v28 = vld [vmem:[%s1499_s0 + $0xa0] sm:$0xff] }
  0x15   :  { %558 = vst [vmem:[%s1505_s6 + $0x38] sm:$0xff] %v494_v32  ;;  %v433_v41 = vadd.f32 %v369_v33, %v169_v29  ;;  %v370_v42 = vadd.f32 %v687_v6, %v302_v35  ;;  %v104_v43 = vmul.f32 %v668_v1, %v36_v30  ;;  %v304_v44 = vmul.f32 %v682_v5, %v236_v31  ;;  %v243_v29 = vld [vmem:[%s1502_s3 + $0xa0] sm:$0xff]  ;;  %v244_v35 = vld [vmem:[%s1502_s3 + $0xa8] sm:$0xff] }
  0x16   :  { %559 = vst [vmem:[%s1505_s6 + $0x40] sm:$0xff] %v495_v37  ;;  %v496_v47 = vmax.f32 %v432_v38, 0.0  ;;  %v171_v48 = vadd.f32 %v673_v2, %v103_v39  ;;  %v371_v49 = vadd.f32 %v687_v6, %v303_v40  ;;  %v105_v50 = vmul.f32 %v668_v1, %v37_v36  ;;  %v45_v40 = vld [vmem:[%s1499_s0 + $0xb0] sm:$0xff] }
  0x17   :  { %v497_v53 = vmax.f32 %v433_v41, 0.0  ;;  %v434_v54 = vadd.f32 %v370_v42, %v170_v34  ;;  %v172_v55 = vadd.f32 %v673_v2, %v104_v43  ;;  %v372_v56 = vadd.f32 %v687_v6, %v304_v44  ;;  %v44_v34 = vld [vmem:[%s1499_s0 + $0xa8] sm:$0xff] }
  0x18   :  { %560 = vst [vmem:[%s1505_s6 + $0x48] sm:$0xff] %v496_v47  ;;  %v435_v58 = vadd.f32 %v371_v49, %v171_v48  ;;  %v173_v59 = vadd.f32 %v673_v2, %v105_v50  ;;  %v305_v60 = vmul.f32 %v682_v5, %v237_v45  ;;  %v106_v61 = vmul.f32 %v668_v1, %v38_v46  ;;  %v245_v49 = vld [vmem:[%s1502_s3 + $0xb0] sm:$0xff]  ;;  %v46_v50 = vld [vmem:[%s1499_s0 + $0xb8] sm:$0xff] }
  0x19   :  { %561 = vst [vmem:[%s1505_s6 + $0x50] sm:$0xff] %v497_v53  ;;  %v498_v63 = vmax.f32 %v434_v54, 0.0  ;;  %v436_v0 = vadd.f32 %v372_v56, %v172_v55  ;;  %v306_v3 = vmul.f32 %v682_v5, %v238_v51  ;;  %v107_v4 = vmul.f32 %v668_v1, %v39_v52  ;;  %v246_v55 = vld [vmem:[%s1502_s3 + $0xb8] sm:$0xff]  ;;  %v47_v56 = vld [vmem:[%s1499_s0 + $0xc0] sm:$0xff] }
  0x1a   :  { %v499_v9 = vmax.f32 %v435_v58, 0.0  ;;  %v373_v10 = vadd.f32 %v687_v6, %v305_v60  ;;  %v174_v11 = vadd.f32 %v673_v2, %v106_v61  ;;  %v307_v12 = vmul.f32 %v682_v5, %v239_v57  ;;  %v247_v61 = vld [vmem:[%s1502_s3 + $0xc0] sm:$0xff] }
  0x1b   :  { %562 = vst [vmem:[%s1505_s6 + $0x58] sm:$0xff] %v498_v63  ;;  %v500_v15 = vmax.f32 %v436_v0, 0.0  ;;  %v374_v16 = vadd.f32 %v687_v6, %v306_v3  ;;  %v175_v17 = vadd.f32 %v673_v2, %v107_v4  ;;  %v108_v18 = vmul.f32 %v668_v1, %v40_v62  ;;  %v48_v4 = vld [vmem:[%s1499_s0 + $0xc8] sm:$0xff] }
  0x1c   :  { %563 = vst [vmem:[%s1505_s6 + $0x60] sm:$0xff] %v499_v9  ;;  %v437_v19 = vadd.f32 %v373_v10, %v173_v59  ;;  %v375_v20 = vadd.f32 %v687_v6, %v307_v12  ;;  %v308_v21 = vmul.f32 %v682_v5, %v240_v7  ;;  %v109_v22 = vmul.f32 %v668_v1, %v41_v8  ;;  %v49_v12 = vld [vmem:[%s1499_s0 + $0xd0] sm:$0xff] }
  0x1d   :  { %564 = vst [vmem:[%s1505_s6 + $0x68] sm:$0xff] %v500_v15  ;;  %v438_v24 = vadd.f32 %v374_v16, %v174_v11  ;;  %v176_v25 = vadd.f32 %v673_v2, %v108_v18  ;;  %v309_v26 = vmul.f32 %v682_v5, %v241_v13  ;;  %v110_v27 = vmul.f32 %v668_v1, %v42_v14  ;;  %v248_v11 = vld [vmem:[%s1502_s3 + $0xc8] sm:$0xff]  ;;  %v50_v18 = vld [vmem:[%s1499_s0 + $0xd8] sm:$0xff] }
  0x1e   :  { %v501_v30 = vmax.f32 %v437_v19, 0.0  ;;  %v439_v31 = vadd.f32 %v375_v20, %v175_v17  ;;  %v376_v32 = vadd.f32 %v687_v6, %v308_v21  ;;  %v177_v33 = vadd.f32 %v673_v2, %v109_v22  ;;  %v249_v17 = vld [vmem:[%s1502_s3 + $0xd0] sm:$0xff] }
  0x1f   :  { %v502_v36 = vmax.f32 %v438_v24, 0.0  ;;  %v377_v37 = vadd.f32 %v687_v6, %v309_v26  ;;  %v178_v38 = vadd.f32 %v673_v2, %v110_v27  ;;  %v310_v39 = vmul.f32 %v682_v5, %v242_v23  ;;  %v250_v27 = vld [vmem:[%s1502_s3 + $0xd8] sm:$0xff] }
  0x20   :  { %565 = vst [vmem:[%s1505_s6 + $0x70] sm:$0xff] %v501_v30  ;;  %v503_v41 = vmax.f32 %v439_v31, 0.0  ;;  %v440_v42 = vadd.f32 %v376_v32, %v176_v25  ;;  %v111_v43 = vmul.f32 %v668_v1, %v43_v28  ;;  %v311_v44 = vmul.f32 %v682_v5, %v243_v29  ;;  %v51_v32 = vld [vmem:[%s1499_s0 + $0xe0] sm:$0xff] }
  0x21   :  { %566 = vst [vmem:[%s1505_s6 + $0x78] sm:$0xff] %v502_v36  ;;  %v441_v45 = vadd.f32 %v377_v37, %v177_v33  ;;  %v378_v46 = vadd.f32 %v687_v6, %v310_v39  ;;  %v112_v47 = vmul.f32 %v668_v1, %v44_v34  ;;  %v312_v48 = vmul.f32 %v682_v5, %v244_v35  ;;  %v251_v33 = vld [vmem:[%s1502_s3 + $0xe0] sm:$0xff]  ;;  %v252_v39 = vld [vmem:[%s1502_s3 + $0xe8] sm:$0xff] }
  0x22   :  { %567 = vst [vmem:[%s1505_s6 + $0x80] sm:$0xff] %v503_v41  ;;  %v504_v51 = vmax.f32 %v440_v42, 0.0  ;;  %v179_v52 = vadd.f32 %v673_v2, %v111_v43  ;;  %v379_v53 = vadd.f32 %v687_v6, %v311_v44  ;;  %v113_v54 = vmul.f32 %v668_v1, %v45_v40  ;;  %v53_v44 = vld [vmem:[%s1499_s0 + $0xf0] sm:$0xff] }
  0x23   :  { %v505_v57 = vmax.f32 %v441_v45, 0.0  ;;  %v442_v58 = vadd.f32 %v378_v46, %v178_v38  ;;  %v180_v59 = vadd.f32 %v673_v2, %v112_v47  ;;  %v380_v60 = vadd.f32 %v687_v6, %v312_v48  ;;  %v52_v38 = vld [vmem:[%s1499_s0 + $0xe8] sm:$0xff] }
  0x24   :  { %568 = vst [vmem:[%s1505_s6 + $0x88] sm:$0xff] %v504_v51  ;;  %v443_v62 = vadd.f32 %v379_v53, %v179_v52  ;;  %v181_v63 = vadd.f32 %v673_v2, %v113_v54  ;;  %v313_v0 = vmul.f32 %v682_v5, %v245_v49  ;;  %v114_v3 = vmul.f32 %v668_v1, %v46_v50  ;;  %v253_v53 = vld [vmem:[%s1502_s3 + $0xf0] sm:$0xff]  ;;  %v54_v54 = vld [vmem:[%s1499_s0 + $0xf8] sm:$0xff] }
  0x25   :  { %569 = vst [vmem:[%s1505_s6 + $0x90] sm:$0xff] %v505_v57  ;;  %v506_v7 = vmax.f32 %v442_v58, 0.0  ;;  %v444_v8 = vadd.f32 %v380_v60, %v180_v59  ;;  %v314_v9 = vmul.f32 %v682_v5, %v246_v55  ;;  %v115_v10 = vmul.f32 %v668_v1, %v47_v56  ;;  %v254_v59 = vld [vmem:[%s1502_s3 + $0xf8] sm:$0xff]  ;;  %v55_v60 = vld [vmem:[%s1499_s0 + $0x100] sm:$0xff] }
  0x26   :  { %v507_v13 = vmax.f32 %v443_v62, 0.0  ;;  %v381_v14 = vadd.f32 %v687_v6, %v313_v0  ;;  %v182_v15 = vadd.f32 %v673_v2, %v114_v3  ;;  %v315_v16 = vmul.f32 %v682_v5, %v247_v61  ;;  %v255_v3 = vld [vmem:[%s1502_s3 + $0x100] sm:$0xff] }
  0x27   :  { %570 = vst [vmem:[%s1505_s6 + $0x98] sm:$0xff] %v506_v7  ;;  %v508_v19 = vmax.f32 %v444_v8, 0.0  ;;  %v382_v20 = vadd.f32 %v687_v6, %v314_v9  ;;  %v183_v21 = vadd.f32 %v673_v2, %v115_v10  ;;  %v116_v22 = vmul.f32 %v668_v1, %v48_v4  ;;  %v56_v10 = vld [vmem:[%s1499_s0 + $0x108] sm:$0xff] }
  0x28   :  { %571 = vst [vmem:[%s1505_s6 + $0xa0] sm:$0xff] %v507_v13  ;;  %v445_v23 = vadd.f32 %v381_v14, %v181_v63  ;;  %v383_v24 = vadd.f32 %v687_v6, %v315_v16  ;;  %v316_v25 = vmul.f32 %v682_v5, %v248_v11  ;;  %v117_v26 = vmul.f32 %v668_v1, %v49_v12  ;;  %v57_v16 = vld [vmem:[%s1499_s0 + $0x110] sm:$0xff] }
  0x29   :  { %572 = vst [vmem:[%s1505_s6 + $0xa8] sm:$0xff] %v508_v19  ;;  %v446_v28 = vadd.f32 %v382_v20, %v182_v15  ;;  %v184_v29 = vadd.f32 %v673_v2, %v116_v22  ;;  %v317_v30 = vmul.f32 %v682_v5, %v249_v17  ;;  %v118_v31 = vmul.f32 %v668_v1, %v50_v18  ;;  %v256_v15 = vld [vmem:[%s1502_s3 + $0x108] sm:$0xff]  ;;  %v58_v22 = vld [vmem:[%s1499_s0 + $0x118] sm:$0xff] }
  0x2a   :  { %v509_v34 = vmax.f32 %v445_v23, 0.0  ;;  %v447_v35 = vadd.f32 %v383_v24, %v183_v21  ;;  %v384_v36 = vadd.f32 %v687_v6, %v316_v25  ;;  %v185_v37 = vadd.f32 %v673_v2, %v117_v26  ;;  %v257_v21 = vld [vmem:[%s1502_s3 + $0x110] sm:$0xff] }
  0x2b   :  { %v510_v40 = vmax.f32 %v446_v28, 0.0  ;;  %v385_v41 = vadd.f32 %v687_v6, %v317_v30  ;;  %v186_v42 = vadd.f32 %v673_v2, %v118_v31  ;;  %v318_v43 = vmul.f32 %v682_v5, %v250_v27  ;;  %v258_v31 = vld [vmem:[%s1502_s3 + $0x118] sm:$0xff] }
  0x2c   :  { %573 = vst [vmem:[%s1505_s6 + $0xb0] sm:$0xff] %v509_v34  ;;  %v511_v45 = vmax.f32 %v447_v35, 0.0  ;;  %v448_v46 = vadd.f32 %v384_v36, %v184_v29  ;;  %v119_v47 = vmul.f32 %v668_v1, %v51_v32  ;;  %v319_v48 = vmul.f32 %v682_v5, %v251_v33  ;;  %v59_v36 = vld [vmem:[%s1499_s0 + $0x120] sm:$0xff] }
  0x2d   :  { %574 = vst [vmem:[%s1505_s6 + $0xb8] sm:$0xff] %v510_v40  ;;  %v449_v49 = vadd.f32 %v385_v41, %v185_v37  ;;  %v386_v50 = vadd.f32 %v687_v6, %v318_v43  ;;  %v120_v51 = vmul.f32 %v668_v1, %v52_v38  ;;  %v320_v52 = vmul.f32 %v682_v5, %v252_v39  ;;  %v259_v37 = vld [vmem:[%s1502_s3 + $0x120] sm:$0xff]  ;;  %v260_v43 = vld [vmem:[%s1502_s3 + $0x128] sm:$0xff] }
  0x2e   :  { %575 = vst [vmem:[%s1505_s6 + $0xc0] sm:$0xff] %v511_v45  ;;  %v512_v55 = vmax.f32 %v448_v46, 0.0  ;;  %v187_v56 = vadd.f32 %v673_v2, %v119_v47  ;;  %v387_v57 = vadd.f32 %v687_v6, %v319_v48  ;;  %v121_v58 = vmul.f32 %v668_v1, %v53_v44  ;;  %v61_v48 = vld [vmem:[%s1499_s0 + $0x130] sm:$0xff] }
  0x2f   :  { %v513_v61 = vmax.f32 %v449_v49, 0.0  ;;  %v450_v62 = vadd.f32 %v386_v50, %v186_v42  ;;  %v188_v63 = vadd.f32 %v673_v2, %v120_v51  ;;  %v388_v0 = vadd.f32 %v687_v6, %v320_v52  ;;  %v60_v42 = vld [vmem:[%s1499_s0 + $0x128] sm:$0xff] }
  0x30   :  { %576 = vst [vmem:[%s1505_s6 + $0xc8] sm:$0xff] %v512_v55  ;;  %v451_v4 = vadd.f32 %v387_v57, %v187_v56  ;;  %v189_v7 = vadd.f32 %v673_v2, %v121_v58  ;;  %v321_v8 = vmul.f32 %v682_v5, %v253_v53  ;;  %v122_v9 = vmul.f32 %v668_v1, %v54_v54  ;;  %v261_v57 = vld [vmem:[%s1502_s3 + $0x130] sm:$0xff]  ;;  %v62_v58 = vld [vmem:[%s1499_s0 + $0x138] sm:$0xff] }
  0x31   :  { %577 = vst [vmem:[%s1505_s6 + $0xd0] sm:$0xff] %v513_v61  ;;  %v514_v11 = vmax.f32 %v450_v62, 0.0  ;;  %v452_v12 = vadd.f32 %v388_v0, %v188_v63  ;;  %v322_v13 = vmul.f32 %v682_v5, %v254_v59  ;;  %v123_v14 = vmul.f32 %v668_v1, %v55_v60  ;;  %v262_v63 = vld [vmem:[%s1502_s3 + $0x138] sm:$0xff]  ;;  %v63_v0 = vld [vmem:[%s1499_s0 + $0x140] sm:$0xff] }
  0x32   :  { %v515_v17 = vmax.f32 %v451_v4, 0.0  ;;  %v389_v18 = vadd.f32 %v687_v6, %v321_v8  ;;  %v190_v19 = vadd.f32 %v673_v2, %v122_v9  ;;  %v323_v20 = vmul.f32 %v682_v5, %v255_v3  ;;  %v263_v9 = vld [vmem:[%s1502_s3 + $0x140] sm:$0xff] }
  0x33   :  { %578 = vst [vmem:[%s1505_s6 + $0xd8] sm:$0xff] %v514_v11  ;;  %v516_v23 = vmax.f32 %v452_v12, 0.0  ;;  %v390_v24 = vadd.f32 %v687_v6, %v322_v13  ;;  %v191_v25 = vadd.f32 %v673_v2, %v123_v14  ;;  %v124_v26 = vmul.f32 %v668_v1, %v56_v10  ;;  %v64_v14 = vld [vmem:[%s1499_s0 + $0x148] sm:$0xff] }
  0x34   :  { %579 = vst [vmem:[%s1505_s6 + $0xe0] sm:$0xff] %v515_v17  ;;  %v453_v27 = vadd.f32 %v389_v18, %v189_v7  ;;  %v391_v28 = vadd.f32 %v687_v6, %v323_v20  ;;  %v324_v29 = vmul.f32 %v682_v5, %v256_v15  ;;  %v125_v30 = vmul.f32 %v668_v1, %v57_v16  ;;  %v65_v20 = vld [vmem:[%s1499_s0 + $0x150] sm:$0xff] }
  0x35   :  { %580 = vst [vmem:[%s1505_s6 + $0xe8] sm:$0xff] %v516_v23  ;;  %v454_v32 = vadd.f32 %v390_v24, %v190_v19  ;;  %v192_v33 = vadd.f32 %v673_v2, %v124_v26  ;;  %v325_v34 = vmul.f32 %v682_v5, %v257_v21  ;;  %v126_v35 = vmul.f32 %v668_v1, %v58_v22  ;;  %v264_v19 = vld [vmem:[%s1502_s3 + $0x148] sm:$0xff]  ;;  %v66_v26 = vld [vmem:[%s1499_s0 + $0x158] sm:$0xff] }
  0x36   :  { %v517_v38 = vmax.f32 %v453_v27, 0.0  ;;  %v455_v39 = vadd.f32 %v391_v28, %v191_v25  ;;  %v392_v40 = vadd.f32 %v687_v6, %v324_v29  ;;  %v193_v41 = vadd.f32 %v673_v2, %v125_v30  ;;  %v265_v25 = vld [vmem:[%s1502_s3 + $0x150] sm:$0xff] }
  0x37   :  { %v518_v44 = vmax.f32 %v454_v32, 0.0  ;;  %v393_v45 = vadd.f32 %v687_v6, %v325_v34  ;;  %v194_v46 = vadd.f32 %v673_v2, %v126_v35  ;;  %v326_v47 = vmul.f32 %v682_v5, %v258_v31  ;;  %v266_v35 = vld [vmem:[%s1502_s3 + $0x158] sm:$0xff] }
  0x38   :  { %581 = vst [vmem:[%s1505_s6 + $0xf0] sm:$0xff] %v517_v38  ;;  %v519_v49 = vmax.f32 %v455_v39, 0.0  ;;  %v456_v50 = vadd.f32 %v392_v40, %v192_v33  ;;  %v127_v51 = vmul.f32 %v668_v1, %v59_v36  ;;  %v327_v52 = vmul.f32 %v682_v5, %v259_v37  ;;  %v67_v40 = vld [vmem:[%s1499_s0 + $0x160] sm:$0xff] }
  0x39   :  { %582 = vst [vmem:[%s1505_s6 + $0xf8] sm:$0xff] %v518_v44  ;;  %v457_v53 = vadd.f32 %v393_v45, %v193_v41  ;;  %v394_v54 = vadd.f32 %v687_v6, %v326_v47  ;;  %v128_v55 = vmul.f32 %v668_v1, %v60_v42  ;;  %v328_v56 = vmul.f32 %v682_v5, %v260_v43  ;;  %v267_v41 = vld [vmem:[%s1502_s3 + $0x160] sm:$0xff]  ;;  %v268_v47 = vld [vmem:[%s1502_s3 + $0x168] sm:$0xff] }
  0x3a   :  { %583 = vst [vmem:[%s1505_s6 + $0x100] sm:$0xff] %v519_v49  ;;  %v520_v59 = vmax.f32 %v456_v50, 0.0  ;;  %v195_v60 = vadd.f32 %v673_v2, %v127_v51  ;;  %v395_v61 = vadd.f32 %v687_v6, %v327_v52  ;;  %v129_v62 = vmul.f32 %v668_v1, %v61_v48  ;;  %v69_v52 = vld [vmem:[%s1499_s0 + $0x170] sm:$0xff] }
  0x3b   :  { %v521_v3 = vmax.f32 %v457_v53, 0.0  ;;  %v458_v4 = vadd.f32 %v394_v54, %v194_v46  ;;  %v196_v7 = vadd.f32 %v673_v2, %v128_v55  ;;  %v396_v8 = vadd.f32 %v687_v6, %v328_v56  ;;  %v68_v46 = vld [vmem:[%s1499_s0 + $0x168] sm:$0xff] }
  0x3c   :  { %584 = vst [vmem:[%s1505_s6 + $0x108] sm:$0xff] %v520_v59  ;;  %v459_v10 = vadd.f32 %v395_v61, %v195_v60  ;;  %v197_v11 = vadd.f32 %v673_v2, %v129_v62  ;;  %v329_v12 = vmul.f32 %v682_v5, %v261_v57  ;;  %v130_v13 = vmul.f32 %v668_v1, %v62_v58  ;;  %v269_v61 = vld [vmem:[%s1502_s3 + $0x170] sm:$0xff]  ;;  %v70_v62 = vld [vmem:[%s1499_s0 + $0x178] sm:$0xff] }
  0x3d   :  { %585 = vst [vmem:[%s1505_s6 + $0x110] sm:$0xff] %v521_v3  ;;  %v522_v15 = vmax.f32 %v458_v4, 0.0  ;;  %v460_v16 = vadd.f32 %v396_v8, %v196_v7  ;;  %v330_v17 = vmul.f32 %v682_v5, %v262_v63  ;;  %v131_v18 = vmul.f32 %v668_v1, %v63_v0  ;;  %v270_v7 = vld [vmem:[%s1502_s3 + $0x178] sm:$0xff]  ;;  %v71_v8 = vld [vmem:[%s1499_s0 + $0x180] sm:$0xff] }
  0x3e   :  { %v523_v21 = vmax.f32 %v459_v10, 0.0  ;;  %v397_v22 = vadd.f32 %v687_v6, %v329_v12  ;;  %v198_v23 = vadd.f32 %v673_v2, %v130_v13  ;;  %v331_v24 = vmul.f32 %v682_v5, %v263_v9  ;;  %v271_v13 = vld [vmem:[%s1502_s3 + $0x180] sm:$0xff] }
  0x3f   :  { %586 = vst [vmem:[%s1505_s6 + $0x118] sm:$0xff] %v522_v15  ;;  %v524_v27 = vmax.f32 %v460_v16, 0.0  ;;  %v398_v28 = vadd.f32 %v687_v6, %v330_v17  ;;  %v199_v29 = vadd.f32 %v673_v2, %v131_v18  ;;  %v132_v30 = vmul.f32 %v668_v1, %v64_v14  ;;  %v72_v18 = vld [vmem:[%s1499_s0 + $0x188] sm:$0xff] }
  0x40   :  { %587 = vst [vmem:[%s1505_s6 + $0x120] sm:$0xff] %v523_v21  ;;  %v461_v31 = vadd.f32 %v397_v22, %v197_v11  ;;  %v399_v32 = vadd.f32 %v687_v6, %v331_v24  ;;  %v332_v33 = vmul.f32 %v682_v5, %v264_v19  ;;  %v133_v34 = vmul.f32 %v668_v1, %v65_v20  ;;  %v73_v24 = vld [vmem:[%s1499_s0 + $0x190] sm:$0xff] }
  0x41   :  { %588 = vst [vmem:[%s1505_s6 + $0x128] sm:$0xff] %v524_v27  ;;  %v462_v36 = vadd.f32 %v398_v28, %v198_v23  ;;  %v200_v37 = vadd.f32 %v673_v2, %v132_v30  ;;  %v333_v38 = vmul.f32 %v682_v5, %v265_v25  ;;  %v134_v39 = vmul.f32 %v668_v1, %v66_v26  ;;  %v272_v23 = vld [vmem:[%s1502_s3 + $0x188] sm:$0xff]  ;;  %v74_v30 = vld [vmem:[%s1499_s0 + $0x198] sm:$0xff] }
  0x42   :  { %v525_v42 = vmax.f32 %v461_v31, 0.0  ;;  %v463_v43 = vadd.f32 %v399_v32, %v199_v29  ;;  %v400_v44 = vadd.f32 %v687_v6, %v332_v33  ;;  %v201_v45 = vadd.f32 %v673_v2, %v133_v34  ;;  %v273_v29 = vld [vmem:[%s1502_s3 + $0x190] sm:$0xff] }
  0x43   :  { %v526_v48 = vmax.f32 %v462_v36, 0.0  ;;  %v401_v49 = vadd.f32 %v687_v6, %v333_v38  ;;  %v202_v50 = vadd.f32 %v673_v2, %v134_v39  ;;  %v334_v51 = vmul.f32 %v682_v5, %v266_v35  ;;  %v274_v39 = vld [vmem:[%s1502_s3 + $0x198] sm:$0xff] }
  0x44   :  { %589 = vst [vmem:[%s1505_s6 + $0x130] sm:$0xff] %v525_v42  ;;  %v527_v53 = vmax.f32 %v463_v43, 0.0  ;;  %v464_v54 = vadd.f32 %v400_v44, %v200_v37  ;;  %v135_v55 = vmul.f32 %v668_v1, %v67_v40  ;;  %v335_v56 = vmul.f32 %v682_v5, %v267_v41  ;;  %v75_v44 = vld [vmem:[%s1499_s0 + $0x1a0] sm:$0xff] }
  0x45   :  { %590 = vst [vmem:[%s1505_s6 + $0x138] sm:$0xff] %v526_v48  ;;  %v465_v57 = vadd.f32 %v401_v49, %v201_v45  ;;  %v402_v58 = vadd.f32 %v687_v6, %v334_v51  ;;  %v136_v59 = vmul.f32 %v668_v1, %v68_v46  ;;  %v336_v60 = vmul.f32 %v682_v5, %v268_v47  ;;  %v275_v45 = vld [vmem:[%s1502_s3 + $0x1a0] sm:$0xff]  ;;  %v276_v51 = vld [vmem:[%s1502_s3 + $0x1a8] sm:$0xff] }
  0x46   :  { %591 = vst [vmem:[%s1505_s6 + $0x140] sm:$0xff] %v527_v53  ;;  %v528_v63 = vmax.f32 %v464_v54, 0.0  ;;  %v203_v0 = vadd.f32 %v673_v2, %v135_v55  ;;  %v403_v3 = vadd.f32 %v687_v6, %v335_v56  ;;  %v137_v4 = vmul.f32 %v668_v1, %v69_v52  ;;  %v77_v56 = vld [vmem:[%s1499_s0 + $0x1b0] sm:$0xff] }
  0x47   :  { %v529_v9 = vmax.f32 %v465_v57, 0.0  ;;  %v466_v10 = vadd.f32 %v402_v58, %v202_v50  ;;  %v204_v11 = vadd.f32 %v673_v2, %v136_v59  ;;  %v404_v12 = vadd.f32 %v687_v6, %v336_v60  ;;  %v76_v50 = vld [vmem:[%s1499_s0 + $0x1a8] sm:$0xff] }
  0x48   :  { %592 = vst [vmem:[%s1505_s6 + $0x148] sm:$0xff] %v528_v63  ;;  %v467_v14 = vadd.f32 %v403_v3, %v203_v0  ;;  %v205_v15 = vadd.f32 %v673_v2, %v137_v4  ;;  %v337_v16 = vmul.f32 %v682_v5, %v269_v61  ;;  %v138_v17 = vmul.f32 %v668_v1, %v70_v62  ;;  %v277_v3 = vld [vmem:[%s1502_s3 + $0x1b0] sm:$0xff]  ;;  %v78_v4 = vld [vmem:[%s1499_s0 + $0x1b8] sm:$0xff] }
  0x49   :  { %593 = vst [vmem:[%s1505_s6 + $0x150] sm:$0xff] %v529_v9  ;;  %v530_v19 = vmax.f32 %v466_v10, 0.0  ;;  %v468_v20 = vadd.f32 %v404_v12, %v204_v11  ;;  %v338_v21 = vmul.f32 %v682_v5, %v270_v7  ;;  %v139_v22 = vmul.f32 %v668_v1, %v71_v8  ;;  %v278_v11 = vld [vmem:[%s1502_s3 + $0x1b8] sm:$0xff]  ;;  %v79_v12 = vld [vmem:[%s1499_s0 + $0x1c0] sm:$0xff] }
  0x4a   :  { %v531_v25 = vmax.f32 %v467_v14, 0.0  ;;  %v405_v26 = vadd.f32 %v687_v6, %v337_v16  ;;  %v206_v27 = vadd.f32 %v673_v2, %v138_v17  ;;  %v339_v28 = vmul.f32 %v682_v5, %v271_v13  ;;  %v279_v17 = vld [vmem:[%s1502_s3 + $0x1c0] sm:$0xff] }
  0x4b   :  { %594 = vst [vmem:[%s1505_s6 + $0x158] sm:$0xff] %v530_v19  ;;  %v532_v31 = vmax.f32 %v468_v20, 0.0  ;;  %v406_v32 = vadd.f32 %v687_v6, %v338_v21  ;;  %v207_v33 = vadd.f32 %v673_v2, %v139_v22  ;;  %v140_v34 = vmul.f32 %v668_v1, %v72_v18  ;;  %v80_v22 = vld [vmem:[%s1499_s0 + $0x1c8] sm:$0xff] }
  0x4c   :  { %595 = vst [vmem:[%s1505_s6 + $0x160] sm:$0xff] %v531_v25  ;;  %v469_v35 = vadd.f32 %v405_v26, %v205_v15  ;;  %v407_v36 = vadd.f32 %v687_v6, %v339_v28  ;;  %v340_v37 = vmul.f32 %v682_v5, %v272_v23  ;;  %v141_v38 = vmul.f32 %v668_v1, %v73_v24  ;;  %v81_v28 = vld [vmem:[%s1499_s0 + $0x1d0] sm:$0xff] }
  0x4d   :  { %596 = vst [vmem:[%s1505_s6 + $0x168] sm:$0xff] %v532_v31  ;;  %v470_v40 = vadd.f32 %v406_v32, %v206_v27  ;;  %v208_v41 = vadd.f32 %v673_v2, %v140_v34  ;;  %v341_v42 = vmul.f32 %v682_v5, %v273_v29  ;;  %v142_v43 = vmul.f32 %v668_v1, %v74_v30  ;;  %v280_v27 = vld [vmem:[%s1502_s3 + $0x1c8] sm:$0xff] }
  0x4e   :  { %v533_v46 = vmax.f32 %v469_v35, 0.0  ;;  %v471_v47 = vadd.f32 %v407_v36, %v207_v33  ;;  %v408_v48 = vadd.f32 %v687_v6, %v340_v37  ;;  %v209_v49 = vadd.f32 %v673_v2, %v141_v38  ;;  %v281_v33 = vld [vmem:[%s1502_s3 + $0x1d0] sm:$0xff]  ;;  %v623_v37 = vld [vmem:[%s1500_s1] ss:$0 sm:$0xff] }
  0x4f   :  { %v534_v52 = vmax.f32 %v470_v40, 0.0  ;;  %v409_v53 = vadd.f32 %v687_v6, %v341_v42  ;;  %v210_v54 = vadd.f32 %v673_v2, %v142_v43  ;;  %v342_v55 = vmul.f32 %v682_v5, %v274_v39  ;;  %v282_v43 = vld [vmem:[%s1502_s3 + $0x1d8] sm:$0xff] }
  0x50   :  { %597 = vst [vmem:[%s1505_s6 + $0x170] sm:$0xff] %v533_v46  ;;  %v535_v57 = vmax.f32 %v471_v47, 0.0  ;;  %v472_v58 = vadd.f32 %v408_v48, %v208_v41  ;;  %v143_v59 = vmul.f32 %v668_v1, %v75_v44  ;;  %v343_v60 = vmul.f32 %v682_v5, %v275_v45  ;;  %v624_v44 = vld [vmem:[%s1501_s2] ss:$0 sm:$0xff] }
  0x51   :  { %598 = vst [vmem:[%s1505_s6 + $0x178] sm:$0xff] %v534_v52  ;;  %v473_v61 = vadd.f32 %v409_v53, %v209_v49  ;;  %v410_v62 = vadd.f32 %v687_v6, %v342_v55  ;;  %v144_v63 = vmul.f32 %v668_v1, %v76_v50  ;;  %v344_v0 = vmul.f32 %v682_v5, %v276_v51  ;;  %v83_v47 = vld [vmem:[%s1499_s0 + $0x1e0] sm:$0xff]  ;;  %v284_v55 = vld [vmem:[%s1502_s3 + $0x1e8] sm:$0xff] }
  0x52   :  { %599 = vst [vmem:[%s1505_s6 + $0x180] sm:$0xff] %v535_v57  ;;  %v536_v7 = vmax.f32 %v472_v58, 0.0  ;;  %v211_v8 = vadd.f32 %v673_v2, %v143_v59  ;;  %v411_v9 = vadd.f32 %v687_v6, %v343_v60  ;;  %v145_v10 = vmul.f32 %v668_v1, %v77_v56  ;;  %v283_v48 = vld [vmem:[%s1502_s3 + $0x1e0] sm:$0xff]  ;;  %v85_v60 = vld [vmem:[%s1499_s0 + $0x1f0] sm:$0xff] }
  0x53   :  { %v537_v13 = vmax.f32 %v473_v61, 0.0  ;;  %v474_v14 = vadd.f32 %v410_v62, %v210_v54  ;;  %v212_v15 = vadd.f32 %v673_v2, %v144_v63  ;;  %v412_v16 = vadd.f32 %v687_v6, %v344_v0  ;;  %v626_v51 = vld [vmem:[%s1504_s5] ss:$0 sm:$0xff]  ;;  %v84_v54 = vld [vmem:[%s1499_s0 + $0x1e8] sm:$0xff] }
  0x54   :  { %600 = vst [vmem:[%s1505_s6 + $0x188] sm:$0xff] %v536_v7  ;;  %v475_v18 = vadd.f32 %v411_v9, %v211_v8  ;;  %v213_v19 = vadd.f32 %v673_v2, %v145_v10  ;;  %v345_v20 = vmul.f32 %v682_v5, %v277_v3  ;;  %v146_v21 = vmul.f32 %v668_v1, %v78_v4  ;;  %v285_v9 = vld [vmem:[%s1502_s3 + $0x1f0] sm:$0xff]  ;;  %v86_v10 = vld [vmem:[%s1499_s0 + $0x1f8] sm:$0xff] }
  0x55   :  { %601 = vst [vmem:[%s1505_s6 + $0x190] sm:$0xff] %v537_v13  ;;  %v538_v23 = vmax.f32 %v474_v14, 0.0  ;;  %v476_v24 = vadd.f32 %v412_v16, %v212_v15  ;;  %v346_v25 = vmul.f32 %v682_v5, %v278_v11  ;;  %v147_v26 = vmul.f32 %v668_v1, %v79_v12  ;;  %v82_v1 = vld [vmem:[%s1499_s0 + $0x1d8] sm:$0xff] }
  0x56   :  { %v539_v29 = vmax.f32 %v475_v18, 0.0  ;;  %v413_v30 = vadd.f32 %v687_v6, %v345_v20  ;;  %v214_v31 = vadd.f32 %v673_v2, %v146_v21  ;;  %v347_v32 = vmul.f32 %v682_v5, %v279_v17  ;;  %v286_v15 = vld [vmem:[%s1502_s3 + $0x1f8] sm:$0xff] }
  0x57   :  { %602 = vst [vmem:[%s1505_s6 + $0x198] sm:$0xff] %v538_v23  ;;  %v540_v34 = vmax.f32 %v476_v24, 0.0  ;;  %v414_v35 = vadd.f32 %v687_v6, %v346_v25  ;;  %v215_v36 = vadd.f32 %v673_v2, %v147_v26  ;;  %v148_v38 = vmul.f32 %v623_v37, %v80_v22 }
  0x58   :  { %603 = vst [vmem:[%s1505_s6 + $0x1a0] sm:$0xff] %v539_v29  ;;  %v477_v39 = vadd.f32 %v413_v30, %v213_v19  ;;  %v415_v40 = vadd.f32 %v687_v6, %v347_v32  ;;  %v348_v41 = vmul.f32 %v682_v5, %v280_v27  ;;  %v149_v42 = vmul.f32 %v623_v37, %v81_v28  ;;  %v625_v6 = vld [vmem:[%s1503_s4] ss:$0 sm:$0xff] }
  0x59   :  { %604 = vst [vmem:[%s1505_s6 + $0x1a8] sm:$0xff] %v540_v34  ;;  %v478_v2 = vadd.f32 %v414_v35, %v214_v31  ;;  %v216_v45 = vadd.f32 %v624_v44, %v148_v38  ;;  %v349_v5 = vmul.f32 %v625_v6, %v281_v33  ;;  %v150_v46 = vmul.f32 %v623_v37, %v82_v1 }
  0x5a   :  { %v541_v49 = vmax.f32 %v477_v39, 0.0  ;;  %v479_v50 = vadd.f32 %v415_v40, %v215_v36  ;;  %v416_v52 = vadd.f32 %v626_v51, %v348_v41  ;;  %v217_v53 = vadd.f32 %v624_v44, %v149_v42 }
  0x5b   :  { %v542_v56 = vmax.f32 %v478_v2, 0.0  ;;  %v417_v57 = vadd.f32 %v626_v51, %v349_v5  ;;  %v218_v58 = vadd.f32 %v624_v44, %v150_v46  ;;  %v350_v59 = vmul.f32 %v625_v6, %v282_v43 }
  0x5c   :  { %605 = vst [vmem:[%s1505_s6 + $0x1b0] sm:$0xff] %v541_v49  ;;  %v543_v61 = vmax.f32 %v479_v50, 0.0  ;;  %v480_v62 = vadd.f32 %v416_v52, %v216_v45  ;;  %v151_v63 = vmul.f32 %v623_v37, %v83_v47  ;;  %v351_v0 = vmul.f32 %v625_v6, %v283_v48 }
  0x5d   :  { %606 = vst [vmem:[%s1505_s6 + $0x1b8] sm:$0xff] %v542_v56  ;;  %v481_v3 = vadd.f32 %v417_v57, %v217_v53  ;;  %v418_v4 = vadd.f32 %v626_v51, %v350_v59  ;;  %v152_v7 = vmul.f32 %v623_v37, %v84_v54  ;;  %v352_v8 = vmul.f32 %v625_v6, %v284_v55 }
  0x5e   :  { %607 = vst [vmem:[%s1505_s6 + $0x1c0] sm:$0xff] %v543_v61  ;;  %v544_v11 = vmax.f32 %v480_v62, 0.0  ;;  %v219_v12 = vadd.f32 %v624_v44, %v151_v63  ;;  %v419_v13 = vadd.f32 %v626_v51, %v351_v0  ;;  %v153_v14 = vmul.f32 %v623_v37, %v85_v60 }
  0x5f   :  { %v545_v16 = vmax.f32 %v481_v3, 0.0  ;;  %v482_v17 = vadd.f32 %v418_v4, %v218_v58  ;;  %v220_v18 = vadd.f32 %v624_v44, %v152_v7  ;;  %v420_v19 = vadd.f32 %v626_v51, %v352_v8 }
  0x60   :  { %608 = vst [vmem:[%s1505_s6 + $0x1c8] sm:$0xff] %v544_v11  ;;  %v483_v20 = vadd.f32 %v419_v13, %v219_v12  ;;  %v221_v21 = vadd.f32 %v624_v44, %v153_v14  ;;  %v353_v22 = vmul.f32 %v625_v6, %v285_v9  ;;  %v154_v23 = vmul.f32 %v623_v37, %v86_v10 }
  0x61   :  { %609 = vst [vmem:[%s1505_s6 + $0x1d0] sm:$0xff] %v545_v16  ;;  %v546_v24 = vmax.f32 %v482_v17, 0.0  ;;  %v484_v25 = vadd.f32 %v420_v19, %v220_v18  ;;  %v354_v26 = vmul.f32 %v625_v6, %v286_v15 }
  0x62   :  { %v547_v27 = vmax.f32 %v483_v20, 0.0  ;;  %v421_v28 = vadd.f32 %v626_v51, %v353_v22  ;;  %v222_v29 = vadd.f32 %v624_v44, %v154_v23 }
  0x63   :  { %610 = vst [vmem:[%s1505_s6 + $0x1d8] sm:$0xff] %v546_v24  ;;  %v548_v30 = vmax.f32 %v484_v25, 0.0  ;;  %v422_v31 = vadd.f32 %v626_v51, %v354_v26 }
  0x64   :  { %611 = vst [vmem:[%s1505_s6 + $0x1e0] sm:$0xff] %v547_v27  ;;  %v485_v32 = vadd.f32 %v421_v28, %v221_v21 }
  0x65   :  { %612 = vst [vmem:[%s1505_s6 + $0x1e8] sm:$0xff] %v548_v30  ;;  %v486_v33 = vadd.f32 %v422_v31, %v222_v29 }
  0x66   :  { %v549_v1 = vmax.f32 %v485_v32, 0.0 }
  0x67   :  { %v550_v34 = vmax.f32 %v486_v33, 0.0 }
  0x68   :  { %613 = vst [vmem:[%s1505_s6 + $0x1f0] sm:$0xff] %v549_v1 }
  0x69   :  { %614 = vst [vmem:[%s1505_s6 + $0x1f8] sm:$0xff] %v550_v34 }

// kernel: bottleneck_forward.6
= control target key start
LH: loop header
LB: loop body
LE: loop exit
PB: predicated region body
PF: predicated region fallthrough
CT: control target
= control target key end

     0   :  { %s2628_s18 = smov 0   ;;  %s3626_s0 = inlined_call_operand.vmem [shape: f32[2,16,16,128], index: 0, kind: input, shape index: {}]   ;;  %s3627_s1 = inlined_call_operand.vmem [shape: f32[9,128,128], index: 1, kind: input, shape index: {}]   ;;  %s3628_s2 = inlined_call_operand.vmem [shape: f32[1,128], index: 2, kind: input, shape index: {}]   ;;  %s3629_s3 = inlined_call_operand.vmem [shape: f32[1,128], index: 3, kind: input, shape index: {}]   ;;  %s3630_s4 = inlined_call_operand.vmem [shape: f32[2,256,128], index: 4, kind: output, shape index: {0}]   ;;  %s3631_s5 = inlined_call_operand.vmem [shape: f32[2,2,128], index: 5, kind: output, shape index: {1}]  }
   0x1 LB: > { %s2385_s19 = sadd.s32 4294967295, %s2595_s18   ;;  %p2389_p0 = scmp.ge.s32.totalorder %s2595_s18, 1  ;;  %s2595_s18 = sphi %s2628_s18, %s16_s18  }
   0x2   : > { %p190_p1 = scmp.lt.s32.totalorder %s2595_s18, 3 }
   0x4   : > { %p191_p2 = pnand %p2389_p0, %p190_p1 }
   0x5   : > { %p222_p3 = scmp.lt.s32.totalorder (!%p191_p2), %s2385_s19, 1 }
   0x6   : > { %194 = sbr.rel (%p191_p2) target bundleno = 766 (0x2fe), region = 36 }
   0xb   : > { %v2410_v0 = vld [vmem:[%s3627_s1 + $0xf8] sm:$0xff]  ;;  %v2409_v1 = vld [vmem:[%s3627_s1 + $0xf0] sm:$0xff]  ;;  %v2597_v2 = vmov 0.0   ;;  %v2408_v3 = vld [vmem:[%s3627_s1 + $0xe8] sm:$0xff]  ;;  %s3633_s19 = smov (!%p222_p3, %s2385_s19), 1 }
   0xc   : > { %2527 = vmatpush.msra.mxu1 %v2410_v0  ;;  %2528 = vmatpush.msra.mxu2 %v2410_v0  ;;  %372 = vst [vmem:[#allocation2] sm:$0xff] %v2597_v2  ;;  %v2407_v4 = vld [vmem:[%s3627_s1 + $0xe0] sm:$0xff]  ;;  %s2525_s28 = sshll.u32 %s3633_s19, 8  ;;  %v2406_v5 = vld [vmem:[%s3627_s1 + $0xd8] sm:$0xff]  ;;  %v2405_v10 = vld [vmem:[%s3627_s1 + $0xd0] sm:$0xff] }
   0xd   : > { %2529 = vmatpush.msra.mxu3 %v2410_v0  ;;  %574 = vmatpush.msra.mxu0 %v2410_v0  ;;  %373 = vst [vmem:[#allocation2 + $0x8] sm:$0xff] %v2597_v2  ;;  %s2663_s8 = scalar_lea.vmem %s3626_s0, %s2525_s28  ;;  %v2668_v6 = vld [vmem:[%s3628_s2] ss:$0 sm:$0xff]  ;;  %v2404_v12 = vld [vmem:[%s3627_s1 + $0xc8] sm:$0xff]  ;;  %v2402_v15 = vld [vmem:[%s3627_s1 + $0xb8] sm:$0xff]  ;;  %s3554_s25 = scalar_lea.vmem %s3630_s4, %s2525_s28 }
   0xe   : > { %2530 = vmatpush.msra.mxu1 %v2409_v1  ;;  %2531 = vmatpush.msra.mxu2 %v2409_v1  ;;  %374 = vst [vmem:[#allocation2 + $0x10] sm:$0xff] %v2597_v2  ;;  %v242_v7 = vld [vmem:[%s2663_s8 + $0x30] sm:$0xff]  ;;  %v2675_v8 = vld [vmem:[%s3629_s3] ss:$0 sm:$0xff]  ;;  %v2400_v18 = vld [vmem:[%s3627_s1 + $0xa8] sm:$0xff]  ;;  %s2394_s28 = sshll.u32 %s3633_s19, 1 }
   0xf   : > { %2532 = vmatpush.msra.mxu3 %v2409_v1  ;;  %575 = vmatpush.msra.mxu0 %v2409_v1  ;;  %375 = vst [vmem:[#allocation2 + $0x18] sm:$0xff] %v2597_v2  ;;  %v278_v9 = vmul.f32 %v2668_v6, %v242_v7  ;;  %v2403_v14 = vld [vmem:[%s3627_s1 + $0xc0] sm:$0xff]  ;;  %v2401_v16 = vld [vmem:[%s3627_s1 + $0xb0] sm:$0xff]  ;;  %v2398_v22 = vld [vmem:[%s3627_s1 + $0x98] sm:$0xff]  ;;  %s235_s29 = scalar_lea.vmem %s3631_s5, %s2394_s28 }
  0x10   : > { %2533 = vmatpush.msra.mxu1 %v2408_v3  ;;  %2534 = vmatpush.msra.mxu2 %v2408_v3  ;;  %376 = vst [vmem:[#allocation2 + $0x20] sm:$0xff] %v2597_v2  ;;  %v250_v17 = vld [vmem:[%s2663_s8 + $0x70] sm:$0xff]  ;;  %v2399_v20 = vld [vmem:[%s3627_s1 + $0xa0] sm:$0xff]  ;;  %v243_v26 = vld [vmem:[%s2663_s8 + $0x38] sm:$0xff] }
  0x11   : > { %2535 = vmatpush.msra.mxu3 %v2408_v3  ;;  %576 = vmatpush.msra.mxu0 %v2408_v3  ;;  %379 = vst [vmem:[#allocation2 + $0x38] sm:$0xff] %v2597_v2  ;;  %v314_v11 = vadd.f32 %v2675_v8, %v278_v9  ;;  %v258_v19 = vld [vmem:[%s2663_s8 + $0xb0] sm:$0xff]  ;;  %v286_v21 = vmul.f32 %v2668_v6, %v250_v17  ;;  %v251_v27 = vld [vmem:[%s2663_s8 + $0x78] sm:$0xff]  ;;  %v2396_v28 = vld [vmem:[%s3627_s1 + $0x88] sm:$0xff] }
  0x12   : > { %2536 = vmatpush.msra.mxu1 %v2407_v4  ;;  %2537 = vmatpush.msra.mxu2 %v2407_v4  ;;  %380 = vst [vmem:[#allocation2 + $0x40] sm:$0xff] %v2597_v2  ;;  %v294_v23 = vmul.f32 %v2668_v6, %v258_v19  ;;  %v2397_v24 = vld [vmem:[%s3627_s1 + $0x90] sm:$0xff]  ;;  %v259_v30 = vld [vmem:[%s2663_s8 + $0xb8] sm:$0xff]  ;;  %v2395_v31 = vld [vmem:[%s3627_s1 + $0x80] sm:$0xff]  ;;  %v279_v33 = vmul.f32 %v2668_v6, %v243_v26 }
  0x13   : > { %2538 = vmatpush.msra.mxu3 %v2407_v4  ;;  %577 = vmatpush.msra.mxu0 %v2407_v4  ;;  %383 = vst [vmem:[#allocation2 + $0x58] sm:$0xff] %v2597_v2  ;;  %v2690_v13 = vmax.f32 %v314_v11, 0.0  ;;  %v2732_v25 = vadd.f32 %v2675_v8, %v286_v21  ;;  %v287_v34 = vmul.f32 %v2668_v6, %v251_v27  ;;  %v2426_v35 = vld [vmem:[%s3627_s1 + $0x178] sm:$0xff]  ;;  %v2425_v40 = vld [vmem:[%s3627_s1 + $0x170] sm:$0xff]  ;;  %v244_v44 = vld [vmem:[%s2663_s8 + $0x40] sm:$0xff] }
  0x14   : > { %2539 = vmatpush.msra.mxu1 %v2406_v5  ;;  %2540 = vmatpush.msra.mxu2 %v2406_v5  ;;  %384 = vst [vmem:[#allocation2 + $0x60] sm:$0xff] %v2597_v2  ;;  %v2742_v29 = vadd.f32 %v2675_v8, %v294_v23  ;;  %v295_v37 = vmul.f32 %v2668_v6, %v259_v30  ;;  %v524_v38 = vld [vmem:[%s3627_s1 + $0x78] sm:$0xff]  ;;  %v523_v43 = vld [vmem:[%s3627_s1 + $0x70] sm:$0xff]  ;;  %v252_v45 = vld [vmem:[%s2663_s8 + $0x80] sm:$0xff] }
  0x15   : > { %2541 = vmatpush.msra.mxu3 %v2406_v5  ;;  %578 = vmatpush.msra.mxu0 %v2406_v5  ;;  %387 = vst [vmem:[#allocation2 + $0x78] sm:$0xff] %v2597_v2  ;;  %v354_v32 = vmax.f32 %v2732_v25, 0.0  ;;  %v2442_v39 = vld [vmem:[%s3627_s1 + $0x1f8] sm:$0xff]  ;;  %v315_v41 = vadd.f32 %v2675_v8, %v279_v33  ;;  %v2776_v42 = vadd.f32 %v2675_v8, %v287_v34  ;;  %v2441_v46 = vld [vmem:[%s3627_s1 + $0x1f0] sm:$0xff]  ;;  %v2424_v47 = vld [vmem:[%s3627_s1 + $0x168] sm:$0xff] }
  0x16   : > { %2542 = vmatpush.msra.mxu1 %v2405_v10  ;;  %2543 = vmatpush.msra.mxu2 %v2405_v10  ;;  %388 = vst [vmem:[#allocation2 + $0x80] sm:$0xff] %v2597_v2  ;;  %v362_v36 = vmax.f32 %v2742_v29, 0.0  ;;  %v2794_v48 = vadd.f32 %v2675_v8, %v295_v37  ;;  %v522_v49 = vld [vmem:[%s3627_s1 + $0x68] sm:$0xff]  ;;  %v260_v50 = vld [vmem:[%s2663_s8 + $0xc0] sm:$0xff]  ;;  %v2458_v54 = vld [vmem:[%s3627_s1 + $0x278] sm:$0xff]  ;;  %v280_v55 = vmul.f32 %v2668_v6, %v244_v44 }
  0x17   : > { %2544 = vmatpush.msra.mxu3 %v2405_v10  ;;  %579 = vmatpush.msra.mxu0 %v2405_v10  ;;  %391 = vst [vmem:[#allocation2 + $0x98] sm:$0xff] %v2597_v2  ;;  %v2802_v51 = vmax.f32 %v315_v41, 0.0  ;;  %v355_v52 = vmax.f32 %v2776_v42, 0.0  ;;  %v2440_v53 = vld [vmem:[%s3627_s1 + $0x1e8] sm:$0xff]  ;;  %v288_v56 = vmul.f32 %v2668_v6, %v252_v45  ;;  %v2423_v59 = vld [vmem:[%s3627_s1 + $0x160] sm:$0xff]  ;;  %v296_v61 = vmul.f32 %v2668_v6, %v260_v50  ;;  %v2457_v63 = vld [vmem:[%s3627_s1 + $0x270] sm:$0xff] }
  0x18   : > { %2545 = vmatpush.msra.mxu1 %v2404_v12  ;;  %2546 = vmatpush.msra.mxu2 %v2404_v12  ;;  %451 = vst [vmem:[#allocation2 + $0x88] sm:$0xff] %v2690_v13  ;;  %v245_v57 = vld [vmem:[%s2663_s8 + $0x48] sm:$0xff]  ;;  %v363_v58 = vmax.f32 %v2794_v48, 0.0  ;;  %v2439_v60 = vld [vmem:[%s3627_s1 + $0x1e0] sm:$0xff]  ;;  %v316_v1 = vadd.f32 %v2675_v8, %v280_v55  ;;  %v2422_v5 = vld [vmem:[%s3627_s1 + $0x158] sm:$0xff] }
  0x19   : > { %2547 = vmatpush.msra.mxu3 %v2404_v12  ;;  %580 = vmatpush.msra.mxu0 %v2404_v12  ;;  %392 = vst [vmem:[#allocation2 + $0xa0] sm:$0xff] %v2597_v2  ;;  %v253_v62 = vld [vmem:[%s2663_s8 + $0x88] sm:$0xff]  ;;  %v236_v0 = vld [vmem:[%s2663_s8] sm:$0xff]  ;;  %v324_v3 = vadd.f32 %v2675_v8, %v288_v56  ;;  %v281_v7 = vmul.f32 %v2668_v6, %v245_v57  ;;  %v2438_v10 = vld [vmem:[%s3627_s1 + $0x1d8] sm:$0xff] }
  0x1a   : > { %2548 = vmatpush.msra.mxu1 %v2403_v14  ;;  %2549 = vmatpush.msra.mxu2 %v2403_v14  ;;  %395 = vst [vmem:[#allocation2 + $0xb8] sm:$0xff] %v2597_v2  ;;  %v521_v4 = vld [vmem:[%s3627_s1 + $0x60] sm:$0xff]  ;;  %v261_v9 = vld [vmem:[%s2663_s8 + $0xc8] sm:$0xff]  ;;  %v289_v12 = vmul.f32 %v2668_v6, %v253_v62  ;;  %v2421_v17 = vld [vmem:[%s3627_s1 + $0x150] sm:$0xff]  ;;  %v2873_v23 = vmax.f32 %v316_v1, 0.0 }
  0x1b   : > { %2550 = vmatpush.msra.mxu3 %v2403_v14  ;;  %581 = vmatpush.msra.mxu0 %v2403_v14  ;;  %396 = vst [vmem:[#allocation2 + $0xc0] sm:$0xff] %v2597_v2  ;;  %v2456_v11 = vld [vmem:[%s3627_s1 + $0x268] sm:$0xff]  ;;  %v246_v14 = vld [vmem:[%s2663_s8 + $0x50] sm:$0xff]  ;;  %v297_v21 = vmul.f32 %v2668_v6, %v261_v9  ;;  %v2455_v25 = vld [vmem:[%s3627_s1 + $0x260] sm:$0xff]  ;;  %v317_v26 = vadd.f32 %v2675_v8, %v281_v7 }
  0x1c   : > { %2551 = vmatpush.msra.mxu1 %v2402_v15  ;;  %2552 = vmatpush.msra.mxu2 %v2402_v15  ;;  %399 = vst [vmem:[#allocation2 + $0xd8] sm:$0xff] %v2597_v2  ;;  %v254_v19 = vld [vmem:[%s2663_s8 + $0x90] sm:$0xff]  ;;  %v325_v30 = vadd.f32 %v2675_v8, %v289_v12  ;;  %v2420_v34 = vld [vmem:[%s3627_s1 + $0x148] sm:$0xff]  ;;  %v2419_v44 = vld [vmem:[%s3627_s1 + $0x140] sm:$0xff] }
  0x1d   : > { %2553 = vmatpush.msra.mxu3 %v2402_v15  ;;  %582 = vmatpush.msra.mxu0 %v2402_v15  ;;  %400 = vst [vmem:[#allocation2 + $0xe0] sm:$0xff] %v2597_v2  ;;  %v332_v15 = vadd.f32 %v2675_v8, %v296_v61  ;;  %v519_v27 = vld [vmem:[%s3627_s1 + $0x50] sm:$0xff]  ;;  %v2909_v42 = vmax.f32 %v317_v26, 0.0  ;;  %v517_v56 = vld [vmem:[%s3627_s1 + $0x40] sm:$0xff]  ;;  %v2418_v57 = vld [vmem:[%s3627_s1 + $0x138] sm:$0xff] }
  0x1e   : > { %2554 = vmatpush.msra.mxu1 %v2401_v16  ;;  %2555 = vmatpush.msra.mxu2 %v2401_v16  ;;  %403 = vst [vmem:[#allocation2 + $0xf8] sm:$0xff] %v2597_v2  ;;  %v262_v29 = vld [vmem:[%s2663_s8 + $0xd0] sm:$0xff]  ;;  %v2920_v48 = vmax.f32 %v325_v30, 0.0  ;;  %v239_v1 = vld [vmem:[%s2663_s8 + $0x18] sm:$0xff]  ;;  %v2416_v30 = vld [vmem:[%s3627_s1 + $0x128] sm:$0xff] }
  0x1f   : > { %2556 = vmatpush.msra.mxu3 %v2401_v16  ;;  %583 = vmatpush.msra.mxu0 %v2401_v16  ;;  %404 = vst [vmem:[#allocation2 + $0x100] sm:$0xff] %v2597_v2  ;;  %v520_v16 = vld [vmem:[%s3627_s1 + $0x58] sm:$0xff]  ;;  %v364_v33 = vmax.f32 %v332_v15, 0.0  ;;  %v238_v41 = vld [vmem:[%s2663_s8 + $0x10] sm:$0xff]  ;;  %v249_v15 = vld [vmem:[%s2663_s8 + $0x68] sm:$0xff] }
  0x20   : > { %2557 = vmatpush.msra.mxu1 %v2400_v18  ;;  %2558 = vmatpush.msra.mxu2 %v2400_v18  ;;  %407 = vst [vmem:[#allocation2 + $0x118] sm:$0xff] %v2597_v2  ;;  %v2453_v50 = vld [vmem:[%s3627_s1 + $0x250] sm:$0xff] }
  0x21   : > { %2559 = vmatpush.msra.mxu3 %v2400_v18  ;;  %584 = vmatpush.msra.mxu0 %v2400_v18  ;;  %408 = vst [vmem:[#allocation2 + $0x120] sm:$0xff] %v2597_v2  ;;  %v272_v18 = vmul.f32 %v2668_v6, %v236_v0 }
  0x22   : > { %2560 = vmatpush.msra.mxu1 %v2399_v20  ;;  %2561 = vmatpush.msra.mxu2 %v2399_v20  ;;  %411 = vst [vmem:[#allocation2 + $0x138] sm:$0xff] %v2597_v2 }
  0x23   : > { %2562 = vmatpush.msra.mxu3 %v2399_v20  ;;  %412 = vst [vmem:[#allocation2 + $0x140] sm:$0xff] %v2597_v2  ;;  %585 = vmatpush.msra.mxu0 %v2399_v20  ;;  %v2437_v20 = vld [vmem:[%s3627_s1 + $0x1d0] sm:$0xff] }
  0x24   : > { %2563 = vmatpush.msra.mxu1 %v2398_v22  ;;  %2564 = vmatpush.msra.mxu2 %v2398_v22  ;;  %415 = vst [vmem:[#allocation2 + $0x158] sm:$0xff] %v2597_v2 }
  0x25   : > { %2565 = vmatpush.msra.mxu3 %v2398_v22  ;;  %416 = vst [vmem:[#allocation2 + $0x160] sm:$0xff] %v2597_v2  ;;  %586 = vmatpush.msra.mxu0 %v2398_v22  ;;  %v237_v22 = vld [vmem:[%s2663_s8 + $0x8] sm:$0xff] }
  0x26   : > { %2566 = vmatpush.msra.mxu1 %v2397_v24  ;;  %2567 = vmatpush.msra.mxu2 %v2397_v24  ;;  %419 = vst [vmem:[#allocation2 + $0x178] sm:$0xff] %v2597_v2  ;;  %v273_v37 = vmul.f32 %v2668_v6, %v237_v22 }
  0x27   : > { %2568 = vmatpush.msra.mxu3 %v2397_v24  ;;  %420 = vst [vmem:[#allocation2 + $0x180] sm:$0xff] %v2597_v2  ;;  %587 = vmatpush.msra.mxu0 %v2397_v24  ;;  %v356_v24 = vmax.f32 %v324_v3, 0.0 }
  0x28   : > { %2569 = vmatpush.msra.mxu1 %v2396_v28  ;;  %2570 = vmatpush.msra.mxu2 %v2396_v28  ;;  %423 = vst [vmem:[#allocation2 + $0x198] sm:$0xff] %v2597_v2 }
  0x29   : > { %2571 = vmatpush.msra.mxu3 %v2396_v28  ;;  %424 = vst [vmem:[#allocation2 + $0x1a0] sm:$0xff] %v2597_v2  ;;  %588 = vmatpush.msra.mxu0 %v2396_v28  ;;  %v282_v28 = vmul.f32 %v2668_v6, %v246_v14 }
  0x2a   : > { %2572 = vmatpush.msra.mxu1 %v2395_v31  ;;  %2573 = vmatpush.msra.mxu2 %v2395_v31  ;;  %427 = vst [vmem:[#allocation2 + $0x1b8] sm:$0xff] %v2597_v2 }
  0x2b   : > { %614 = vmatmul.f32.vlgmr.msra.gmra.mxu1 %v2690_v13  ;;  %428 = vst [vmem:[#allocation2 + $0x1c0] sm:$0xff] %v2597_v2  ;;  %638 = vmatmul.f32.vlgmr.msra.gmra.mxu2 %v354_v32  ;;  %v318_v45 = vadd.f32 %v2675_v8, %v282_v28 }
  0x2c   : > { %431 = vst [vmem:[#allocation2 + $0x1d8] sm:$0xff] %v2597_v2  ;;  %849 = vmatpush.msrb.mxu2 %v2426_v35  ;;  %2574 = vmatpush.msra.mxu3 %v2395_v31  ;;  %v308_v35 = vadd.f32 %v2675_v8, %v272_v18  ;;  %v2433_v18 = vld [vmem:[%s3627_s1 + $0x1b0] sm:$0xff] }
  0x2d   : > { %432 = vst [vmem:[#allocation2 + $0x1e0] sm:$0xff] %v2597_v2  ;;  %662 = vmatmul.f32.vlgmr.msra.gmra.mxu3 %v362_v36  ;;  %687 = vmatpush.msrb.mxu1 %v524_v38  ;;  %v255_v38 = vld [vmem:[%s2663_s8 + $0x98] sm:$0xff]  ;;  %v2954_v3 = vmax.f32 %v318_v45, 0.0  ;;  %v2431_v45 = vld [vmem:[%s3627_s1 + $0x1a0] sm:$0xff] }
  0x2e   : > { %435 = vst [vmem:[#allocation2 + $0x1f8] sm:$0xff] %v2597_v2  ;;  %1043 = vmatpush.msrb.mxu3 %v2442_v39  ;;  %850 = vmatpush.msrb.mxu2 %v2425_v40  ;;  %v2454_v39 = vld [vmem:[%s3627_s1 + $0x258] sm:$0xff]  ;;  %v298_v40 = vmul.f32 %v2668_v6, %v262_v29  ;;  %v2932_v55 = vmax.f32 %v308_v35, 0.0  ;;  %v515_v29 = vld [vmem:[%s3627_s1 + $0x30] sm:$0xff]  ;;  %v2432_v35 = vld [vmem:[%s3627_s1 + $0x1a8] sm:$0xff] }
  0x2f   : > { %436 = vst [vmem:[#allocation2 + $0x200] sm:$0xff] %v2597_v2  ;;  %688 = vmatpush.msrb.mxu1 %v523_v43  ;;  %589 = vmatpush.msra.mxu0 %v2395_v31  ;;  %v290_v31 = vmul.f32 %v2668_v6, %v254_v19  ;;  %v518_v43 = vld [vmem:[%s3627_s1 + $0x48] sm:$0xff] }
  0x30   : > { %439 = vst [vmem:[#allocation2 + $0x218] sm:$0xff] %v2597_v2  ;;  %1044 = vmatpush.msrb.mxu3 %v2441_v46  ;;  %851 = vmatpush.msrb.mxu2 %v2424_v47  ;;  %v263_v47 = vld [vmem:[%s2663_s8 + $0xd8] sm:$0xff]  ;;  %v2946_v62 = vadd.f32 %v2675_v8, %v298_v40  ;;  %v2415_v40 = vld [vmem:[%s3627_s1 + $0x120] sm:$0xff] }
  0x31   : > { %440 = vst [vmem:[#allocation2 + $0x220] sm:$0xff] %v2597_v2  ;;  %590 = vmatmul.f32.vlgmr.msra.gmra.mxu0 %v2597_v2  ;;  %689 = vmatpush.msrb.mxu1 %v522_v49  ;;  %v2435_v49 = vld [vmem:[%s3627_s1 + $0x1c0] sm:$0xff]  ;;  %v299_v0 = vmul.f32 %v2668_v6, %v263_v47 }
  0x32   : > { %441 = vst [vmem:[#allocation2 + $0x228] sm:$0xff] %v2597_v2  ;;  %1045 = vmatpush.msrb.mxu3 %v2440_v53  ;;  %1237 = vmatpush.msrb.mxu0 %v2458_v54  ;;  %v291_v53 = vmul.f32 %v2668_v6, %v255_v38  ;;  %v248_v54 = vld [vmem:[%s2663_s8 + $0x60] sm:$0xff]  ;;  %v366_v22 = vmax.f32 %v2946_v62, 0.0 }
  0x33   : > { %442 = vst [vmem:[#allocation2 + $0x230] sm:$0xff] %v2597_v2  ;;  %617 = vmatmul.f32.gmra.mxu1 %v2802_v51  ;;  %641 = vmatmul.f32.gmra.mxu2 %v355_v52  ;;  %v284_v9 = vmul.f32 %v2668_v6, %v248_v54  ;;  %v241_v54 = vld [vmem:[%s2663_s8 + $0x28] sm:$0xff] }
  0x34   : > { %443 = vst [vmem:[#allocation2 + $0x238] sm:$0xff] %v2597_v2  ;;  %852 = vmatpush.msrb.mxu2 %v2423_v59  ;;  %1046 = vmatpush.msrb.mxu3 %v2439_v60  ;;  %v274_v59 = vmul.f32 %v2668_v6, %v238_v41  ;;  %v256_v60 = vld [vmem:[%s2663_s8 + $0xa0] sm:$0xff]  ;;  %v327_v12 = vadd.f32 %v2675_v8, %v291_v53 }
  0x35   : > { %459 = vst [vmem:[#allocation2 + $0x108] sm:$0xff] %v354_v32  ;;  %665 = vmatmul.f32.gmra.mxu3 %v363_v58  ;;  %1238 = vmatpush.msrb.mxu0 %v2457_v63  ;;  %v247_v32 = vld [vmem:[%s2663_s8 + $0x58] sm:$0xff]  ;;  %v292_v14 = vmul.f32 %v2668_v6, %v256_v60 }
  0x36   : > { %467 = vst [vmem:[#allocation2 + $0x188] sm:$0xff] %v362_v36  ;;  %690 = vmatpush.msrb.mxu1 %v521_v4  ;;  %853 = vmatpush.msrb.mxu2 %v2422_v5  ;;  %v2436_v36 = vld [vmem:[%s3627_s1 + $0x1c8] sm:$0xff]  ;;  %v283_v46 = vmul.f32 %v2668_v6, %v247_v32  ;;  %v2434_v63 = vld [vmem:[%s3627_s1 + $0x1b8] sm:$0xff]  ;;  %v310_v19 = vadd.f32 %v2675_v8, %v274_v59 }
  0x37   : > { %452 = vst [vmem:[#allocation2 + $0x90] sm:$0xff] %v2802_v51  ;;  %1047 = vmatpush.msrb.mxu3 %v2438_v10  ;;  %1239 = vmatpush.msrb.mxu0 %v2456_v11  ;;  %v2452_v4 = vld [vmem:[%s3627_s1 + $0x248] sm:$0xff]  ;;  %v516_v5 = vld [vmem:[%s3627_s1 + $0x38] sm:$0xff]  ;;  %v264_v10 = vld [vmem:[%s2663_s8 + $0xe0] sm:$0xff]  ;;  %v285_v32 = vmul.f32 %v2668_v6, %v249_v15 }
  0x38   : > { %460 = vst [vmem:[#allocation2 + $0x110] sm:$0xff] %v355_v52  ;;  %691 = vmatpush.msrb.mxu1 %v520_v16  ;;  %854 = vmatpush.msrb.mxu2 %v2421_v17  ;;  %v326_v52 = vadd.f32 %v2675_v8, %v290_v31  ;;  %v319_v7 = vadd.f32 %v2675_v8, %v283_v46  ;;  %v2417_v17 = vld [vmem:[%s3627_s1 + $0x130] sm:$0xff]  ;;  %v2414_v59 = vld [vmem:[%s3627_s1 + $0x118] sm:$0xff]  ;;  %v2412_v15 = vld [vmem:[%s3627_s1 + $0x108] sm:$0xff] }
  0x39   : > { %468 = vst [vmem:[#allocation2 + $0x190] sm:$0xff] %v363_v58  ;;  %593 = vmatmul.f32.gmra.mxu0 %v2597_v2  ;;  %1048 = vmatpush.msrb.mxu3 %v2437_v20  ;;  %v2901_v2 = vadd.f32 %v2675_v8, %v297_v21  ;;  %v309_v58 = vadd.f32 %v2675_v8, %v273_v37  ;;  %v257_v21 = vld [vmem:[%s2663_s8 + $0xa8] sm:$0xff] }
  0x3a   : > { %453 = vst [vmem:[#allocation2 + $0xa8] sm:$0xff] %v2873_v23  ;;  %1240 = vmatpush.msrb.mxu0 %v2455_v25  ;;  %692 = vmatpush.msrb.mxu1 %v519_v27  ;;  %v2965_v11 = vmax.f32 %v326_v52, 0.0  ;;  %v275_v20 = vmul.f32 %v2668_v6, %v239_v1  ;;  %v2989_v25 = vadd.f32 %v2675_v8, %v299_v0  ;;  %v240_v27 = vld [vmem:[%s2663_s8 + $0x20] sm:$0xff]  ;;  %v2996_v28 = vmax.f32 %v319_v7, 0.0  ;;  %v2448_v0 = vld [vmem:[%s3627_s1 + $0x228] sm:$0xff] }
  0x3b   : > { %620 = vmatmul.f32.gmra.mxu1 %v2873_v23  ;;  %461 = vst [vmem:[#allocation2 + $0x128] sm:$0xff] %v356_v24  ;;  %644 = vmatmul.f32.gmra.mxu2 %v356_v24  ;;  %v365_v61 = vmax.f32 %v2901_v2, 0.0  ;;  %v2972_v16 = vmax.f32 %v309_v58, 0.0  ;;  %v2451_v24 = vld [vmem:[%s3627_s1 + $0x240] sm:$0xff]  ;;  %v300_v26 = vmul.f32 %v2668_v6, %v264_v10  ;;  %v320_v31 = vadd.f32 %v2675_v8, %v284_v9  ;;  %v2429_v10 = vld [vmem:[%s3627_s1 + $0x190] sm:$0xff] }
  0x3c   : > { %469 = vst [vmem:[#allocation2 + $0x1a8] sm:$0xff] %v364_v33  ;;  %855 = vmatpush.msrb.mxu2 %v2420_v34  ;;  %1049 = vmatpush.msrb.mxu3 %v2436_v36  ;;  %v3009_v34 = vmax.f32 %v327_v12, 0.0  ;;  %v2450_v36 = vld [vmem:[%s3627_s1 + $0x238] sm:$0xff]  ;;  %v328_v37 = vadd.f32 %v2675_v8, %v292_v14  ;;  %v293_v38 = vmul.f32 %v2668_v6, %v257_v21  ;;  %v3020_v2 = vmax.f32 %v310_v19, 0.0  ;;  %v513_v52 = vld [vmem:[%s3627_s1 + $0x20] sm:$0xff] }
  0x3d   : > { %668 = vmatmul.f32.gmra.mxu3 %v364_v33  ;;  %454 = vst [vmem:[#allocation2 + $0xb0] sm:$0xff] %v2909_v42  ;;  %1241 = vmatpush.msrb.mxu0 %v2454_v39  ;;  %v265_v33 = vld [vmem:[%s2663_s8 + $0xe8] sm:$0xff]  ;;  %v311_v41 = vadd.f32 %v2675_v8, %v275_v20  ;;  %v3036_v46 = vadd.f32 %v2675_v8, %v300_v26  ;;  %v2447_v12 = vld [vmem:[%s3627_s1 + $0x220] sm:$0xff]  ;;  %v2446_v19 = vld [vmem:[%s3627_s1 + $0x218] sm:$0xff] }
  0x3e   : > { %462 = vst [vmem:[#allocation2 + $0x130] sm:$0xff] %v2920_v48  ;;  %693 = vmatpush.msrb.mxu1 %v518_v43  ;;  %856 = vmatpush.msrb.mxu2 %v2419_v44  ;;  %v514_v39 = vld [vmem:[%s3627_s1 + $0x28] sm:$0xff]  ;;  %v276_v43 = vmul.f32 %v2668_v6, %v240_v27  ;;  %v367_v44 = vmax.f32 %v2989_v25, 0.0  ;;  %v301_v47 = vmul.f32 %v2668_v6, %v265_v33  ;;  %v2445_v26 = vld [vmem:[%s3627_s1 + $0x210] sm:$0xff]  ;;  %v509_v27 = vld [vmem:[%s3627_s1] sm:$0xff] }
  0x3f   : > { %445 = vst [vmem:[#allocation2 + $0x28] sm:$0xff] %v2932_v55  ;;  %1050 = vmatpush.msrb.mxu3 %v2435_v49  ;;  %1242 = vmatpush.msrb.mxu0 %v2453_v50  ;;  %v2449_v49 = vld [vmem:[%s3627_s1 + $0x230] sm:$0xff]  ;;  %v3043_v50 = vmax.f32 %v320_v31, 0.0  ;;  %v321_v53 = vadd.f32 %v2675_v8, %v285_v32  ;;  %v277_v58 = vmul.f32 %v2668_v6, %v241_v54  ;;  %v3061_v60 = vmax.f32 %v311_v41, 0.0  ;;  %v510_v20 = vld [vmem:[%s3627_s1 + $0x8] sm:$0xff]  ;;  %v2506_v31 = vld [vmem:[%s3627_s1 + $0x3f8] sm:$0xff] }
  0x40   : > { %470 = vst [vmem:[#allocation2 + $0x1b0] sm:$0xff] %v365_v61  ;;  %694 = vmatpush.msrb.mxu1 %v517_v56  ;;  %857 = vmatpush.msrb.mxu2 %v2418_v57  ;;  %v3052_v56 = vmax.f32 %v328_v37, 0.0  ;;  %v329_v57 = vadd.f32 %v2675_v8, %v293_v38  ;;  %v368_v6 = vmax.f32 %v3036_v46, 0.0  ;;  %v3073_v1 = vadd.f32 %v2675_v8, %v301_v47  ;;  %v2474_v32 = vld [vmem:[%s3627_s1 + $0x2f8] sm:$0xff]  ;;  %v2443_v33 = vld [vmem:[%s3627_s1 + $0x200] sm:$0xff]  ;;  %v2473_v37 = vld [vmem:[%s3627_s1 + $0x2f0] sm:$0xff] }
  0x41   : > { %596 = vmatmul.f32.gmra.mxu0 %v2932_v55  ;;  %455 = vst [vmem:[#allocation2 + $0xc8] sm:$0xff] %v2954_v3  ;;  %1051 = vmatpush.msrb.mxu3 %v2434_v63  ;;  %v312_v63 = vadd.f32 %v2675_v8, %v276_v43  ;;  %v3084_v7 = vmax.f32 %v321_v53, 0.0  ;;  %v313_v9 = vadd.f32 %v2675_v8, %v277_v58  ;;  %v511_v8 = vld [vmem:[%s3627_s1 + $0x10] sm:$0xff]  ;;  %v2522_v25 = vld [vmem:[%s3627_s1 + $0x478] sm:$0xff]  ;;  %v2488_v43 = vld [vmem:[%s3627_s1 + $0x368] sm:$0xff] }
  0x42   : > { %463 = vst [vmem:[#allocation2 + $0x148] sm:$0xff] %v2965_v11  ;;  %1243 = vmatpush.msrb.mxu0 %v2452_v4  ;;  %695 = vmatpush.msrb.mxu1 %v516_v5  ;;  %v512_v4 = vld [vmem:[%s3627_s1 + $0x18] sm:$0xff]  ;;  %v2413_v5 = vld [vmem:[%s3627_s1 + $0x110] sm:$0xff]  ;;  %v3095_v14 = vmax.f32 %v329_v57, 0.0  ;;  %v369_v62 = vmax.f32 %v3073_v1, 0.0  ;;  %v2487_v57 = vld [vmem:[%s3627_s1 + $0x360] sm:$0xff] }
  0x43   : > { %623 = vmatmul.f32.gmra.mxu1 %v2909_v42  ;;  %647 = vmatmul.f32.gmra.mxu2 %v2920_v48  ;;  %446 = vst [vmem:[#allocation2 + $0x30] sm:$0xff] %v2972_v16  ;;  %v3120_v21 = vmax.f32 %v313_v9, 0.0  ;;  %v2521_v38 = vld [vmem:[%s3627_s1 + $0x470] sm:$0xff]  ;;  %v2471_v58 = vld [vmem:[%s3627_s1 + $0x2e0] sm:$0xff]  ;;  %v2470_v1 = vld [vmem:[%s3627_s1 + $0x2d8] sm:$0xff] }
  0x44   : > { %471 = vst [vmem:[#allocation2 + $0x1c8] sm:$0xff] %v366_v22  ;;  %858 = vmatpush.msrb.mxu2 %v2417_v17  ;;  %1052 = vmatpush.msrb.mxu3 %v2433_v18  ;;  %v3106_v17 = vmax.f32 %v312_v63, 0.0  ;;  %v2428_v18 = vld [vmem:[%s3627_s1 + $0x188] sm:$0xff]  ;;  %v801_v47 = vld [vmem:[#allocation2 + $0x11] sm:$0xff] }
  0x45   : > { %671 = vmatmul.f32.gmra.mxu3 %v365_v61  ;;  %1244 = vmatpush.msrb.mxu0 %v2451_v24  ;;  %456 = vst [vmem:[#allocation2 + $0xd0] sm:$0xff] %v2996_v28  ;;  %v2430_v61 = vld [vmem:[%s3627_s1 + $0x198] sm:$0xff]  ;;  %v2427_v24 = vld [vmem:[%s3627_s1 + $0x180] sm:$0xff]  ;;  %v478_v46 = vld [vmem:[#allocation2 + $0xf] sm:$0xff] }
  0x46   : > { %464 = vst [vmem:[#allocation2 + $0x150] sm:$0xff] %v3009_v34  ;;  %696 = vmatpush.msrb.mxu1 %v515_v29  ;;  %859 = vmatpush.msrb.mxu2 %v2416_v30  ;;  %v2490_v29 = vld [vmem:[%s3627_s1 + $0x378] sm:$0xff]  ;;  %v2444_v30 = vld [vmem:[%s3627_s1 + $0x208] sm:$0xff] }
  0x47   : > { %447 = vst [vmem:[#allocation2 + $0x48] sm:$0xff] %v3020_v2  ;;  %1053 = vmatpush.msrb.mxu3 %v2432_v35  ;;  %1245 = vmatpush.msrb.mxu0 %v2450_v36  ;;  %v2489_v35 = vld [vmem:[%s3627_s1 + $0x370] sm:$0xff]  ;;  %v994_v41 = vld [vmem:[#allocation2 + $0x27] sm:$0xff] }
  0x48   : > { %472 = vst [vmem:[#allocation2 + $0x1d0] sm:$0xff] %v367_v44  ;;  %697 = vmatpush.msrb.mxu1 %v514_v39  ;;  %860 = vmatpush.msrb.mxu2 %v2415_v40  ;;  %v2505_v36 = vld [vmem:[%s3627_s1 + $0x3f0] sm:$0xff]  ;;  %v477_v39 = vld [vmem:[#allocation2 + $0x7] sm:$0xff] }
  0x49   : > { %599 = vmatmul.f32.gmra.mxu0 %v2972_v16  ;;  %1054 = vmatpush.msrb.mxu3 %v2431_v45  ;;  %457 = vst [vmem:[#allocation2 + $0xe8] sm:$0xff] %v3043_v50  ;;  %v800_v40 = vld [vmem:[#allocation2 + $0x9] sm:$0xff] }
  0x4a   : > { %1246 = vmatpush.msrb.mxu0 %v2449_v49  ;;  %465 = vst [vmem:[#allocation2 + $0x168] sm:$0xff] %v3052_v56  ;;  %698 = vmatpush.msrb.mxu1 %v513_v52  ;;  %v2472_v45 = vld [vmem:[%s3627_s1 + $0x2e8] sm:$0xff] }
  0x4b   : > { %626 = vmatmul.f32.gmra.mxu1 %v2954_v3  ;;  %650 = vmatmul.f32.gmra.mxu2 %v2965_v11  ;;  %448 = vst [vmem:[#allocation2 + $0x50] sm:$0xff] %v3061_v60  ;;  %v995_v49 = vld [vmem:[#allocation2 + $0x2f] sm:$0xff] }
  0x4c   : > { %861 = vmatpush.msrb.mxu2 %v2414_v59  ;;  %473 = vst [vmem:[#allocation2 + $0x1e8] sm:$0xff] %v368_v6  ;;  %1055 = vmatpush.msrb.mxu3 %v2430_v61  ;;  %v2520_v52 = vld [vmem:[%s3627_s1 + $0x468] sm:$0xff]  ;;  %v2519_v61 = vld [vmem:[%s3627_s1 + $0x460] sm:$0xff] }
  0x4d   : > { %674 = vmatmul.f32.gmra.mxu3 %v366_v22  ;;  %1247 = vmatpush.msrb.mxu0 %v2448_v0  ;;  %458 = vst [vmem:[#allocation2 + $0xf0] sm:$0xff] %v3084_v7  ;;  %v2411_v22 = vld [vmem:[%s3627_s1 + $0x100] sm:$0xff]  ;;  %v802_v53 = vld [vmem:[#allocation2 + $0x29] sm:$0xff]  ;;  %v2486_v0 = vld [vmem:[%s3627_s1 + $0x358] sm:$0xff] }
  0x4e   : > { %699 = vmatpush.msrb.mxu1 %v512_v4  ;;  %862 = vmatpush.msrb.mxu2 %v2413_v5  ;;  %466 = vst [vmem:[#allocation2 + $0x170] sm:$0xff] %v3095_v14  ;;  %v996_v54 = vld [vmem:[#allocation2 + $0x47] sm:$0xff]  ;;  %v2518_v5 = vld [vmem:[%s3627_s1 + $0x458] sm:$0xff] }
  0x4f   : > { %1056 = vmatpush.msrb.mxu3 %v2429_v10  ;;  %1248 = vmatpush.msrb.mxu0 %v2447_v12  ;;  %449 = vst [vmem:[#allocation2 + $0x68] sm:$0xff] %v3106_v17  ;;  %v1000_v10 = vld [vmem:[#allocation2 + $0x87] sm:$0xff]  ;;  %v2485_v12 = vld [vmem:[%s3627_s1 + $0x350] sm:$0xff] }
  0x50   : > { %700 = vmatpush.msrb.mxu1 %v511_v8  ;;  %863 = vmatpush.msrb.mxu2 %v2412_v15  ;;  %474 = vst [vmem:[#allocation2 + $0x1f0] sm:$0xff] %v369_v62  ;;  %v2501_v8 = vld [vmem:[%s3627_s1 + $0x3d0] sm:$0xff] }
  0x51   : > { %602 = vmatmul.f32.gmra.mxu0 %v3020_v2  ;;  %1057 = vmatpush.msrb.mxu3 %v2428_v18  ;;  %450 = vst [vmem:[#allocation2 + $0x70] sm:$0xff] %v3120_v21  ;;  %v2469_v15 = vld [vmem:[%s3627_s1 + $0x2d0] sm:$0xff] }
  0x52   : > { %1249 = vmatpush.msrb.mxu0 %v2446_v19  ;;  %701 = vmatpush.msrb.mxu1 %v510_v20  ;;  %v997_v59 = vld [vmem:[#allocation2 + $0x4f] sm:$0xff] }
  0x53   : > { %629 = vmatmul.f32.gmra.mxu1 %v2996_v28  ;;  %653 = vmatmul.f32.gmra.mxu2 %v3009_v34  ;;  %v804_v63 = vld [vmem:[#allocation2 + $0x49] sm:$0xff] }
  0x54   : > { %864 = vmatpush.msrb.mxu2 %v2411_v22  ;;  %1058 = vmatpush.msrb.mxu3 %v2427_v24  ;;  %v2517_v18 = vld [vmem:[%s3627_s1 + $0x450] sm:$0xff]  ;;  %v2500_v22 = vld [vmem:[%s3627_s1 + $0x3c8] sm:$0xff] }
  0x55   : > { %677 = vmatmul.f32.gmra.mxu3 %v367_v44  ;;  %1250 = vmatpush.msrb.mxu0 %v2445_v26  ;;  %v2504_v44 = vld [vmem:[%s3627_s1 + $0x3e8] sm:$0xff] }
  0x56   : > { %702 = vmatpush.msrb.mxu1 %v509_v27  ;;  %1626 = vmatpush.msra.mxu2 %v2490_v29  ;;  %v808_v20 = vld [vmem:[#allocation2 + $0x89] sm:$0xff] }
  0x57   : > { %1251 = vmatpush.msrb.mxu0 %v2444_v30  ;;  %1820 = vmatpush.msra.mxu3 %v2506_v31  ;;  %v809_v30 = vld [vmem:[#allocation2 + $0x91] sm:$0xff] }
  0x58   : > { %1431 = vmatpush.msra.mxu1 %v2474_v32  ;;  %1627 = vmatpush.msra.mxu2 %v2489_v35  ;;  %v999_v4 = vld [vmem:[#allocation2 + $0x6f] sm:$0xff] }
  0x59   : > { %605 = vmatmul.f32.gmra.mxu0 %v3061_v60  ;;  %1821 = vmatpush.msra.mxu3 %v2505_v36  ;;  %v806_v9 = vld [vmem:[#allocation2 + $0x69] sm:$0xff] }
  0x5a   : > { %1252 = vmatpush.msrb.mxu0 %v2443_v33  ;;  %1432 = vmatpush.msra.mxu1 %v2473_v37  ;;  %v1003_v31 = vld [vmem:[#allocation2 + $0xaf] sm:$0xff] }
  0x5b   : > { %632 = vmatmul.f32.gmra.mxu1 %v3043_v50  ;;  %656 = vmatmul.f32.gmra.mxu2 %v3052_v56  ;;  %v2516_v32 = vld [vmem:[%s3627_s1 + $0x448] sm:$0xff] }
  0x5c   : > { %2014 = vmatpush.msra.mxu0 %v2522_v25  ;;  %1628 = vmatpush.msra.mxu2 %v2488_v43  ;;  %v810_v37 = vld [vmem:[#allocation2 + $0xa9] sm:$0xff] }
  0x5d   : > { %680 = vmatmul.f32.gmra.mxu3 %v368_v6  ;;  %1433 = vmatpush.msra.mxu1 %v2472_v45  ;;  %v998_v6 = vld [vmem:[#allocation2 + $0x67] sm:$0xff]  ;;  %v811_v45 = vld [vmem:[#allocation2 + $0xb1] sm:$0xff] }
  0x5e   : > { %2015 = vmatpush.msra.mxu0 %v2521_v38  ;;  %1822 = vmatpush.msra.mxu3 %v2504_v44  ;;  %v2483_v38 = vld [vmem:[%s3627_s1 + $0x340] sm:$0xff] }
  0x5f   : > { %1629 = vmatpush.msra.mxu2 %v2487_v57  ;;  %1434 = vmatpush.msra.mxu1 %v2471_v58  ;;  %v812_v57 = vld [vmem:[#allocation2 + $0xc9] sm:$0xff]  ;;  %v2498_v58 = vld [vmem:[%s3627_s1 + $0x3b8] sm:$0xff] }
  0x60   : > { %2016 = vmatpush.msra.mxu0 %v2520_v52 }
  0x61   : > { %608 = vmatmul.f32.gmra.mxu0 %v3106_v17  ;;  %1630 = vmatpush.msra.mxu2 %v2486_v0  ;;  %v1007_v0 = vld [vmem:[#allocation2 + $0xef] sm:$0xff] }
  0x62   : > { %2017 = vmatpush.msra.mxu0 %v2519_v61  ;;  %1435 = vmatpush.msra.mxu1 %v2470_v1 }
  0x63   : > { %635 = vmatmul.f32.gmra.mxu1 %v3084_v7  ;;  %659 = vmatmul.f32.gmra.mxu2 %v3095_v14 }
  0x64   : > { %2018 = vmatpush.msra.mxu0 %v2518_v5  ;;  %1631 = vmatpush.msra.mxu2 %v2485_v12  ;;  %v2497_v12 = vld [vmem:[%s3627_s1 + $0x3b0] sm:$0xff] }
  0x65   : > { %683 = vmatmul.f32.gmra.mxu3 %v369_v62  ;;  %1436 = vmatpush.msra.mxu1 %v2469_v15  ;;  %v1001_v62 = vld [vmem:[#allocation2 + $0x8f] sm:$0xff] }
  0x66   : > { %2019 = vmatpush.msra.mxu0 %v2517_v18 }
  0x68   : > { %2020 = vmatpush.msra.mxu0 %v2516_v32 }
  0x69   : > { %611 = vmatmul.f32.gmra.mxu0 %v3120_v21 }
  0x6b   : > { %703 = vmatmul.f32.vlgmr.msrb.gmra.mxu1 %v477_v39  ;;  %865 = vmatmul.f32.vlgmr.msrb.gmra.mxu2 %v800_v40  ;;  %v2499_v39 = vld [vmem:[%s3627_s1 + $0x3c0] sm:$0xff] }
  0x6d   : > { %1059 = vmatmul.f32.vlgmr.msrb.gmra.mxu3 %v994_v41 }
  0x71   : > { %1253 = vmatmul.f32.vlgmr.msrb.gmra.mxu0 %v2932_v55  ;;  %v2503_v55 = vld [vmem:[%s3627_s1 + $0x3e0] sm:$0xff] }
  0x72   : > { %1823 = vmatpush.msra.mxu3 %v2503_v55  ;;  %v2482_v55 = vld [vmem:[%s3627_s1 + $0x338] sm:$0xff] }
  0x73   : > { %706 = vmatmul.f32.gmra.mxu1 %v478_v46  ;;  %868 = vmatmul.f32.gmra.mxu2 %v801_v47  ;;  %v1005_v46 = vld [vmem:[#allocation2 + $0xcf] sm:$0xff]  ;;  %v2515_v47 = vld [vmem:[%s3627_s1 + $0x440] sm:$0xff] }
  0x74   : > { %2021 = vmatpush.msra.mxu0 %v2515_v47  ;;  %v1204_v47 = vld [vmem:[#allocation2 + $0x128] sm:$0xff] }
  0x75   : > { %1062 = vmatmul.f32.gmra.mxu3 %v995_v49 }
  0x79   : > { %1256 = vmatmul.f32.gmra.mxu0 %v2972_v16  ;;  %v803_v16 = vld [vmem:[#allocation2 + $0x31] sm:$0xff] }
  0x7b   : > { %709 = vmatmul.f32.gmra.mxu1 %v994_v41  ;;  %871 = vmatmul.f32.gmra.mxu2 %v802_v53 }
  0x7d   : > { %1065 = vmatmul.f32.gmra.mxu3 %v996_v54 }
  0x81   : > { %1259 = vmatmul.f32.gmra.mxu0 %v3020_v2  ;;  %v2502_v2 = vld [vmem:[%s3627_s1 + $0x3d8] sm:$0xff] }
  0x82   : > { %1824 = vmatpush.msra.mxu3 %v2502_v2  ;;  %v2514_v2 = vld [vmem:[%s3627_s1 + $0x438] sm:$0xff] }
  0x83   : > { %712 = vmatmul.f32.gmra.mxu1 %v995_v49  ;;  %874 = vmatmul.f32.gmra.mxu2 %v803_v16 }
  0x84   : > { %1825 = vmatpush.msra.mxu3 %v2501_v8  ;;  %2022 = vmatpush.msra.mxu0 %v2514_v2 }
  0x85   : > { %1068 = vmatmul.f32.gmra.mxu3 %v997_v59 }
  0x86   : > { %1826 = vmatpush.msra.mxu3 %v2500_v22 }
  0x88   : > { %1827 = vmatpush.msra.mxu3 %v2499_v39 }
  0x89   : > { %1262 = vmatmul.f32.gmra.mxu0 %v3061_v60  ;;  %v805_v60 = vld [vmem:[#allocation2 + $0x51] sm:$0xff] }
  0x8a   : > { %1828 = vmatpush.msra.mxu3 %v2498_v58 }
  0x8b   : > { %715 = vmatmul.f32.gmra.mxu1 %v996_v54  ;;  %877 = vmatmul.f32.gmra.mxu2 %v804_v63 }
  0x8c   : > { %1829 = vmatpush.msra.mxu3 %v2497_v12 }
  0x8d   : > { %1071 = vmatmul.f32.gmra.mxu3 %v998_v6 }
  0x91   : > { %1265 = vmatmul.f32.gmra.mxu0 %v3106_v17  ;;  %v807_v17 = vld [vmem:[#allocation2 + $0x71] sm:$0xff] }
  0x93   : > { %718 = vmatmul.f32.gmra.mxu1 %v997_v59  ;;  %880 = vmatmul.f32.gmra.mxu2 %v805_v60 }
  0x95   : > { %1074 = vmatmul.f32.gmra.mxu3 %v999_v4 }
  0x99   : > { %1268 = vmatmul.f32.gmra.mxu0 %v3120_v21  ;;  %v1002_v21 = vld [vmem:[#allocation2 + $0xa7] sm:$0xff] }
  0x9b   : > { %721 = vmatmul.f32.gmra.mxu1 %v998_v6  ;;  %883 = vmatmul.f32.gmra.mxu2 %v806_v9  ;;  %v813_v6 = vld [vmem:[#allocation2 + $0xd1] sm:$0xff]  ;;  %v814_v9 = vld [vmem:[#allocation2 + $0xe9] sm:$0xff] }
  0x9d   : > { %1077 = vmatmul.f32.gmra.mxu3 %v1000_v10 }
  0xa1   : > { %1271 = vmatmul.f32.gmra.mxu0 %v2690_v13  ;;  %v2484_v13 = vld [vmem:[%s3627_s1 + $0x348] sm:$0xff] }
  0xa2   : > { %1632 = vmatpush.msra.mxu2 %v2484_v13  ;;  %v2513_v13 = vld [vmem:[%s3627_s1 + $0x430] sm:$0xff] }
  0xa3   : > { %724 = vmatmul.f32.gmra.mxu1 %v999_v4  ;;  %886 = vmatmul.f32.gmra.mxu2 %v807_v17  ;;  %v1202_v17 = vld [vmem:[#allocation2 + $0x108] sm:$0xff] }
  0xa4   : > { %1633 = vmatpush.msra.mxu2 %v2483_v38  ;;  %2023 = vmatpush.msra.mxu0 %v2513_v13  ;;  %v2480_v38 = vld [vmem:[%s3627_s1 + $0x328] sm:$0xff] }
  0xa5   : > { %1080 = vmatmul.f32.gmra.mxu3 %v1001_v62 }
  0xa6   : > { %1634 = vmatpush.msra.mxu2 %v2482_v55 }
  0xa8   : > { %v3234_v19 = vpop.f32.mrf.mxu1 }
  0xa9   : > { %1274 = vmatmul.f32.gmra.mxu0 %v2802_v51  ;;  %v2468_v51 = vld [vmem:[%s3627_s1 + $0x2c8] sm:$0xff] }
  0xaa   : > { %1437 = vmatpush.msra.mxu1 %v2468_v51 }
  0xab   : > { %727 = vmatmul.f32.gmra.mxu1 %v1000_v10  ;;  %889 = vmatmul.f32.gmra.mxu2 %v808_v20  ;;  %v2481_v10 = vld [vmem:[%s3627_s1 + $0x330] sm:$0xff] }
  0xac   : > { %1635 = vmatpush.msra.mxu2 %v2481_v10  ;;  %v815_v20 = vld [vmem:[#allocation2 + $0xf1] sm:$0xff] }
  0xad   : > { %1083 = vmatmul.f32.gmra.mxu3 %v1002_v21 }
  0xae   : > { %v3243_v24 = vpop.f32.mrf.mxu2  ;;  %v3245_v26 = vpop.f32.mrf.mxu0  ;;  %1636 = vmatpush.msra.mxu2 %v2480_v38 }
  0xb0   : > { %v3250_v27 = vpop.f32.mrf.mxu1  ;;  %v3252_v29 = vpop.f32.mrf.mxu3 }
  0xb1   : > { %1277 = vmatmul.f32.gmra.mxu0 %v2873_v23  ;;  %v1004_v23 = vld [vmem:[#allocation2 + $0xc7] sm:$0xff] }
  0xb3   : > { %730 = vmatmul.f32.gmra.mxu1 %v1001_v62  ;;  %892 = vmatmul.f32.gmra.mxu2 %v809_v30  ;;  %v1203_v30 = vld [vmem:[#allocation2 + $0x110] sm:$0xff] }
  0xb5   : > { %1086 = vmatmul.f32.gmra.mxu3 %v1003_v31 }
  0xb6   : > { %v3258_v33 = vpop.f32.mrf.mxu2  ;;  %v3260_v25 = vpop.f32.mrf.mxu0 }
  0xb8   : > { %v3262_v35 = vpop.f32.mrf.mxu1  ;;  %v3264_v36 = vpop.f32.mrf.mxu3 }
  0xb9   : > { %1280 = vmatmul.f32.gmra.mxu0 %v2909_v42  ;;  %v2467_v42 = vld [vmem:[%s3627_s1 + $0x2c0] sm:$0xff] }
  0xba   : > { %1438 = vmatpush.msra.mxu1 %v2467_v42  ;;  %v2496_v42 = vld [vmem:[%s3627_s1 + $0x3a8] sm:$0xff] }
  0xbb   : > { %733 = vmatmul.f32.gmra.mxu1 %v1002_v21  ;;  %895 = vmatmul.f32.gmra.mxu2 %v810_v37  ;;  %v1009_v21 = vld [vmem:[#allocation2 + $0x10f] sm:$0xff] }
  0xbc   : > { %v816_v37 = vld [vmem:[#allocation2 + $0x109] sm:$0xff]  ;;  %1830 = vmatpush.msra.mxu3 %v2496_v42 }
  0xbd   : > { %1089 = vmatmul.f32.gmra.mxu3 %v1004_v23 }
  0xbe   : > { %v3273_v40 = vpop.f32.mrf.mxu2  ;;  %v3275_v41 = vpop.f32.mrf.mxu0 }
  0xc0   : > { %v3280_v43 = vpop.f32.mrf.mxu1  ;;  %v3282_v44 = vpop.f32.mrf.mxu3 }
  0xc1   : > { %1283 = vmatmul.f32.gmra.mxu0 %v2954_v3  ;;  %v1006_v3 = vld [vmem:[#allocation2 + $0xe7] sm:$0xff] }
  0xc3   : > { %736 = vmatmul.f32.gmra.mxu1 %v1003_v31  ;;  %898 = vmatmul.f32.gmra.mxu2 %v811_v45 }
  0xc5   : > { %1092 = vmatmul.f32.gmra.mxu3 %v1005_v46 }
  0xc6   : > { %v3288_v49 = vpop.f32.mrf.mxu2  ;;  %v3290_v52 = vpop.f32.mrf.mxu0 }
  0xc8   : > { %v3292_v53 = vpop.f32.mrf.mxu1  ;;  %v3294_v54 = vpop.f32.mrf.mxu3 }
  0xc9   : > { %1286 = vmatmul.f32.gmra.mxu0 %v2996_v28  ;;  %v2466_v28 = vld [vmem:[%s3627_s1 + $0x2b8] sm:$0xff] }
  0xca   : > { %1439 = vmatpush.msra.mxu1 %v2466_v28  ;;  %v817_v28 = vld [vmem:[#allocation2 + $0x111] sm:$0xff] }
  0xcb   : > { %739 = vmatmul.f32.gmra.mxu1 %v1004_v23  ;;  %901 = vmatmul.f32.gmra.mxu2 %v812_v57  ;;  %v1010_v23 = vld [vmem:[#allocation2 + $0x127] sm:$0xff] }
  0xcd   : > { %1095 = vmatmul.f32.gmra.mxu3 %v1006_v3 }
  0xce   : > { %v3303_v16 = vpop.f32.mrf.mxu2  ;;  %v3305_v59 = vpop.f32.mrf.mxu0 }
  0xd0   : > { %v3310_v61 = vpop.f32.mrf.mxu1  ;;  %v3312_v63 = vpop.f32.mrf.mxu3 }
  0xd1   : > { %1289 = vmatmul.f32.gmra.mxu0 %v3043_v50  ;;  %v1008_v50 = vld [vmem:[#allocation2 + $0x107] sm:$0xff] }
  0xd3   : > { %742 = vmatmul.f32.gmra.mxu1 %v1005_v46  ;;  %904 = vmatmul.f32.gmra.mxu2 %v813_v6 }
  0xd5   : > { %1098 = vmatmul.f32.gmra.mxu3 %v1007_v0 }
  0xd6   : > { %v3318_v1 = vpop.f32.mrf.mxu2  ;;  %v3320_v60 = vpop.f32.mrf.mxu0 }
  0xd8   : > { %v3322_v4 = vpop.f32.mrf.mxu1  ;;  %v3324_v5 = vpop.f32.mrf.mxu3 }
  0xd9   : > { %1292 = vmatmul.f32.gmra.mxu0 %v3084_v7  ;;  %v2465_v7 = vld [vmem:[%s3627_s1 + $0x2b0] sm:$0xff] }
  0xda   : > { %1440 = vmatpush.msra.mxu1 %v2465_v7 }
  0xdb   : > { %745 = vmatmul.f32.gmra.mxu1 %v1006_v3  ;;  %907 = vmatmul.f32.gmra.mxu2 %v814_v9  ;;  %v2464_v3 = vld [vmem:[%s3627_s1 + $0x2a8] sm:$0xff] }
  0xdc   : > { %1441 = vmatpush.msra.mxu1 %v2464_v3  ;;  %v2512_v9 = vld [vmem:[%s3627_s1 + $0x428] sm:$0xff] }
  0xdd   : > { %1101 = vmatmul.f32.gmra.mxu3 %v1008_v50  ;;  %2024 = vmatpush.msra.mxu0 %v2512_v9 }
  0xde   : > { %v3333_v8 = vpop.f32.mrf.mxu2  ;;  %v3335_v15 = vpop.f32.mrf.mxu0 }
  0xe0   : > { %v3340_v62 = vpop.f32.mrf.mxu1  ;;  %v3342_v18 = vpop.f32.mrf.mxu3 }
  0xe1   : > { %1295 = vmatmul.f32.gmra.mxu0 %v1202_v17 }
  0xe3   : > { %748 = vmatmul.f32.gmra.mxu1 %v1007_v0  ;;  %910 = vmatmul.f32.gmra.mxu2 %v815_v20  ;;  %v818_v20 = vld [vmem:[#allocation2 + $0x129] sm:$0xff] }
  0xe5   : > { %1104 = vmatmul.f32.gmra.mxu3 %v1009_v21 }
  0xe6   : > { %v3347_v22 = vpop.f32.mrf.mxu2  ;;  %v3349_v51 = vpop.f32.mrf.mxu0 }
  0xe8   : > { %v3351_v31 = vpop.f32.mrf.mxu3  ;;  %v704_v32 = vpop.f32.mrf.mxu1 }
  0xe9   : > { %1298 = vmatmul.f32.gmra.mxu0 %v1203_v30  ;;  %v705_v39 = vadd.f32 %v704_v32, %v3245_v26  ;;  %v1011_v26 = vld [vmem:[#allocation2 + $0x12f] sm:$0xff]  ;;  %v1012_v30 = vld [vmem:[#allocation2 + $0x147] sm:$0xff] }
  0xeb   : > { %751 = vmatmul.f32.gmra.mxu1 %v1008_v50  ;;  %913 = vmatmul.f32.gmra.mxu2 %v816_v37  ;;  %v2495_v37 = vld [vmem:[%s3627_s1 + $0x3a0] sm:$0xff] }
  0xec   : > { %1831 = vmatpush.msra.mxu3 %v2495_v37 }
  0xed   : > { %1107 = vmatmul.f32.gmra.mxu3 %v1010_v23 }
  0xee   : > { %v866_v45 = vpop.f32.mrf.mxu2  ;;  %v1254_v46 = vpop.f32.mrf.mxu0 }
  0xef   : > { %v962_v57 = vadd.f32 %v866_v45, %v705_v39 }
  0xf0   : > { %v707_v55 = vpop.f32.mrf.mxu1  ;;  %v1060_v58 = vpop.f32.mrf.mxu3 }
  0xf1   : > { %v1156_v6 = vadd.f32 %v1060_v58, %v962_v57  ;;  %1301 = vmatmul.f32.gmra.mxu0 %v1204_v47  ;;  %v708_v2 = vadd.f32 %v707_v55, %v3260_v25  ;;  %v2479_v25 = vld [vmem:[%s3627_s1 + $0x320] sm:$0xff] }
  0xf2   : > { %1637 = vmatpush.msra.mxu2 %v2479_v25  ;;  %v2511_v55 = vld [vmem:[%s3627_s1 + $0x420] sm:$0xff] }
  0xf3   : > { %v3363_v0 = vadd.f32 %v1254_v46, %v1156_v6  ;;  %754 = vmatmul.f32.gmra.mxu1 %v1009_v21  ;;  %916 = vmatmul.f32.gmra.mxu2 %v817_v28  ;;  %v819_v46 = vld [vmem:[#allocation2 + $0x131] sm:$0xff] }
  0xf4   : > { %2025 = vmatpush.msra.mxu0 %v2511_v55  ;;  %v1016_v55 = vld [vmem:[#allocation2 + $0x187] sm:$0xff] }
  0xf5   : > { %1110 = vmatmul.f32.gmra.mxu3 %v1011_v26 }
  0xf6   : > { %v869_v50 = vpop.f32.mrf.mxu2  ;;  %v1257_v10 = vpop.f32.mrf.mxu0 }
  0xf7   : > { %v963_v12 = vadd.f32 %v869_v50, %v708_v2  ;;  %v820_v50 = vld [vmem:[#allocation2 + $0x149] sm:$0xff] }
  0xf8   : > { %v710_v17 = vpop.f32.mrf.mxu1  ;;  %v1063_v7 = vpop.f32.mrf.mxu3 }
  0xf9   : > { %v1157_v13 = vadd.f32 %v1063_v7, %v963_v12  ;;  %1304 = vmatmul.f32.gmra.mxu0 %v2920_v48  ;;  %v711_v32 = vadd.f32 %v710_v17, %v3275_v41  ;;  %v1013_v41 = vld [vmem:[#allocation2 + $0x14f] sm:$0xff]  ;;  %v2494_v17 = vld [vmem:[%s3627_s1 + $0x398] sm:$0xff] }
  0xfa   : > { %1832 = vmatpush.msra.mxu3 %v2494_v17 }
  0xfb   : > { %v3370_v21 = vadd.f32 %v1257_v10, %v1157_v13  ;;  %757 = vmatmul.f32.gmra.mxu1 %v1010_v23  ;;  %919 = vmatmul.f32.gmra.mxu2 %v818_v20  ;;  %v2463_v23 = vld [vmem:[%s3627_s1 + $0x2a0] sm:$0xff]  ;;  %v2462_v13 = vld [vmem:[%s3627_s1 + $0x298] sm:$0xff] }
  0xfc   : > { %1442 = vmatpush.msra.mxu1 %v2463_v23  ;;  %v1014_v10 = vld [vmem:[#allocation2 + $0x167] sm:$0xff] }
  0xfd   : > { %1113 = vmatmul.f32.gmra.mxu3 %v1012_v30 }
  0xfe   : > { %v872_v38 = vpop.f32.mrf.mxu2  ;;  %v1260_v39 = vpop.f32.mrf.mxu0  ;;  %1443 = vmatpush.msra.mxu1 %v2462_v13 }
  0xff   : > { %v964_v48 = vadd.f32 %v872_v38, %v711_v32  ;;  %v821_v32 = vld [vmem:[#allocation2 + $0x151] sm:$0xff] }
 0x100   : > { %v713_v42 = vpop.f32.mrf.mxu1  ;;  %v1066_v45 = vpop.f32.mrf.mxu3 }
 0x101   : > { %v1158_v47 = vadd.f32 %v1066_v45, %v964_v48  ;;  %1307 = vmatmul.f32.gmra.mxu0 %v2965_v11  ;;  %v714_v3 = vadd.f32 %v713_v42, %v3290_v52  ;;  %v2478_v52 = vld [vmem:[%s3627_s1 + $0x318] sm:$0xff] }
 0x102   : > { %1638 = vmatpush.msra.mxu2 %v2478_v52  ;;  %v2510_v48 = vld [vmem:[%s3627_s1 + $0x418] sm:$0xff] }
 0x103   : > { %v3383_v57 = vadd.f32 %v1260_v39, %v1158_v47  ;;  %760 = vmatmul.f32.gmra.mxu1 %v1011_v26  ;;  %922 = vmatmul.f32.gmra.mxu2 %v819_v46  ;;  %v823_v52 = vld [vmem:[#allocation2 + $0x171] sm:$0xff] }
 0x104   : > { %2026 = vmatpush.msra.mxu0 %v2510_v48 }
 0x105   : > { %1116 = vmatmul.f32.gmra.mxu3 %v1013_v41 }
 0x106   : > { %v875_v58 = vpop.f32.mrf.mxu2  ;;  %v1263_v28 = vpop.f32.mrf.mxu0 }
 0x107   : > { %v965_v6 = vadd.f32 %v875_v58, %v714_v3  ;;  %v822_v3 = vld [vmem:[#allocation2 + $0x169] sm:$0xff] }
 0x108   : > { %v716_v2 = vpop.f32.mrf.mxu1  ;;  %v1069_v9 = vpop.f32.mrf.mxu3 }
 0x109   : > { %v1159_v11 = vadd.f32 %v1069_v9, %v965_v6  ;;  %1310 = vmatmul.f32.gmra.mxu0 %v3009_v34  ;;  %v717_v12 = vadd.f32 %v716_v2, %v3305_v59  ;;  %v1015_v59 = vld [vmem:[#allocation2 + $0x16f] sm:$0xff] }
 0x10b   : > { %v3390_v26 = vadd.f32 %v1263_v28, %v1159_v11  ;;  %763 = vmatmul.f32.gmra.mxu1 %v1012_v30  ;;  %925 = vmatmul.f32.gmra.mxu2 %v820_v50  ;;  %v2493_v28 = vld [vmem:[%s3627_s1 + $0x390] sm:$0xff] }
 0x10c   : > { %1833 = vmatpush.msra.mxu3 %v2493_v28  ;;  %v2461_v50 = vld [vmem:[%s3627_s1 + $0x290] sm:$0xff] }
 0x10d   : > { %1119 = vmatmul.f32.gmra.mxu3 %v1014_v10  ;;  %1444 = vmatpush.msra.mxu1 %v2461_v50 }
 0x10e   : > { %v878_v7 = vpop.f32.mrf.mxu2  ;;  %v1266_v20 = vpop.f32.mrf.mxu0 }
 0x10f   : > { %v966_v34 = vadd.f32 %v878_v7, %v717_v12 }
 0x110   : > { %v719_v30 = vpop.f32.mrf.mxu1  ;;  %v1072_v25 = vpop.f32.mrf.mxu3 }
 0x111   : > { %v1160_v37 = vadd.f32 %v1072_v25, %v966_v34  ;;  %1313 = vmatmul.f32.gmra.mxu0 %v3052_v56  ;;  %v720_v39 = vadd.f32 %v719_v30, %v3320_v60  ;;  %v2477_v60 = vld [vmem:[%s3627_s1 + $0x310] sm:$0xff] }
 0x112   : > { %1639 = vmatpush.msra.mxu2 %v2477_v60  ;;  %v1211_v30 = vld [vmem:[#allocation2 + $0x190] sm:$0xff] }
 0x113   : > { %v3403_v38 = vadd.f32 %v1266_v20, %v1160_v37  ;;  %766 = vmatmul.f32.gmra.mxu1 %v1013_v41  ;;  %928 = vmatmul.f32.gmra.mxu2 %v821_v32  ;;  %v2509_v20 = vld [vmem:[%s3627_s1 + $0x410] sm:$0xff] }
 0x114   : > { %2027 = vmatpush.msra.mxu0 %v2509_v20 }
 0x115   : > { %1122 = vmatmul.f32.gmra.mxu3 %v1015_v59 }
 0x116   : > { %v881_v23 = vpop.f32.mrf.mxu2  ;;  %v1269_v42 = vpop.f32.mrf.mxu0 }
 0x117   : > { %v967_v45 = vadd.f32 %v881_v23, %v720_v39  ;;  %v824_v39 = vld [vmem:[#allocation2 + $0x189] sm:$0xff] }
 0x118   : > { %v722_v46 = vpop.f32.mrf.mxu1  ;;  %v1075_v47 = vpop.f32.mrf.mxu3 }
 0x119   : > { %v1161_v56 = vadd.f32 %v1075_v47, %v967_v45  ;;  %1316 = vmatmul.f32.gmra.mxu0 %v3095_v14  ;;  %v723_v58 = vadd.f32 %v722_v46, %v3335_v15  ;;  %v1210_v14 = vld [vmem:[#allocation2 + $0x188] sm:$0xff] }
 0x11a   : > { %v1017_v15 = vld [vmem:[#allocation2 + $0x18f] sm:$0xff] }
 0x11b   : > { %v3410_v41 = vadd.f32 %v1269_v42, %v1161_v56  ;;  %769 = vmatmul.f32.gmra.mxu1 %v1014_v10  ;;  %931 = vmatmul.f32.gmra.mxu2 %v822_v3  ;;  %v2492_v45 = vld [vmem:[%s3627_s1 + $0x388] sm:$0xff]  ;;  %v266_v56 = vld [vmem:[%s2663_s8 + $0xf0] sm:$0xff] }
 0x11c   : > { %v1212_v3 = vld [vmem:[#allocation2 + $0x1a8] sm:$0xff]  ;;  %1834 = vmatpush.msra.mxu3 %v2492_v45  ;;  %v2475_v45 = vld [vmem:[%s3627_s1 + $0x300] sm:$0xff] }
 0x11d   : > { %1125 = vmatmul.f32.gmra.mxu3 %v1016_v55 }
 0x11e   : > { %v884_v6 = vpop.f32.mrf.mxu2  ;;  %v1272_v2 = vpop.f32.mrf.mxu0 }
 0x11f   : > { %v968_v9 = vadd.f32 %v884_v6, %v723_v58  ;;  %v2586_v58 = vld [vmem:[%s3628_s2] ss:$0 sm:$0xff] }
 0x120   : > { %v725_v11 = vpop.f32.mrf.mxu1  ;;  %v1078_v10 = vpop.f32.mrf.mxu3 }
 0x121   : > { %v1162_v12 = vadd.f32 %v1078_v10, %v968_v9  ;;  %1319 = vmatmul.f32.gmra.mxu0 %v1210_v14  ;;  %v726_v7 = vadd.f32 %v725_v11, %v3349_v51  ;;  %v2476_v51 = vld [vmem:[%s3627_s1 + $0x308] sm:$0xff]  ;;  %v2587_v9 = vld [vmem:[%s3629_s3] ss:$0 sm:$0xff] }
 0x122   : > { %1640 = vmatpush.msra.mxu2 %v2476_v51  ;;  %v1019_v11 = vld [vmem:[#allocation2 + $0x1af] sm:$0xff]  ;;  %v1020_v51 = vld [vmem:[#allocation2 + $0x1c7] sm:$0xff] }
 0x123   : > { %v3422_v17 = vadd.f32 %v1272_v2, %v1162_v12  ;;  %772 = vmatmul.f32.gmra.mxu1 %v1015_v59  ;;  %934 = vmatmul.f32.gmra.mxu2 %v823_v52  ;;  %v1018_v59 = vld [vmem:[#allocation2 + $0x1a7] sm:$0xff]  ;;  %v825_v2 = vld [vmem:[#allocation2 + $0x191] sm:$0xff] }
 0x124   : > { %1641 = vmatpush.msra.mxu2 %v2475_v45  ;;  %v1216_v45 = vld [vmem:[#allocation2 + $0x1e8] sm:$0xff] }
 0x125   : > { %1128 = vmatmul.f32.gmra.mxu3 %v1017_v15 }
 0x126   : > { %v887_v34 = vpop.f32.mrf.mxu2  ;;  %v1275_v13 = vpop.f32.mrf.mxu0 }
 0x127   : > { %v969_v25 = vadd.f32 %v887_v34, %v726_v7  ;;  %v2508_v7 = vld [vmem:[%s3627_s1 + $0x408] sm:$0xff] }
 0x128   : > { %v728_v32 = vpop.f32.mrf.mxu1  ;;  %v1081_v37 = vpop.f32.mrf.mxu3  ;;  %2028 = vmatpush.msra.mxu0 %v2508_v7 }
 0x129   : > { %v1163_v48 = vadd.f32 %v1081_v37, %v969_v25  ;;  %1322 = vmatmul.f32.gmra.mxu0 %v1211_v30  ;;  %v729_v42 = vadd.f32 %v728_v32, %v3234_v19  ;;  %v302_v19 = vmul.f32 %v2586_v58, %v266_v56  ;;  %v267_v30 = vld [vmem:[%s2663_s8 + $0xf8] sm:$0xff] }
 0x12b   : > { %v3428_v23 = vadd.f32 %v1275_v13, %v1163_v48  ;;  %775 = vmatmul.f32.gmra.mxu1 %v1016_v55  ;;  %937 = vmatmul.f32.gmra.mxu2 %v824_v39  ;;  %v2460_v55 = vld [vmem:[%s3627_s1 + $0x288] sm:$0xff]  ;;  %v3447_v50 = vadd.f32 %v2587_v9, %v302_v19  ;;  %v1213_v13 = vld [vmem:[#allocation2 + $0x1b0] sm:$0xff] }
 0x12c   : > { %1445 = vmatpush.msra.mxu1 %v2460_v55  ;;  %v826_v39 = vld [vmem:[#allocation2 + $0x1a9] sm:$0xff] }
 0x12d   : > { %1131 = vmatmul.f32.gmra.mxu3 %v1018_v59  ;;  %v370_v52 = vmax.f32 %v3447_v50, 0.0  ;;  %v1771_v50 = vld [vmem:[#allocation2 + $0x48] sm:$0xff] }
 0x12e   : > { %v890_v46 = vpop.f32.mrf.mxu2  ;;  %v1278_v47 = vpop.f32.mrf.mxu0 }
 0x12f   : > { %v970_v60 = vadd.f32 %v890_v46, %v729_v42  ;;  %475 = vst [vmem:[#allocation2 + $0x208] sm:$0xff] %v370_v52 }
 0x130   : > { %v731_v28 = vpop.f32.mrf.mxu1  ;;  %v1084_v6 = vpop.f32.mrf.mxu3 }
 0x131   : > { %v1164_v14 = vadd.f32 %v1084_v6, %v970_v60  ;;  %1325 = vmatmul.f32.gmra.mxu0 %v1212_v3  ;;  %v732_v12 = vadd.f32 %v731_v28, %v3250_v27  ;;  %v2491_v3 = vld [vmem:[%s3627_s1 + $0x380] sm:$0xff]  ;;  %v1214_v60 = vld [vmem:[#allocation2 + $0x1c8] sm:$0xff] }
 0x132   : > { %1835 = vmatpush.msra.mxu3 %v2491_v3 }
 0x133   : > { %v3449_v10 = vadd.f32 %v1278_v47, %v1164_v14  ;;  %778 = vmatmul.f32.gmra.mxu1 %v1017_v15  ;;  %940 = vmatmul.f32.gmra.mxu2 %v825_v2  ;;  %v303_v15 = vmul.f32 %v2586_v58, %v267_v30  ;;  %v2459_v58 = vld [vmem:[%s3627_s1 + $0x280] sm:$0xff]  ;;  %v1021_v2 = vld [vmem:[#allocation2 + $0x1cf] sm:$0xff] }
 0x134   : > { %1446 = vmatpush.msra.mxu1 %v2459_v58 }
 0x135   : > { %1134 = vmatmul.f32.gmra.mxu3 %v1019_v11  ;;  %v3459_v27 = vadd.f32 %v2587_v9, %v303_v15  ;;  %v828_v15 = vld [vmem:[#allocation2 + $0x1c9] sm:$0xff] }
 0x136   : > { %v893_v20 = vpop.f32.mrf.mxu2  ;;  %v1281_v34 = vpop.f32.mrf.mxu0 }
 0x137   : > { %v971_v25 = vadd.f32 %v893_v20, %v732_v12  ;;  %v371_v46 = vmax.f32 %v3459_v27, 0.0  ;;  %v2507_v12 = vld [vmem:[%s3627_s1 + $0x400] sm:$0xff]  ;;  %v1772_v27 = vld [vmem:[#allocation2 + $0x50] sm:$0xff] }
 0x138   : > { %v734_v32 = vpop.f32.mrf.mxu1  ;;  %v1087_v37 = vpop.f32.mrf.mxu3  ;;  %2029 = vmatpush.msra.mxu0 %v2507_v12  ;;  %v830_v12 = vld [vmem:[#allocation2 + $0x1e9] sm:$0xff] }
 0x139   : > { %v1165_v48 = vadd.f32 %v1087_v37, %v971_v25  ;;  %1328 = vmatmul.f32.gmra.mxu0 %v1213_v13  ;;  %v735_v47 = vadd.f32 %v734_v32, %v3262_v35  ;;  %476 = vst [vmem:[#allocation2 + $0x210] sm:$0xff] %v371_v46  ;;  %v827_v35 = vld [vmem:[#allocation2 + $0x1b1] sm:$0xff]  ;;  %v1022_v37 = vld [vmem:[#allocation2 + $0x1e7] sm:$0xff] }
 0x13b   : > { %v3461_v42 = vadd.f32 %v1281_v34, %v1165_v48  ;;  %781 = vmatmul.f32.gmra.mxu1 %v1018_v59  ;;  %943 = vmatmul.f32.gmra.mxu2 %v826_v39  ;;  %v1215_v34 = vld [vmem:[#allocation2 + $0x1d0] sm:$0xff] }
 0x13d   : > { %1137 = vmatmul.f32.gmra.mxu3 %v1020_v51 }
 0x13e   : > { %v896_v56 = vpop.f32.mrf.mxu2  ;;  %v1284_v59 = vpop.f32.mrf.mxu0 }
 0x13f   : > { %v972_v55 = vadd.f32 %v896_v56, %v735_v47 }
 0x140   : > { %v737_v19 = vpop.f32.mrf.mxu1  ;;  %v1090_v28 = vpop.f32.mrf.mxu3 }
 0x141   : > { %v1166_v6 = vadd.f32 %v1090_v28, %v972_v55  ;;  %1331 = vmatmul.f32.gmra.mxu0 %v1214_v60  ;;  %v738_v9 = vadd.f32 %v737_v19, %v3280_v43  ;;  %v1023_v55 = vld [vmem:[#allocation2 + $0x1ef] sm:$0xff] }
 0x142   : > { %v1217_v28 = vld [vmem:[#allocation2 + $0x1f0] sm:$0xff] }
 0x143   : > { %v3476_v14 = vadd.f32 %v1284_v59, %v1166_v6  ;;  %784 = vmatmul.f32.gmra.mxu1 %v1019_v11  ;;  %946 = vmatmul.f32.gmra.mxu2 %v827_v35  ;;  %v829_v59 = vld [vmem:[#allocation2 + $0x1d1] sm:$0xff] }
 0x145   : > { %1140 = vmatmul.f32.gmra.mxu3 %v1021_v2 }
 0x146   : > { %v899_v7 = vpop.f32.mrf.mxu2  ;;  %v1287_v20 = vpop.f32.mrf.mxu0 }
 0x147   : > { %v973_v13 = vadd.f32 %v899_v7, %v738_v9 }
 0x148   : > { %v740_v30 = vpop.f32.mrf.mxu1  ;;  %v1093_v25 = vpop.f32.mrf.mxu3 }
 0x149   : > { %v1167_v32 = vadd.f32 %v1093_v25, %v973_v13  ;;  %1334 = vmatmul.f32.gmra.mxu0 %v1215_v34  ;;  %v741_v43 = vadd.f32 %v740_v30, %v3292_v53 }
 0x14b   : > { %v3482_v11 = vadd.f32 %v1287_v20, %v1167_v32  ;;  %787 = vmatmul.f32.gmra.mxu1 %v1020_v51  ;;  %949 = vmatmul.f32.gmra.mxu2 %v828_v15  ;;  %v1024_v20 = vld [vmem:[#allocation2 + $0x207] sm:$0xff]  ;;  %v831_v32 = vld [vmem:[#allocation2 + $0x1f1] sm:$0xff] }
 0x14d   : > { %1143 = vmatmul.f32.gmra.mxu3 %v1022_v37 }
 0x14e   : > { %v902_v39 = vpop.f32.mrf.mxu2  ;;  %v1290_v48 = vpop.f32.mrf.mxu0 }
 0x14f   : > { %v974_v47 = vadd.f32 %v902_v39, %v741_v43  ;;  %v1025_v39 = vld [vmem:[#allocation2 + $0x20f] sm:$0xff] }
 0x150   : > { %v743_v3 = vpop.f32.mrf.mxu1  ;;  %v1096_v56 = vpop.f32.mrf.mxu3 }
 0x151   : > { %v1168_v60 = vadd.f32 %v1096_v56, %v974_v47  ;;  %1337 = vmatmul.f32.gmra.mxu0 %v1216_v45  ;;  %v744_v51 = vadd.f32 %v743_v3, %v3310_v61 }
 0x153   : > { %v3485_v58 = vadd.f32 %v1290_v48, %v1168_v60  ;;  %790 = vmatmul.f32.gmra.mxu1 %v1021_v2  ;;  %952 = vmatmul.f32.gmra.mxu2 %v829_v59  ;;  %v1382_v59 = vld [vmem:[#allocation2 + $0x29] sm:$0xff] }
 0x154   : > { %v1577_v60 = vld [vmem:[#allocation2 + $0x47] sm:$0xff] }
 0x155   : > { %1146 = vmatmul.f32.gmra.mxu3 %v1023_v55 }
 0x156   : > { %v905_v19 = vpop.f32.mrf.mxu2  ;;  %v1293_v53 = vpop.f32.mrf.mxu0 }
 0x157   : > { %v975_v35 = vadd.f32 %v905_v19, %v744_v51 }
 0x158   : > { %v746_v6 = vpop.f32.mrf.mxu1  ;;  %v1099_v9 = vpop.f32.mrf.mxu3 }
 0x159   : > { %v1169_v7 = vadd.f32 %v1099_v9, %v975_v35  ;;  %1340 = vmatmul.f32.gmra.mxu0 %v1217_v28  ;;  %v747_v2 = vadd.f32 %v746_v6, %v3322_v4  ;;  %v1383_v9 = vld [vmem:[#allocation2 + $0x31] sm:$0xff] }
 0x15b   : > { %v3488_v34 = vadd.f32 %v1293_v53, %v1169_v7  ;;  %793 = vmatmul.f32.gmra.mxu1 %v1022_v37  ;;  %955 = vmatmul.f32.gmra.mxu2 %v830_v12  ;;  %v1965_v53 = vld [vmem:[#allocation2 + $0x49] sm:$0xff] }
 0x15c   : > { %v1578_v12 = vld [vmem:[#allocation2 + $0x4f] sm:$0xff] }
 0x15d   : > { %1149 = vmatmul.f32.gmra.mxu3 %v1024_v20 }
 0x15e   : > { %v908_v13 = vpop.f32.mrf.mxu2  ;;  %v1296_v61 = vpop.f32.mrf.mxu0 }
 0x15f   : > { %v976_v30 = vadd.f32 %v908_v13, %v747_v2  ;;  %v1966_v13 = vld [vmem:[#allocation2 + $0x51] sm:$0xff] }
 0x160   : > { %v749_v25 = vpop.f32.mrf.mxu1  ;;  %v1102_v15 = vpop.f32.mrf.mxu3 }
 0x161   : > { %v1170_v43 = vadd.f32 %v1102_v15, %v976_v30  ;;  %1343 = vmatmul.f32.gmra.mxu0 %v370_v52  ;;  %v750_v37 = vadd.f32 %v749_v25, %v3340_v62  ;;  %v1579_v15 = vld [vmem:[#allocation2 + $0x67] sm:$0xff] }
 0x163   : > { %v3493_v48 = vadd.f32 %v1296_v61, %v1170_v43  ;;  %796 = vmatmul.f32.gmra.mxu1 %v1023_v55  ;;  %958 = vmatmul.f32.gmra.mxu2 %v831_v32  ;;  %v1773_v43 = vld [vmem:[#allocation2 + $0x68] sm:$0xff] }
 0x165   : > { %1152 = vmatmul.f32.gmra.mxu3 %v1025_v39 }
 0x166   : > { %v911_v4 = vpop.f32.mrf.mxu2  ;;  %v1299_v45 = vpop.f32.mrf.mxu0 }
 0x167   : > { %v977_v47 = vadd.f32 %v911_v4, %v750_v37 }
 0x168   : > { %v752_v3 = vpop.f32.mrf.mxu1  ;;  %v1105_v56 = vpop.f32.mrf.mxu3 }
 0x169   : > { %v1171_v51 = vadd.f32 %v1105_v56, %v977_v47  ;;  %1346 = vmatmul.f32.gmra.mxu0 %v371_v46  ;;  %v753_v55 = vadd.f32 %v752_v3, %v3243_v24 }
 0x16b   : > { %v3498_v52 = vadd.f32 %v1299_v45, %v1171_v51  ;;  %1447 = vmatmul.f32.vlgmr.msra.gmra.mxu1 %v1382_v59  ;;  %1642 = vmatmul.f32.vlgmr.msra.gmra.mxu2 %v1577_v60  ;;  %v1967_v45 = vld [vmem:[#allocation2 + $0x69] sm:$0xff] }
 0x16c   : > { %v1580_v59 = vld [vmem:[#allocation2 + $0x6f] sm:$0xff] }
 0x16d   : > { %1836 = vmatmul.f32.vlgmr.msra.gmra.mxu3 %v1771_v50  ;;  %v1774_v51 = vld [vmem:[#allocation2 + $0x70] sm:$0xff] }
 0x16e   : > { %v914_v62 = vpop.f32.mrf.mxu2  ;;  %v1302_v19 = vpop.f32.mrf.mxu0 }
 0x16f   : > { %v978_v28 = vadd.f32 %v914_v62, %v753_v55 }
 0x170   : > { %v755_v35 = vpop.f32.mrf.mxu1  ;;  %v1108_v6 = vpop.f32.mrf.mxu3 }
 0x171   : > { %v1172_v7 = vadd.f32 %v1108_v6, %v978_v28  ;;  %2030 = vmatmul.f32.vlgmr.msra.gmra.mxu0 %v1965_v53  ;;  %v756_v20 = vadd.f32 %v755_v35, %v3258_v33  ;;  %v1581_v6 = vld [vmem:[#allocation2 + $0x87] sm:$0xff] }
 0x173   : > { %v3501_v46 = vadd.f32 %v1302_v19, %v1172_v7  ;;  %1450 = vmatmul.f32.gmra.mxu1 %v1383_v9  ;;  %1645 = vmatmul.f32.gmra.mxu2 %v1578_v12  ;;  %v1968_v19 = vld [vmem:[#allocation2 + $0x71] sm:$0xff]  ;;  %v1775_v12 = vld [vmem:[#allocation2 + $0x88] sm:$0xff] }
 0x175   : > { %1839 = vmatmul.f32.gmra.mxu3 %v1772_v27 }
 0x176   : > { %v917_v24 = vpop.f32.mrf.mxu2  ;;  %v1305_v2 = vpop.f32.mrf.mxu0 }
 0x177   : > { %v979_v61 = vadd.f32 %v917_v24, %v756_v20  ;;  %v1969_v24 = vld [vmem:[#allocation2 + $0x89] sm:$0xff] }
 0x178   : > { %v758_v30 = vpop.f32.mrf.mxu1  ;;  %v1111_v25 = vpop.f32.mrf.mxu3 }
 0x179   : > { %v1173_v32 = vadd.f32 %v1111_v25, %v979_v61  ;;  %2033 = vmatmul.f32.gmra.mxu0 %v1966_v13  ;;  %v759_v37 = vadd.f32 %v758_v30, %v3273_v40  ;;  %v1582_v30 = vld [vmem:[#allocation2 + $0x8f] sm:$0xff] }
 0x17b   : > { %v3504_v39 = vadd.f32 %v1305_v2, %v1173_v32  ;;  %1453 = vmatmul.f32.gmra.mxu1 %v1965_v53  ;;  %1648 = vmatmul.f32.gmra.mxu2 %v1579_v15  ;;  %v1776_v15 = vld [vmem:[#allocation2 + $0x90] sm:$0xff] }
 0x17d   : > { %1842 = vmatmul.f32.gmra.mxu3 %v1773_v43 }
 0x17e   : > { %v920_v4 = vpop.f32.mrf.mxu2  ;;  %v1308_v33 = vpop.f32.mrf.mxu0 }
 0x17f   : > { %v980_v47 = vadd.f32 %v920_v4, %v759_v37  ;;  %v1970_v4 = vld [vmem:[#allocation2 + $0x91] sm:$0xff] }
 0x180   : > { %v761_v3 = vpop.f32.mrf.mxu1  ;;  %v1114_v56 = vpop.f32.mrf.mxu3 }
 0x181   : > { %v1174_v60 = vadd.f32 %v1114_v56, %v980_v47  ;;  %2036 = vmatmul.f32.gmra.mxu0 %v1967_v45  ;;  %v762_v55 = vadd.f32 %v761_v3, %v3288_v49  ;;  %v1583_v3 = vld [vmem:[#allocation2 + $0xa7] sm:$0xff] }
 0x183   : > { %v3507_v50 = vadd.f32 %v1308_v33, %v1174_v60  ;;  %1456 = vmatmul.f32.gmra.mxu1 %v1966_v13  ;;  %1651 = vmatmul.f32.gmra.mxu2 %v1580_v59  ;;  %v1777_v59 = vld [vmem:[#allocation2 + $0xa8] sm:$0xff] }
 0x185   : > { %1845 = vmatmul.f32.gmra.mxu3 %v1774_v51 }
 0x186   : > { %v923_v62 = vpop.f32.mrf.mxu2  ;;  %v1311_v40 = vpop.f32.mrf.mxu0 }
 0x187   : > { %v981_v53 = vadd.f32 %v923_v62, %v762_v55  ;;  %v1971_v62 = vld [vmem:[#allocation2 + $0xa9] sm:$0xff] }
 0x188   : > { %v764_v28 = vpop.f32.mrf.mxu1  ;;  %v1117_v35 = vpop.f32.mrf.mxu3 }
 0x189   : > { %v1175_v9 = vadd.f32 %v1117_v35, %v981_v53  ;;  %2039 = vmatmul.f32.gmra.mxu0 %v1968_v19  ;;  %v765_v27 = vadd.f32 %v764_v28, %v3303_v16  ;;  %v1584_v28 = vld [vmem:[#allocation2 + $0xaf] sm:$0xff] }
 0x18b   : > { %v3510_v7 = vadd.f32 %v1311_v40, %v1175_v9  ;;  %1459 = vmatmul.f32.gmra.mxu1 %v1967_v45  ;;  %1654 = vmatmul.f32.gmra.mxu2 %v1581_v6  ;;  %v1778_v6 = vld [vmem:[#allocation2 + $0xb0] sm:$0xff] }
 0x18d   : > { %1848 = vmatmul.f32.gmra.mxu3 %v1775_v12 }
 0x18e   : > { %v926_v20 = vpop.f32.mrf.mxu2  ;;  %v1314_v49 = vpop.f32.mrf.mxu0 }
 0x18f   : > { %v982_v2 = vadd.f32 %v926_v20, %v765_v27  ;;  %v1972_v20 = vld [vmem:[#allocation2 + $0xb1] sm:$0xff] }
 0x190   : > { %v767_v13 = vpop.f32.mrf.mxu1  ;;  %v1120_v61 = vpop.f32.mrf.mxu3 }
 0x191   : > { %v1176_v25 = vadd.f32 %v1120_v61, %v982_v2  ;;  %2042 = vmatmul.f32.gmra.mxu0 %v1969_v24  ;;  %v768_v43 = vadd.f32 %v767_v13, %v3318_v1  ;;  %v1585_v13 = vld [vmem:[#allocation2 + $0xc7] sm:$0xff] }
 0x193   : > { %v3513_v32 = vadd.f32 %v1314_v49, %v1176_v25  ;;  %1462 = vmatmul.f32.gmra.mxu1 %v1968_v19  ;;  %1657 = vmatmul.f32.gmra.mxu2 %v1582_v30  ;;  %v1779_v30 = vld [vmem:[#allocation2 + $0xc8] sm:$0xff] }
 0x195   : > { %1851 = vmatmul.f32.gmra.mxu3 %v1776_v15 }
 0x196   : > { %v929_v37 = vpop.f32.mrf.mxu2  ;;  %v1317_v16 = vpop.f32.mrf.mxu0 }
 0x197   : > { %v983_v33 = vadd.f32 %v929_v37, %v768_v43  ;;  %v1973_v37 = vld [vmem:[#allocation2 + $0xc9] sm:$0xff] }
 0x198   : > { %v770_v45 = vpop.f32.mrf.mxu1  ;;  %v1123_v47 = vpop.f32.mrf.mxu3 }
 0x199   : > { %v1177_v56 = vadd.f32 %v1123_v47, %v983_v33  ;;  %2045 = vmatmul.f32.gmra.mxu0 %v1970_v4  ;;  %v771_v51 = vadd.f32 %v770_v45, %v3333_v8  ;;  %v1586_v45 = vld [vmem:[#allocation2 + $0xcf] sm:$0xff] }
 0x19b   : > { %v3516_v60 = vadd.f32 %v1317_v16, %v1177_v56  ;;  %1465 = vmatmul.f32.gmra.mxu1 %v1969_v24  ;;  %1660 = vmatmul.f32.gmra.mxu2 %v1583_v3  ;;  %v1780_v3 = vld [vmem:[#allocation2 + $0xd0] sm:$0xff] }
 0x19d   : > { %1854 = vmatmul.f32.gmra.mxu3 %v1777_v59 }
 0x19e   : > { %v932_v55 = vpop.f32.mrf.mxu2  ;;  %v1320_v1 = vpop.f32.mrf.mxu0 }
 0x19f   : > { %v984_v40 = vadd.f32 %v932_v55, %v771_v51  ;;  %v1974_v55 = vld [vmem:[#allocation2 + $0xd1] sm:$0xff] }
 0x1a0   : > { %v773_v19 = vpop.f32.mrf.mxu1  ;;  %v1126_v53 = vpop.f32.mrf.mxu3 }
 0x1a1   : > { %v1178_v35 = vadd.f32 %v1126_v53, %v984_v40  ;;  %2048 = vmatmul.f32.gmra.mxu0 %v1971_v62  ;;  %v774_v12 = vadd.f32 %v773_v19, %v3347_v22  ;;  %v1587_v19 = vld [vmem:[#allocation2 + $0xe7] sm:$0xff] }
 0x1a3   : > { %v3519_v9 = vadd.f32 %v1320_v1, %v1178_v35  ;;  %1468 = vmatmul.f32.gmra.mxu1 %v1970_v4  ;;  %1663 = vmatmul.f32.gmra.mxu2 %v1584_v28  ;;  %v1781_v28 = vld [vmem:[#allocation2 + $0xe8] sm:$0xff] }
 0x1a5   : > { %1857 = vmatmul.f32.gmra.mxu3 %v1778_v6 }
 0x1a6   : > { %v935_v27 = vpop.f32.mrf.mxu2  ;;  %v1323_v8 = vpop.f32.mrf.mxu0 }
 0x1a7   : > { %v985_v49 = vadd.f32 %v935_v27, %v774_v12  ;;  %v1975_v27 = vld [vmem:[#allocation2 + $0xe9] sm:$0xff] }
 0x1a8   : > { %v776_v24 = vpop.f32.mrf.mxu1  ;;  %v1129_v2 = vpop.f32.mrf.mxu3 }
 0x1a9   : > { %v1179_v61 = vadd.f32 %v1129_v2, %v985_v49  ;;  %2051 = vmatmul.f32.gmra.mxu0 %v1972_v20  ;;  %v777_v15 = vadd.f32 %v776_v24, %v3252_v29  ;;  %v1588_v24 = vld [vmem:[#allocation2 + $0xef] sm:$0xff] }
 0x1ab   : > { %v3522_v25 = vadd.f32 %v1323_v8, %v1179_v61  ;;  %1471 = vmatmul.f32.gmra.mxu1 %v1971_v62  ;;  %1666 = vmatmul.f32.gmra.mxu2 %v1585_v13  ;;  %v1782_v13 = vld [vmem:[#allocation2 + $0xf0] sm:$0xff] }
 0x1ad   : > { %1860 = vmatmul.f32.gmra.mxu3 %v1779_v30 }
 0x1ae   : > { %v938_v43 = vpop.f32.mrf.mxu2  ;;  %v1326_v22 = vpop.f32.mrf.mxu0 }
 0x1af   : > { %v986_v16 = vadd.f32 %v938_v43, %v777_v15  ;;  %v1976_v43 = vld [vmem:[#allocation2 + $0xf1] sm:$0xff] }
 0x1b0   : > { %v779_v4 = vpop.f32.mrf.mxu1  ;;  %v1132_v33 = vpop.f32.mrf.mxu3 }
 0x1b1   : > { %v1180_v47 = vadd.f32 %v1132_v33, %v986_v16  ;;  %2054 = vmatmul.f32.gmra.mxu0 %v1973_v37  ;;  %v780_v59 = vadd.f32 %v779_v4, %v3264_v36  ;;  %v1589_v4 = vld [vmem:[#allocation2 + $0x107] sm:$0xff] }
 0x1b3   : > { %v3525_v56 = vadd.f32 %v1326_v22, %v1180_v47  ;;  %1474 = vmatmul.f32.gmra.mxu1 %v1972_v20  ;;  %1669 = vmatmul.f32.gmra.mxu2 %v1586_v45  ;;  %v1783_v45 = vld [vmem:[#allocation2 + $0x108] sm:$0xff] }
 0x1b5   : > { %1863 = vmatmul.f32.gmra.mxu3 %v1780_v3 }
 0x1b6   : > { %v941_v51 = vpop.f32.mrf.mxu2  ;;  %v1329_v29 = vpop.f32.mrf.mxu0 }
 0x1b7   : > { %v987_v1 = vadd.f32 %v941_v51, %v780_v59  ;;  %v1977_v51 = vld [vmem:[#allocation2 + $0x109] sm:$0xff] }
 0x1b8   : > { %v782_v62 = vpop.f32.mrf.mxu1  ;;  %v1135_v40 = vpop.f32.mrf.mxu3 }
 0x1b9   : > { %v1181_v53 = vadd.f32 %v1135_v40, %v987_v1  ;;  %2057 = vmatmul.f32.gmra.mxu0 %v1974_v55  ;;  %v783_v6 = vadd.f32 %v782_v62, %v3282_v44  ;;  %v1590_v62 = vld [vmem:[#allocation2 + $0x10f] sm:$0xff] }
 0x1bb   : > { %v3528_v35 = vadd.f32 %v1329_v29, %v1181_v53  ;;  %1477 = vmatmul.f32.gmra.mxu1 %v1973_v37  ;;  %1672 = vmatmul.f32.gmra.mxu2 %v1587_v19  ;;  %v1784_v19 = vld [vmem:[#allocation2 + $0x110] sm:$0xff] }
 0x1bd   : > { %1866 = vmatmul.f32.gmra.mxu3 %v1781_v28 }
 0x1be   : > { %v944_v12 = vpop.f32.mrf.mxu2  ;;  %v1332_v36 = vpop.f32.mrf.mxu0 }
 0x1bf   : > { %v988_v8 = vadd.f32 %v944_v12, %v783_v6  ;;  %v1978_v12 = vld [vmem:[#allocation2 + $0x111] sm:$0xff] }
 0x1c0   : > { %v785_v20 = vpop.f32.mrf.mxu1  ;;  %v1138_v49 = vpop.f32.mrf.mxu3 }
 0x1c1   : > { %v1182_v2 = vadd.f32 %v1138_v49, %v988_v8  ;;  %2060 = vmatmul.f32.gmra.mxu0 %v1975_v27  ;;  %v786_v30 = vadd.f32 %v785_v20, %v3294_v54  ;;  %v1591_v20 = vld [vmem:[#allocation2 + $0x127] sm:$0xff] }
 0x1c3   : > { %v3531_v61 = vadd.f32 %v1332_v36, %v1182_v2  ;;  %1480 = vmatmul.f32.gmra.mxu1 %v1974_v55  ;;  %1675 = vmatmul.f32.gmra.mxu2 %v1588_v24  ;;  %v1785_v24 = vld [vmem:[#allocation2 + $0x128] sm:$0xff] }
 0x1c5   : > { %1869 = vmatmul.f32.gmra.mxu3 %v1782_v13 }
 0x1c6   : > { %v947_v15 = vpop.f32.mrf.mxu2  ;;  %v1335_v44 = vpop.f32.mrf.mxu0 }
 0x1c7   : > { %v989_v22 = vadd.f32 %v947_v15, %v786_v30  ;;  %v1979_v15 = vld [vmem:[#allocation2 + $0x129] sm:$0xff] }
 0x1c8   : > { %v788_v37 = vpop.f32.mrf.mxu1  ;;  %v1141_v16 = vpop.f32.mrf.mxu3 }
 0x1c9   : > { %v1183_v33 = vadd.f32 %v1141_v16, %v989_v22  ;;  %2063 = vmatmul.f32.gmra.mxu0 %v1976_v43  ;;  %v789_v3 = vadd.f32 %v788_v37, %v3312_v63  ;;  %v1592_v37 = vld [vmem:[#allocation2 + $0x12f] sm:$0xff] }
 0x1cb   : > { %v3534_v47 = vadd.f32 %v1335_v44, %v1183_v33  ;;  %1483 = vmatmul.f32.gmra.mxu1 %v1975_v27  ;;  %1678 = vmatmul.f32.gmra.mxu2 %v1589_v4  ;;  %v1786_v4 = vld [vmem:[#allocation2 + $0x130] sm:$0xff] }
 0x1cd   : > { %1872 = vmatmul.f32.gmra.mxu3 %v1783_v45 }
 0x1ce   : > { %v950_v59 = vpop.f32.mrf.mxu2  ;;  %v1338_v54 = vpop.f32.mrf.mxu0 }
 0x1cf   : > { %v990_v29 = vadd.f32 %v950_v59, %v789_v3  ;;  %v1980_v59 = vld [vmem:[#allocation2 + $0x131] sm:$0xff] }
 0x1d0   : > { %v791_v55 = vpop.f32.mrf.mxu1  ;;  %v1144_v1 = vpop.f32.mrf.mxu3 }
 0x1d1   : > { %v1184_v40 = vadd.f32 %v1144_v1, %v990_v29  ;;  %2066 = vmatmul.f32.gmra.mxu0 %v1977_v51  ;;  %v792_v28 = vadd.f32 %v791_v55, %v3324_v5  ;;  %v1593_v55 = vld [vmem:[#allocation2 + $0x147] sm:$0xff] }
 0x1d3   : > { %v3537_v53 = vadd.f32 %v1338_v54, %v1184_v40  ;;  %1486 = vmatmul.f32.gmra.mxu1 %v1976_v43  ;;  %1681 = vmatmul.f32.gmra.mxu2 %v1590_v62  ;;  %v1787_v62 = vld [vmem:[#allocation2 + $0x148] sm:$0xff] }
 0x1d5   : > { %1875 = vmatmul.f32.gmra.mxu3 %v1784_v19 }
 0x1d6   : > { %v953_v6 = vpop.f32.mrf.mxu2  ;;  %v1341_v63 = vpop.f32.mrf.mxu0 }
 0x1d7   : > { %v991_v36 = vadd.f32 %v953_v6, %v792_v28  ;;  %v1981_v6 = vld [vmem:[#allocation2 + $0x149] sm:$0xff] }
 0x1d8   : > { %v794_v27 = vpop.f32.mrf.mxu1  ;;  %v1147_v8 = vpop.f32.mrf.mxu3 }
 0x1d9   : > { %v1185_v49 = vadd.f32 %v1147_v8, %v991_v36  ;;  %2069 = vmatmul.f32.gmra.mxu0 %v1978_v12  ;;  %v795_v13 = vadd.f32 %v794_v27, %v3342_v18  ;;  %v1594_v27 = vld [vmem:[#allocation2 + $0x14f] sm:$0xff] }
 0x1db   : > { %v3540_v2 = vadd.f32 %v1341_v63, %v1185_v49  ;;  %1489 = vmatmul.f32.gmra.mxu1 %v1977_v51  ;;  %1684 = vmatmul.f32.gmra.mxu2 %v1591_v20  ;;  %v1788_v20 = vld [vmem:[#allocation2 + $0x150] sm:$0xff] }
 0x1dd   : > { %1878 = vmatmul.f32.gmra.mxu3 %v1785_v24 }
 0x1de   : > { %v956_v30 = vpop.f32.mrf.mxu2  ;;  %v1344_v5 = vpop.f32.mrf.mxu0 }
 0x1df   : > { %v992_v44 = vadd.f32 %v956_v30, %v795_v13  ;;  %v1982_v30 = vld [vmem:[#allocation2 + $0x151] sm:$0xff] }
 0x1e0   : > { %v797_v43 = vpop.f32.mrf.mxu1  ;;  %v1150_v22 = vpop.f32.mrf.mxu3 }
 0x1e1   : > { %v1186_v16 = vadd.f32 %v1150_v22, %v992_v44  ;;  %2072 = vmatmul.f32.gmra.mxu0 %v1979_v15  ;;  %v798_v45 = vadd.f32 %v797_v43, %v3351_v31  ;;  %v1595_v43 = vld [vmem:[#allocation2 + $0x167] sm:$0xff] }
 0x1e3   : > { %v3543_v33 = vadd.f32 %v1344_v5, %v1186_v16  ;;  %1492 = vmatmul.f32.gmra.mxu1 %v1978_v12  ;;  %1687 = vmatmul.f32.gmra.mxu2 %v1592_v37  ;;  %v1789_v37 = vld [vmem:[#allocation2 + $0x168] sm:$0xff] }
 0x1e5   : > { %1881 = vmatmul.f32.gmra.mxu3 %v1786_v4 }
 0x1e6   : > { %v959_v3 = vpop.f32.mrf.mxu2  ;;  %v1347_v18 = vpop.f32.mrf.mxu0 }
 0x1e7   : > { %v993_v54 = vadd.f32 %v959_v3, %v798_v45 }
 0x1e8   : > { %v1153_v51 = vpop.f32.mrf.mxu3  ;;  %v1448_v29 = vpop.f32.mrf.mxu1 }
 0x1e9   : > { %v1187_v1 = vadd.f32 %v1153_v51, %v993_v54  ;;  %2075 = vmatmul.f32.gmra.mxu0 %v1980_v59  ;;  %v1544_v19 = vadd.f32 %v1448_v29, %v3363_v0  ;;  %v1983_v54 = vld [vmem:[#allocation2 + $0x169] sm:$0xff] }
 0x1eb   : > { %v3546_v40 = vadd.f32 %v1347_v18, %v1187_v1  ;;  %1495 = vmatmul.f32.gmra.mxu1 %v1979_v15  ;;  %1690 = vmatmul.f32.gmra.mxu2 %v1593_v55 }
 0x1ed   : > { %1884 = vmatmul.f32.gmra.mxu3 %v1787_v62  ;;  %v1596_v62 = vld [vmem:[#allocation2 + $0x16f] sm:$0xff] }
 0x1ee   : > { %v1643_v31 = vpop.f32.mrf.mxu2  ;;  %v2031_v28 = vpop.f32.mrf.mxu0 }
 0x1ef   : > { %v1739_v63 = vadd.f32 %v1643_v31, %v1544_v19  ;;  %v1790_v31 = vld [vmem:[#allocation2 + $0x170] sm:$0xff] }
 0x1f0   : > { %v1451_v12 = vpop.f32.mrf.mxu1  ;;  %v1837_v36 = vpop.f32.mrf.mxu3 }
 0x1f1   : > { %v1933_v8 = vadd.f32 %v1837_v36, %v1739_v63  ;;  %2078 = vmatmul.f32.gmra.mxu0 %v1981_v6  ;;  %v1545_v0 = vadd.f32 %v1451_v12, %v3370_v21 }
 0x1f3   : > { %v2127_v49 = vadd.f32 %v2031_v28, %v1933_v8  ;;  %1498 = vmatmul.f32.gmra.mxu1 %v1980_v59  ;;  %1693 = vmatmul.f32.gmra.mxu2 %v1594_v27  ;;  %v1984_v27 = vld [vmem:[#allocation2 + $0x171] sm:$0xff] }
 0x1f5   : > { %2159 = vst [vmem:[%s3554_s25] sm:$0xff] %v2127_v49  ;;  %1887 = vmatmul.f32.gmra.mxu3 %v1788_v20  ;;  %v2229_v4 = vmul.f32 %v2127_v49, %v2127_v49 }
 0x1f6   : > { %v1646_v24 = vpop.f32.mrf.mxu2  ;;  %v2034_v13 = vpop.f32.mrf.mxu0 }
 0x1f7   : > { %v1740_v5 = vadd.f32 %v1646_v24, %v1545_v0  ;;  %v1597_v24 = vld [vmem:[#allocation2 + $0x187] sm:$0xff] }
 0x1f8   : > { %v1454_v15 = vpop.f32.mrf.mxu1  ;;  %v1840_v44 = vpop.f32.mrf.mxu3 }
 0x1f9   : > { %v1934_v22 = vadd.f32 %v1840_v44, %v1740_v5  ;;  %2081 = vmatmul.f32.gmra.mxu0 %v1982_v30  ;;  %v1546_v45 = vadd.f32 %v1454_v15, %v3383_v57  ;;  %v1791_v5 = vld [vmem:[#allocation2 + $0x188] sm:$0xff] }
 0x1fb   : > { %v2128_v16 = vadd.f32 %v2034_v13, %v1934_v22  ;;  %1501 = vmatmul.f32.gmra.mxu1 %v1981_v6  ;;  %1696 = vmatmul.f32.gmra.mxu2 %v1595_v43 }
 0x1fd   : > { %2160 = vst [vmem:[%s3554_s25 + $0x8] sm:$0xff] %v2128_v16  ;;  %v2191_v21 = vadd.f32 %v2128_v16, %v2127_v49  ;;  %v2230_v3 = vmul.f32 %v2128_v16, %v2128_v16  ;;  %1890 = vmatmul.f32.gmra.mxu3 %v1789_v37  ;;  %v1985_v37 = vld [vmem:[#allocation2 + $0x189] sm:$0xff] }
 0x1fe   : > { %v1649_v18 = vpop.f32.mrf.mxu2  ;;  %v2037_v59 = vpop.f32.mrf.mxu0 }
 0x1ff   : > { %v2261_v51 = vadd.f32 %v2230_v3, %v2229_v4  ;;  %v1741_v29 = vadd.f32 %v1649_v18, %v1546_v45  ;;  %v1598_v3 = vld [vmem:[#allocation2 + $0x18f] sm:$0xff] }
 0x200   : > { %v1457_v55 = vpop.f32.mrf.mxu1  ;;  %v1843_v1 = vpop.f32.mrf.mxu3 }
 0x201   : > { %v1935_v19 = vadd.f32 %v1843_v1, %v1741_v29  ;;  %2084 = vmatmul.f32.gmra.mxu0 %v1983_v54  ;;  %v1547_v57 = vadd.f32 %v1457_v55, %v3390_v26 }
 0x203   : > { %v2129_v28 = vadd.f32 %v2037_v59, %v1935_v19  ;;  %1504 = vmatmul.f32.gmra.mxu1 %v1982_v30  ;;  %1699 = vmatmul.f32.gmra.mxu2 %v1596_v62  ;;  %v1792_v59 = vld [vmem:[#allocation2 + $0x190] sm:$0xff] }
 0x204   : > { %v1986_v62 = vld [vmem:[#allocation2 + $0x191] sm:$0xff] }
 0x205   : > { %2161 = vst [vmem:[%s3554_s25 + $0x10] sm:$0xff] %v2129_v28  ;;  %v2192_v6 = vadd.f32 %v2191_v21, %v2129_v28  ;;  %v2231_v63 = vmul.f32 %v2129_v28, %v2129_v28  ;;  %1893 = vmatmul.f32.gmra.mxu3 %v1790_v31 }
 0x206   : > { %v1652_v12 = vpop.f32.mrf.mxu2  ;;  %v2040_v36 = vpop.f32.mrf.mxu0 }
 0x207   : > { %v2262_v8 = vadd.f32 %v2261_v51, %v2231_v63  ;;  %v1742_v20 = vadd.f32 %v1652_v12, %v1547_v57  ;;  %v1793_v12 = vld [vmem:[#allocation2 + $0x1a8] sm:$0xff] }
 0x208   : > { %v1460_v49 = vpop.f32.mrf.mxu1  ;;  %v1846_v0 = vpop.f32.mrf.mxu3 }
 0x209   : > { %v1936_v13 = vadd.f32 %v1846_v0, %v1742_v20  ;;  %2087 = vmatmul.f32.gmra.mxu0 %v1984_v27  ;;  %v1548_v26 = vadd.f32 %v1460_v49, %v3403_v38  ;;  %v1987_v0 = vld [vmem:[#allocation2 + $0x1a9] sm:$0xff] }
 0x20b   : > { %v2130_v30 = vadd.f32 %v2040_v36, %v1936_v13  ;;  %1507 = vmatmul.f32.gmra.mxu1 %v1983_v54  ;;  %1702 = vmatmul.f32.gmra.mxu2 %v1597_v24 }
 0x20d   : > { %2162 = vst [vmem:[%s3554_s25 + $0x18] sm:$0xff] %v2130_v30  ;;  %v2193_v15 = vadd.f32 %v2192_v6, %v2130_v30  ;;  %v2232_v44 = vmul.f32 %v2130_v30, %v2130_v30  ;;  %1896 = vmatmul.f32.gmra.mxu3 %v1791_v5  ;;  %v1599_v6 = vld [vmem:[#allocation2 + $0x1a7] sm:$0xff] }
 0x20e   : > { %v1655_v43 = vpop.f32.mrf.mxu2  ;;  %v2043_v22 = vpop.f32.mrf.mxu0 }
 0x20f   : > { %v2263_v16 = vadd.f32 %v2262_v8, %v2232_v44  ;;  %v1743_v4 = vadd.f32 %v1655_v43, %v1548_v26  ;;  %v1600_v26 = vld [vmem:[#allocation2 + $0x1af] sm:$0xff] }
 0x210   : > { %v1463_v45 = vpop.f32.mrf.mxu1  ;;  %v1849_v21 = vpop.f32.mrf.mxu3  ;;  %v1794_v44 = vld [vmem:[#allocation2 + $0x1b0] sm:$0xff] }
 0x211   : > { %v1937_v18 = vadd.f32 %v1849_v21, %v1743_v4  ;;  %2090 = vmatmul.f32.gmra.mxu0 %v1985_v37  ;;  %v1549_v38 = vadd.f32 %v1463_v45, %v3410_v41  ;;  %v1988_v45 = vld [vmem:[#allocation2 + $0x1b1] sm:$0xff] }
 0x213   : > { %v2131_v54 = vadd.f32 %v2043_v22, %v1937_v18  ;;  %1510 = vmatmul.f32.gmra.mxu1 %v1984_v27  ;;  %1705 = vmatmul.f32.gmra.mxu2 %v1598_v3 }
 0x215   : > { %2163 = vst [vmem:[%s3554_s25 + $0x20] sm:$0xff] %v2131_v54  ;;  %v2194_v51 = vadd.f32 %v2193_v15, %v2131_v54  ;;  %v2233_v29 = vmul.f32 %v2131_v54, %v2131_v54  ;;  %1899 = vmatmul.f32.gmra.mxu3 %v1792_v59  ;;  %v1601_v54 = vld [vmem:[#allocation2 + $0x1c7] sm:$0xff] }
 0x216   : > { %v1658_v55 = vpop.f32.mrf.mxu2  ;;  %v2046_v1 = vpop.f32.mrf.mxu0 }
 0x217   : > { %v2264_v19 = vadd.f32 %v2263_v16, %v2233_v29  ;;  %v1744_v31 = vadd.f32 %v1658_v55, %v1549_v38 }
 0x218   : > { %v1466_v28 = vpop.f32.mrf.mxu1  ;;  %v1852_v57 = vpop.f32.mrf.mxu3 }
 0x219   : > { %v1938_v63 = vadd.f32 %v1852_v57, %v1744_v31  ;;  %2093 = vmatmul.f32.gmra.mxu0 %v1986_v62  ;;  %v1550_v41 = vadd.f32 %v1466_v28, %v3422_v17  ;;  %v1989_v31 = vld [vmem:[#allocation2 + $0x1c9] sm:$0xff] }
 0x21b   : > { %v2132_v36 = vadd.f32 %v2046_v1, %v1938_v63  ;;  %1513 = vmatmul.f32.gmra.mxu1 %v1985_v37  ;;  %1708 = vmatmul.f32.gmra.mxu2 %v1599_v6 }
 0x21d   : > { %2164 = vst [vmem:[%s3554_s25 + $0x28] sm:$0xff] %v2132_v36  ;;  %v2195_v27 = vadd.f32 %v2194_v51, %v2132_v36  ;;  %v2234_v8 = vmul.f32 %v2132_v36, %v2132_v36  ;;  %1902 = vmatmul.f32.gmra.mxu3 %v1793_v12  ;;  %v1795_v51 = vld [vmem:[#allocation2 + $0x1c8] sm:$0xff] }
 0x21e   : > { %v1661_v20 = vpop.f32.mrf.mxu2  ;;  %v2049_v49 = vpop.f32.mrf.mxu0  ;;  %v1602_v12 = vld [vmem:[#allocation2 + $0x1cf] sm:$0xff] }
 0x21f   : > { %v2265_v24 = vadd.f32 %v2264_v19, %v2234_v8  ;;  %v1745_v13 = vadd.f32 %v1661_v20, %v1550_v41  ;;  %v1796_v41 = vld [vmem:[#allocation2 + $0x1d0] sm:$0xff] }
 0x220   : > { %v1469_v5 = vpop.f32.mrf.mxu1  ;;  %v1855_v30 = vpop.f32.mrf.mxu3 }
 0x221   : > { %v1939_v15 = vadd.f32 %v1855_v30, %v1745_v13  ;;  %2096 = vmatmul.f32.gmra.mxu0 %v1987_v0  ;;  %v1551_v17 = vadd.f32 %v1469_v5, %v3428_v23 }
 0x223   : > { %v2133_v43 = vadd.f32 %v2049_v49, %v1939_v15  ;;  %1516 = vmatmul.f32.gmra.mxu1 %v1986_v62  ;;  %1711 = vmatmul.f32.gmra.mxu2 %v1600_v26  ;;  %v1603_v15 = vld [vmem:[#allocation2 + $0x1e7] sm:$0xff] }
 0x225   : > { %2165 = vst [vmem:[%s3554_s25 + $0x30] sm:$0xff] %v2133_v43  ;;  %v2196_v22 = vadd.f32 %v2195_v27, %v2133_v43  ;;  %v2235_v37 = vmul.f32 %v2133_v43, %v2133_v43  ;;  %1905 = vmatmul.f32.gmra.mxu3 %v1794_v44  ;;  %v1797_v43 = vld [vmem:[#allocation2 + $0x1e8] sm:$0xff] }
 0x226   : > { %v1664_v16 = vpop.f32.mrf.mxu2  ;;  %v2052_v4 = vpop.f32.mrf.mxu0 }
 0x227   : > { %v2266_v21 = vadd.f32 %v2265_v24, %v2235_v37  ;;  %v1746_v3 = vadd.f32 %v1664_v16, %v1551_v17  ;;  %v1990_v24 = vld [vmem:[#allocation2 + $0x1d1] sm:$0xff] }
 0x228   : > { %v1472_v18 = vpop.f32.mrf.mxu1  ;;  %v1858_v59 = vpop.f32.mrf.mxu3 }
 0x229   : > { %v1940_v38 = vadd.f32 %v1858_v59, %v1746_v3  ;;  %2099 = vmatmul.f32.gmra.mxu0 %v1988_v45  ;;  %v1552_v23 = vadd.f32 %v1472_v18, %v3449_v10 }
 0x22b   : > { %v2134_v29 = vadd.f32 %v2052_v4, %v1940_v38  ;;  %1519 = vmatmul.f32.gmra.mxu1 %v1987_v0  ;;  %1714 = vmatmul.f32.gmra.mxu2 %v1601_v54  ;;  %v1604_v54 = vld [vmem:[#allocation2 + $0x1ef] sm:$0xff] }
 0x22d   : > { %2166 = vst [vmem:[%s3554_s25 + $0x38] sm:$0xff] %v2134_v29  ;;  %v2197_v55 = vadd.f32 %v2196_v22, %v2134_v29  ;;  %v2236_v1 = vmul.f32 %v2134_v29, %v2134_v29  ;;  %1908 = vmatmul.f32.gmra.mxu3 %v1795_v51  ;;  %v1798_v51 = vld [vmem:[#allocation2 + $0x1f0] sm:$0xff] }
 0x22e   : > { %v1667_v62 = vpop.f32.mrf.mxu2  ;;  %v2055_v19 = vpop.f32.mrf.mxu0 }
 0x22f   : > { %v2267_v28 = vadd.f32 %v2266_v21, %v2236_v1  ;;  %v1747_v57 = vadd.f32 %v1667_v62, %v1552_v23 }
 0x230   : > { %v1475_v6 = vpop.f32.mrf.mxu1  ;;  %v1861_v63 = vpop.f32.mrf.mxu3 }
 0x231   : > { %v1941_v36 = vadd.f32 %v1861_v63, %v1747_v57  ;;  %2102 = vmatmul.f32.gmra.mxu0 %v1989_v31  ;;  %v1553_v10 = vadd.f32 %v1475_v6, %v3461_v42  ;;  %v1605_v63 = vld [vmem:[#allocation2 + $0x207] sm:$0xff] }
 0x233   : > { %v2135_v27 = vadd.f32 %v2055_v19, %v1941_v36  ;;  %1522 = vmatmul.f32.gmra.mxu1 %v1988_v45  ;;  %1717 = vmatmul.f32.gmra.mxu2 %v1602_v12  ;;  %v1991_v45 = vld [vmem:[#allocation2 + $0x1e9] sm:$0xff]  ;;  %v1992_v19 = vld [vmem:[#allocation2 + $0x1f1] sm:$0xff] }
 0x234   : > { %v1799_v36 = vld [vmem:[#allocation2 + $0x208] sm:$0xff] }
 0x235   : > { %2167 = vst [vmem:[%s3554_s25 + $0x40] sm:$0xff] %v2135_v27  ;;  %v2198_v8 = vadd.f32 %v2197_v55, %v2135_v27  ;;  %v2237_v20 = vmul.f32 %v2135_v27, %v2135_v27  ;;  %1911 = vmatmul.f32.gmra.mxu3 %v1796_v41 }
 0x236   : > { %v1670_v49 = vpop.f32.mrf.mxu2  ;;  %v2058_v0 = vpop.f32.mrf.mxu0 }
 0x237   : > { %v2268_v13 = vadd.f32 %v2267_v28, %v2237_v20  ;;  %v1748_v5 = vadd.f32 %v1670_v49, %v1553_v10  ;;  %v1993_v49 = vld [vmem:[#allocation2 + $0x209] sm:$0xff] }
 0x238   : > { %v1478_v30 = vpop.f32.mrf.mxu1  ;;  %v1864_v26 = vpop.f32.mrf.mxu3 }
 0x239   : > { %v1942_v44 = vadd.f32 %v1864_v26, %v1748_v5  ;;  %2105 = vmatmul.f32.gmra.mxu0 %v1990_v24  ;;  %v1554_v42 = vadd.f32 %v1478_v30, %v3476_v14  ;;  %v1606_v30 = vld [vmem:[#allocation2 + $0x20f] sm:$0xff] }
 0x23b   : > { %v2136_v17 = vadd.f32 %v2058_v0, %v1942_v44  ;;  %1525 = vmatmul.f32.gmra.mxu1 %v1989_v31  ;;  %1720 = vmatmul.f32.gmra.mxu2 %v1603_v15  ;;  %v1800_v15 = vld [vmem:[#allocation2 + $0x210] sm:$0xff] }
 0x23d   : > { %2168 = vst [vmem:[%s3554_s25 + $0x48] sm:$0xff] %v2136_v17  ;;  %v2199_v22 = vadd.f32 %v2198_v8, %v2136_v17  ;;  %v2238_v37 = vmul.f32 %v2136_v17, %v2136_v17  ;;  %1914 = vmatmul.f32.gmra.mxu3 %v1797_v43 }
 0x23e   : > { %v1673_v16 = vpop.f32.mrf.mxu2  ;;  %v2061_v4 = vpop.f32.mrf.mxu0 }
 0x23f   : > { %v2269_v21 = vadd.f32 %v2268_v13, %v2238_v37  ;;  %v1749_v3 = vadd.f32 %v1673_v16, %v1554_v42  ;;  %v1994_v37 = vld [vmem:[#allocation2 + $0x211] sm:$0xff] }
 0x240   : > { %v1481_v18 = vpop.f32.mrf.mxu1  ;;  %v1867_v59 = vpop.f32.mrf.mxu3 }
 0x241   : > { %v1943_v38 = vadd.f32 %v1867_v59, %v1749_v3  ;;  %2108 = vmatmul.f32.gmra.mxu0 %v1991_v45  ;;  %v1555_v14 = vadd.f32 %v1481_v18, %v3482_v11  ;;  %v1607_v3 = vld [vmem:[#allocation2 + $0x227] sm:$0xff] }
 0x243   : > { %v2137_v29 = vadd.f32 %v2061_v4, %v1943_v38  ;;  %1528 = vmatmul.f32.gmra.mxu1 %v1990_v24  ;;  %1723 = vmatmul.f32.gmra.mxu2 %v1604_v54 }
 0x245   : > { %2169 = vst [vmem:[%s3554_s25 + $0x50] sm:$0xff] %v2137_v29  ;;  %v2200_v23 = vadd.f32 %v2199_v22, %v2137_v29  ;;  %v2239_v55 = vmul.f32 %v2137_v29, %v2137_v29  ;;  %1917 = vmatmul.f32.gmra.mxu3 %v1798_v51  ;;  %v2588_v51 = vld [vmem:[#allocation2] sm:$0xff] }
 0x246   : > { %v1676_v1 = vpop.f32.mrf.mxu2  ;;  %v2064_v62 = vpop.f32.mrf.mxu0 }
 0x247   : > { %v2270_v31 = vadd.f32 %v2269_v21, %v2239_v55  ;;  %v1750_v28 = vadd.f32 %v1676_v1, %v1555_v14 }
 0x248   : > { %v1484_v57 = vpop.f32.mrf.mxu1  ;;  %v1870_v6 = vpop.f32.mrf.mxu3 }
 0x249   : > { %v1944_v12 = vadd.f32 %v1870_v6, %v1750_v28  ;;  %2111 = vmatmul.f32.gmra.mxu0 %v1992_v19  ;;  %v1556_v11 = vadd.f32 %v1484_v57, %v3485_v58 }
 0x24b   : > { %v2138_v41 = vadd.f32 %v2064_v62, %v1944_v12  ;;  %1531 = vmatmul.f32.gmra.mxu1 %v1991_v45  ;;  %1726 = vmatmul.f32.gmra.mxu2 %v1605_v63 }
 0x24d   : > { %2170 = vst [vmem:[%s3554_s25 + $0x58] sm:$0xff] %v2138_v41  ;;  %v2201_v27 = vadd.f32 %v2200_v23, %v2138_v41  ;;  %v2240_v10 = vmul.f32 %v2138_v41, %v2138_v41  ;;  %1920 = vmatmul.f32.gmra.mxu3 %v1799_v36  ;;  %v1995_v23 = vld [vmem:[#allocation2 + $0x229] sm:$0xff]  ;;  %v1996_v41 = vld [vmem:[#allocation2 + $0x231] sm:$0xff] }
 0x24e   : > { %v1679_v8 = vpop.f32.mrf.mxu2  ;;  %v2067_v20 = vpop.f32.mrf.mxu0 }
 0x24f   : > { %v2271_v0 = vadd.f32 %v2270_v31, %v2240_v10  ;;  %v1751_v24 = vadd.f32 %v1679_v8, %v1556_v11  ;;  %v1608_v31 = vld [vmem:[#allocation2 + $0x22f] sm:$0xff] }
 0x250   : > { %v1487_v13 = vpop.f32.mrf.mxu1  ;;  %v1873_v5 = vpop.f32.mrf.mxu3 }
 0x251   : > { %v1945_v26 = vadd.f32 %v1873_v5, %v1751_v24  ;;  %2114 = vmatmul.f32.gmra.mxu0 %v1993_v49  ;;  %v1557_v58 = vadd.f32 %v1487_v13, %v3488_v34 }
 0x253   : > { %v2139_v44 = vadd.f32 %v2067_v20, %v1945_v26  ;;  %1534 = vmatmul.f32.gmra.mxu1 %v1992_v19  ;;  %1729 = vmatmul.f32.gmra.mxu2 %v1606_v30 }
 0x255   : > { %2171 = vst [vmem:[%s3554_s25 + $0x60] sm:$0xff] %v2139_v44  ;;  %v2202_v43 = vadd.f32 %v2201_v27, %v2139_v44  ;;  %v2241_v17 = vmul.f32 %v2139_v44, %v2139_v44  ;;  %1923 = vmatmul.f32.gmra.mxu3 %v1800_v15 }
 0x256   : > { %v1682_v42 = vpop.f32.mrf.mxu2  ;;  %v2070_v22 = vpop.f32.mrf.mxu0 }
 0x257   : > { %v2272_v16 = vadd.f32 %v2271_v0, %v2241_v17  ;;  %v1752_v4 = vadd.f32 %v1682_v42, %v1557_v58 }
 0x258   : > { %v1490_v45 = vpop.f32.mrf.mxu1  ;;  %v1876_v21 = vpop.f32.mrf.mxu3 }
 0x259   : > { %v1946_v18 = vadd.f32 %v1876_v21, %v1752_v4  ;;  %2117 = vmatmul.f32.gmra.mxu0 %v1994_v37  ;;  %v1558_v34 = vadd.f32 %v1490_v45, %v3493_v48 }
 0x25b   : > { %v2140_v59 = vadd.f32 %v2070_v22, %v1946_v18  ;;  %1537 = vmatmul.f32.gmra.mxu1 %v1993_v49  ;;  %1732 = vmatmul.f32.gmra.mxu2 %v1607_v3 }
 0x25d   : > { %2172 = vst [vmem:[%s3554_s25 + $0x68] sm:$0xff] %v2140_v59  ;;  %v2203_v54 = vadd.f32 %v2202_v43, %v2140_v59  ;;  %v2242_v38 = vmul.f32 %v2140_v59, %v2140_v59  ;;  %1926 = vmatmul.f32.gmra.mxu3 %v2588_v51 }
 0x25e   : > { %v1685_v29 = vpop.f32.mrf.mxu2  ;;  %v2073_v14 = vpop.f32.mrf.mxu0 }
 0x25f   : > { %v2273_v55 = vadd.f32 %v2272_v16, %v2242_v38  ;;  %v1753_v1 = vadd.f32 %v1685_v29, %v1558_v34 }
 0x260   : > { %v1493_v62 = vpop.f32.mrf.mxu1  ;;  %v1879_v19 = vpop.f32.mrf.mxu3 }
 0x261   : > { %v1947_v28 = vadd.f32 %v1879_v19, %v1753_v1  ;;  %2120 = vmatmul.f32.gmra.mxu0 %v1995_v23  ;;  %v1559_v48 = vadd.f32 %v1493_v62, %v3498_v52 }
 0x263   : > { %v2141_v57 = vadd.f32 %v2073_v14, %v1947_v28  ;;  %1540 = vmatmul.f32.gmra.mxu1 %v1994_v37  ;;  %1735 = vmatmul.f32.gmra.mxu2 %v1608_v31 }
 0x265   : > { %2173 = vst [vmem:[%s3554_s25 + $0x70] sm:$0xff] %v2141_v57  ;;  %v2204_v6 = vadd.f32 %v2203_v54, %v2141_v57  ;;  %v2243_v63 = vmul.f32 %v2141_v57, %v2141_v57  ;;  %1929 = vmatmul.f32.gmra.mxu3 %v2588_v51 }
 0x266   : > { %v1688_v12 = vpop.f32.mrf.mxu2  ;;  %v2076_v36 = vpop.f32.mrf.mxu0 }
 0x267   : > { %v2274_v11 = vadd.f32 %v2273_v55, %v2243_v63  ;;  %v1754_v27 = vadd.f32 %v1688_v12, %v1559_v48 }
 0x268   : > { %v1496_v10 = vpop.f32.mrf.mxu1  ;;  %v1882_v8 = vpop.f32.mrf.mxu3 }
 0x269   : > { %v1948_v20 = vadd.f32 %v1882_v8, %v1754_v27  ;;  %2123 = vmatmul.f32.gmra.mxu0 %v1996_v41  ;;  %v1560_v0 = vadd.f32 %v1496_v10, %v3501_v46 }
 0x26b   : > { %v2142_v49 = vadd.f32 %v2076_v36, %v1948_v20 }
 0x26d   : > { %2174 = vst [vmem:[%s3554_s25 + $0x78] sm:$0xff] %v2142_v49  ;;  %v2205_v52 = vadd.f32 %v2204_v6, %v2142_v49  ;;  %v2244_v24 = vmul.f32 %v2142_v49, %v2142_v49 }
 0x26e   : > { %v1691_v13 = vpop.f32.mrf.mxu2  ;;  %v2079_v5 = vpop.f32.mrf.mxu0 }
 0x26f   : > { %v2275_v30 = vadd.f32 %v2274_v11, %v2244_v24  ;;  %v1755_v26 = vadd.f32 %v1691_v13, %v1560_v0 }
 0x270   : > { %v1499_v15 = vpop.f32.mrf.mxu1  ;;  %v1885_v44 = vpop.f32.mrf.mxu3 }
 0x271   : > { %v1949_v58 = vadd.f32 %v1885_v44, %v1755_v26  ;;  %v1561_v17 = vadd.f32 %v1499_v15, %v3504_v39 }
 0x273   : > { %v2143_v43 = vadd.f32 %v2079_v5, %v1949_v58 }
 0x275   : > { %2175 = vst [vmem:[%s3554_s25 + $0x80] sm:$0xff] %v2143_v43  ;;  %v2206_v42 = vadd.f32 %v2205_v52, %v2143_v43  ;;  %v2245_v22 = vmul.f32 %v2143_v43, %v2143_v43 }
 0x276   : > { %v1694_v37 = vpop.f32.mrf.mxu2  ;;  %v2082_v16 = vpop.f32.mrf.mxu0 }
 0x277   : > { %v2276_v46 = vadd.f32 %v2275_v30, %v2245_v22  ;;  %v1756_v4 = vadd.f32 %v1694_v37, %v1561_v17 }
 0x278   : > { %v1502_v45 = vpop.f32.mrf.mxu1  ;;  %v1888_v21 = vpop.f32.mrf.mxu3 }
 0x279   : > { %v1950_v3 = vadd.f32 %v1888_v21, %v1756_v4  ;;  %v1562_v59 = vadd.f32 %v1502_v45, %v3507_v50 }
 0x27b   : > { %v2144_v18 = vadd.f32 %v2082_v16, %v1950_v3 }
 0x27d   : > { %2176 = vst [vmem:[%s3554_s25 + $0x88] sm:$0xff] %v2144_v18  ;;  %v2207_v34 = vadd.f32 %v2206_v42, %v2144_v18  ;;  %v2246_v54 = vmul.f32 %v2144_v18, %v2144_v18 }
 0x27e   : > { %v1697_v38 = vpop.f32.mrf.mxu2  ;;  %v2085_v51 = vpop.f32.mrf.mxu0 }
 0x27f   : > { %v2277_v39 = vadd.f32 %v2276_v46, %v2246_v54  ;;  %v1757_v29 = vadd.f32 %v1697_v38, %v1562_v59 }
 0x280   : > { %v1505_v14 = vpop.f32.mrf.mxu1  ;;  %v1891_v23 = vpop.f32.mrf.mxu3 }
 0x281   : > { %v1951_v55 = vadd.f32 %v1891_v23, %v1757_v29  ;;  %v1563_v62 = vadd.f32 %v1505_v14, %v3510_v7 }
 0x283   : > { %v2145_v1 = vadd.f32 %v2085_v51, %v1951_v55 }
 0x285   : > { %2177 = vst [vmem:[%s3554_s25 + $0x90] sm:$0xff] %v2145_v1  ;;  %v2208_v19 = vadd.f32 %v2207_v34, %v2145_v1  ;;  %v2247_v31 = vmul.f32 %v2145_v1, %v2145_v1 }
 0x286   : > { %v1700_v28 = vpop.f32.mrf.mxu2  ;;  %v2088_v57 = vpop.f32.mrf.mxu0 }
 0x287   : > { %v2278_v50 = vadd.f32 %v2277_v39, %v2247_v31  ;;  %v1758_v48 = vadd.f32 %v1700_v28, %v1563_v62 }
 0x288   : > { %v1508_v6 = vpop.f32.mrf.mxu1  ;;  %v1894_v63 = vpop.f32.mrf.mxu3 }
 0x289   : > { %v1952_v12 = vadd.f32 %v1894_v63, %v1758_v48  ;;  %v1564_v41 = vadd.f32 %v1508_v6, %v3513_v32 }
 0x28b   : > { %v2146_v36 = vadd.f32 %v2088_v57, %v1952_v12 }
 0x28d   : > { %2178 = vst [vmem:[%s3554_s25 + $0x98] sm:$0xff] %v2146_v36  ;;  %v2209_v11 = vadd.f32 %v2208_v19, %v2146_v36  ;;  %v2248_v27 = vmul.f32 %v2146_v36, %v2146_v36 }
 0x28e   : > { %v1703_v10 = vpop.f32.mrf.mxu2  ;;  %v2091_v8 = vpop.f32.mrf.mxu0 }
 0x28f   : > { %v2279_v7 = vadd.f32 %v2278_v50, %v2248_v27  ;;  %v1759_v20 = vadd.f32 %v1703_v10, %v1564_v41 }
 0x290   : > { %v1511_v49 = vpop.f32.mrf.mxu1  ;;  %v1897_v0 = vpop.f32.mrf.mxu3 }
 0x291   : > { %v1953_v52 = vadd.f32 %v1897_v0, %v1759_v20  ;;  %v1565_v13 = vadd.f32 %v1511_v49, %v3516_v60 }
 0x293   : > { %v2147_v24 = vadd.f32 %v2091_v8, %v1953_v52 }
 0x295   : > { %2179 = vst [vmem:[%s3554_s25 + $0xa0] sm:$0xff] %v2147_v24  ;;  %v2210_v5 = vadd.f32 %v2209_v11, %v2147_v24  ;;  %v2249_v30 = vmul.f32 %v2147_v24, %v2147_v24 }
 0x296   : > { %v1706_v26 = vpop.f32.mrf.mxu2  ;;  %v2094_v15 = vpop.f32.mrf.mxu0 }
 0x297   : > { %v2280_v32 = vadd.f32 %v2279_v7, %v2249_v30  ;;  %v1760_v44 = vadd.f32 %v1706_v26, %v1565_v13 }
 0x298   : > { %v1514_v58 = vpop.f32.mrf.mxu1  ;;  %v1900_v43 = vpop.f32.mrf.mxu3 }
 0x299   : > { %v1954_v17 = vadd.f32 %v1900_v43, %v1760_v44  ;;  %v1566_v22 = vadd.f32 %v1514_v58, %v3519_v9 }
 0x29b   : > { %v2148_v42 = vadd.f32 %v2094_v15, %v1954_v17 }
 0x29d   : > { %2180 = vst [vmem:[%s3554_s25 + $0xa8] sm:$0xff] %v2148_v42  ;;  %v2211_v37 = vadd.f32 %v2210_v5, %v2148_v42  ;;  %v2250_v16 = vmul.f32 %v2148_v42, %v2148_v42 }
 0x29e   : > { %v1709_v46 = vpop.f32.mrf.mxu2  ;;  %v2097_v4 = vpop.f32.mrf.mxu0 }
 0x29f   : > { %v2281_v60 = vadd.f32 %v2280_v32, %v2250_v16  ;;  %v1761_v45 = vadd.f32 %v1709_v46, %v1566_v22 }
 0x2a0   : > { %v1517_v21 = vpop.f32.mrf.mxu1  ;;  %v1903_v3 = vpop.f32.mrf.mxu3 }
 0x2a1   : > { %v1955_v18 = vadd.f32 %v1903_v3, %v1761_v45  ;;  %v1567_v34 = vadd.f32 %v1517_v21, %v3522_v25 }
 0x2a3   : > { %v2149_v59 = vadd.f32 %v2097_v4, %v1955_v18 }
 0x2a5   : > { %2181 = vst [vmem:[%s3554_s25 + $0xb0] sm:$0xff] %v2149_v59  ;;  %v2212_v54 = vadd.f32 %v2211_v37, %v2149_v59  ;;  %v2251_v38 = vmul.f32 %v2149_v59, %v2149_v59 }
 0x2a6   : > { %v1712_v51 = vpop.f32.mrf.mxu2  ;;  %v2100_v39 = vpop.f32.mrf.mxu0 }
 0x2a7   : > { %v2282_v9 = vadd.f32 %v2281_v60, %v2251_v38  ;;  %v1762_v29 = vadd.f32 %v1712_v51, %v1567_v34 }
 0x2a8   : > { %v1520_v14 = vpop.f32.mrf.mxu1  ;;  %v1906_v23 = vpop.f32.mrf.mxu3 }
 0x2a9   : > { %v1956_v55 = vadd.f32 %v1906_v23, %v1762_v29  ;;  %v1568_v62 = vadd.f32 %v1520_v14, %v3525_v56 }
 0x2ab   : > { %v2150_v1 = vadd.f32 %v2100_v39, %v1956_v55 }
 0x2ad   : > { %2182 = vst [vmem:[%s3554_s25 + $0xb8] sm:$0xff] %v2150_v1  ;;  %v2213_v19 = vadd.f32 %v2212_v54, %v2150_v1  ;;  %v2252_v31 = vmul.f32 %v2150_v1, %v2150_v1 }
 0x2ae   : > { %v1715_v28 = vpop.f32.mrf.mxu2  ;;  %v2103_v57 = vpop.f32.mrf.mxu0 }
 0x2af   : > { %v2283_v25 = vadd.f32 %v2282_v9, %v2252_v31  ;;  %v1763_v50 = vadd.f32 %v1715_v28, %v1568_v62 }
 0x2b0   : > { %v1523_v48 = vpop.f32.mrf.mxu1  ;;  %v1909_v6 = vpop.f32.mrf.mxu3 }
 0x2b1   : > { %v1957_v63 = vadd.f32 %v1909_v6, %v1763_v50  ;;  %v1569_v36 = vadd.f32 %v1523_v48, %v3528_v35 }
 0x2b3   : > { %v2151_v12 = vadd.f32 %v2103_v57, %v1957_v63 }
 0x2b5   : > { %2183 = vst [vmem:[%s3554_s25 + $0xc0] sm:$0xff] %v2151_v12  ;;  %v2214_v41 = vadd.f32 %v2213_v19, %v2151_v12  ;;  %v2253_v11 = vmul.f32 %v2151_v12, %v2151_v12 }
 0x2b6   : > { %v1718_v27 = vpop.f32.mrf.mxu2  ;;  %v2106_v10 = vpop.f32.mrf.mxu0 }
 0x2b7   : > { %v2284_v56 = vadd.f32 %v2283_v25, %v2253_v11  ;;  %v1764_v8 = vadd.f32 %v1718_v27, %v1569_v36 }
 0x2b8   : > { %v1526_v7 = vpop.f32.mrf.mxu1  ;;  %v1912_v20 = vpop.f32.mrf.mxu3 }
 0x2b9   : > { %v1958_v49 = vadd.f32 %v1912_v20, %v1764_v8  ;;  %v1570_v52 = vadd.f32 %v1526_v7, %v3531_v61 }
 0x2bb   : > { %v2152_v0 = vadd.f32 %v2106_v10, %v1958_v49 }
 0x2bd   : > { %2184 = vst [vmem:[%s3554_s25 + $0xc8] sm:$0xff] %v2152_v0  ;;  %v2215_v24 = vadd.f32 %v2214_v41, %v2152_v0  ;;  %v2254_v13 = vmul.f32 %v2152_v0, %v2152_v0 }
 0x2be   : > { %v1721_v5 = vpop.f32.mrf.mxu2  ;;  %v2109_v30 = vpop.f32.mrf.mxu0 }
 0x2bf   : > { %v2285_v35 = vadd.f32 %v2284_v56, %v2254_v13  ;;  %v1765_v26 = vadd.f32 %v1721_v5, %v1570_v52 }
 0x2c0   : > { %v1529_v15 = vpop.f32.mrf.mxu1  ;;  %v1915_v32 = vpop.f32.mrf.mxu3 }
 0x2c1   : > { %v1959_v44 = vadd.f32 %v1915_v32, %v1765_v26  ;;  %v1571_v43 = vadd.f32 %v1529_v15, %v3534_v47 }
 0x2c3   : > { %v2153_v58 = vadd.f32 %v2109_v30, %v1959_v44 }
 0x2c5   : > { %2185 = vst [vmem:[%s3554_s25 + $0xd0] sm:$0xff] %v2153_v58  ;;  %v2216_v17 = vadd.f32 %v2215_v24, %v2153_v58  ;;  %v2255_v42 = vmul.f32 %v2153_v58, %v2153_v58 }
 0x2c6   : > { %v1724_v22 = vpop.f32.mrf.mxu2  ;;  %v2112_v37 = vpop.f32.mrf.mxu0 }
 0x2c7   : > { %v2286_v61 = vadd.f32 %v2285_v35, %v2255_v42  ;;  %v1766_v16 = vadd.f32 %v1724_v22, %v1571_v43 }
 0x2c8   : > { %v1532_v46 = vpop.f32.mrf.mxu1  ;;  %v1918_v4 = vpop.f32.mrf.mxu3 }
 0x2c9   : > { %v1960_v60 = vadd.f32 %v1918_v4, %v1766_v16  ;;  %v1572_v21 = vadd.f32 %v1532_v46, %v3537_v53 }
 0x2cb   : > { %v2154_v45 = vadd.f32 %v2112_v37, %v1960_v60 }
 0x2cd   : > { %2186 = vst [vmem:[%s3554_s25 + $0xd8] sm:$0xff] %v2154_v45  ;;  %v2217_v3 = vadd.f32 %v2216_v17, %v2154_v45  ;;  %v2256_v18 = vmul.f32 %v2154_v45, %v2154_v45 }
 0x2ce   : > { %v1727_v59 = vpop.f32.mrf.mxu2  ;;  %v2115_v34 = vpop.f32.mrf.mxu0 }
 0x2cf   : > { %v2287_v47 = vadd.f32 %v2286_v61, %v2256_v18  ;;  %v1767_v54 = vadd.f32 %v1727_v59, %v1572_v21 }
 0x2d0   : > { %v1535_v38 = vpop.f32.mrf.mxu1  ;;  %v1921_v51 = vpop.f32.mrf.mxu3 }
 0x2d1   : > { %v1961_v39 = vadd.f32 %v1921_v51, %v1767_v54  ;;  %v1573_v29 = vadd.f32 %v1535_v38, %v3540_v2 }
 0x2d3   : > { %v2155_v9 = vadd.f32 %v2115_v34, %v1961_v39 }
 0x2d5   : > { %2187 = vst [vmem:[%s3554_s25 + $0xe0] sm:$0xff] %v2155_v9  ;;  %v2218_v14 = vadd.f32 %v2217_v3, %v2155_v9  ;;  %v2257_v23 = vmul.f32 %v2155_v9, %v2155_v9 }
 0x2d6   : > { %v1730_v55 = vpop.f32.mrf.mxu2  ;;  %v2118_v1 = vpop.f32.mrf.mxu0 }
 0x2d7   : > { %v2288_v53 = vadd.f32 %v2287_v47, %v2257_v23  ;;  %v1768_v62 = vadd.f32 %v1730_v55, %v1573_v29 }
 0x2d8   : > { %v1538_v19 = vpop.f32.mrf.mxu1  ;;  %v1924_v31 = vpop.f32.mrf.mxu3 }
 0x2d9   : > { %v1962_v28 = vadd.f32 %v1924_v31, %v1768_v62  ;;  %v1574_v25 = vadd.f32 %v1538_v19, %v3543_v33 }
 0x2db   : > { %v2156_v57 = vadd.f32 %v2118_v1, %v1962_v28 }
 0x2dd   : > { %2188 = vst [vmem:[%s3554_s25 + $0xe8] sm:$0xff] %v2156_v57  ;;  %v2219_v50 = vadd.f32 %v2218_v14, %v2156_v57  ;;  %v2258_v48 = vmul.f32 %v2156_v57, %v2156_v57 }
 0x2de   : > { %v1733_v6 = vpop.f32.mrf.mxu2  ;;  %v2121_v63 = vpop.f32.mrf.mxu0 }
 0x2df   : > { %v2289_v2 = vadd.f32 %v2288_v53, %v2258_v48  ;;  %v1769_v12 = vadd.f32 %v1733_v6, %v1574_v25 }
 0x2e0   : > { %v1927_v36 = vpop.f32.mrf.mxu3  ;;  %v1541_v11 = vpop.f32.mrf.mxu1 }
 0x2e1   : > { %v1963_v41 = vadd.f32 %v1927_v36, %v1769_v12  ;;  %v1575_v10 = vadd.f32 %v1541_v11, %v3546_v40 }
 0x2e3   : > { %v2157_v27 = vadd.f32 %v2121_v63, %v1963_v41 }
 0x2e5   : > { %2189 = vst [vmem:[%s3554_s25 + $0xf0] sm:$0xff] %v2157_v27  ;;  %v2220_v56 = vadd.f32 %v2219_v50, %v2157_v27  ;;  %v2259_v8 = vmul.f32 %v2157_v27, %v2157_v27 }
 0x2e6   : > { %v1736_v7 = vpop.f32.mrf.mxu2  ;;  %v2124_v0 = vpop.f32.mrf.mxu0 }
 0x2e7   : > { %v2290_v33 = vadd.f32 %v2289_v2, %v2259_v8  ;;  %v1770_v20 = vadd.f32 %v1736_v7, %v1575_v10 }
 0x2e8   : > { %v1930_v49 = vpop.f32.mrf.mxu3 }
 0x2e9   : > { %v1964_v52 = vadd.f32 %v1930_v49, %v1770_v20 }
 0x2eb   : > { %v2158_v24 = vadd.f32 %v2124_v0, %v1964_v52 }
 0x2ed   : > { %2190 = vst [vmem:[%s3554_s25 + $0xf8] sm:$0xff] %v2158_v24  ;;  %v2221_v13 = vadd.f32 %v2220_v56, %v2158_v24  ;;  %v2260_v5 = vmul.f32 %v2158_v24, %v2158_v24 }
 0x2ef   : > { %v2222_v30 = vrot.slane %v2221_v13, 4  ;;  %v2291_v35 = vadd.f32 %v2290_v33, %v2260_v5 }
 0x2f1   : > { %v2223_v26 = vadd.f32 %v2222_v30, %v2221_v13  ;;  %v2292_v15 = vrot.slane %v2291_v35, 4 }
 0x2f3   : > { %v2224_v32 = vrot.slane %v2223_v26, 2  ;;  %v2293_v40 = vadd.f32 %v2292_v15, %v2291_v35 }
 0x2f5   : > { %v2225_v44 = vadd.f32 %v2224_v32, %v2223_v26  ;;  %v2294_v58 = vrot.slane %v2293_v40, 2 }
 0x2f7   : > { %v2226_v43 = vrot.slane %v2225_v44, 1  ;;  %v2295_v17 = vadd.f32 %v2294_v58, %v2293_v40 }
 0x2f9   : > { %v2227_v42 = vadd.f32 %v2226_v43, %v2225_v44  ;;  %v2296_v22 = vrot.slane %v2295_v17, 1 }
 0x2fb   : > { %2228 = vst [vmem:[%s235_s29] sm:$0x1] %v2227_v42  ;;  %v2297_v37 = vadd.f32 %v2296_v22, %v2295_v17 }
 0x2fd   : > { %2298 = vst [vmem:[%s235_s29 + $0x1] sm:$0x1] %v2297_v37 }
 0x2fe PF: > { %s16_s18 = sadd.s32 1, %s2595_s18  }
 0x2ff   : > { %p13_p4 = scmp.ge.s32.totalorder %s16_s18, 4  }
 0x301   :  { %15 = sbr.rel (!%p13_p4) target bundleno = 1 (0x1), region = 88 }

</bundles_post_ra>
